<compile_context>
chip_gen: v7x
topology: tpu7x:2x2x1
jax: 0.10.0
libtpu: 0.0.40
codegen_flags: <defaults>
</compile_context>

<pallas_src>
import functools

import jax
import jax.numpy as jnp
from jax.experimental import pallas as pl
from jax.experimental.pallas import tpu as pltpu

VMEM_SPEC = pl.BlockSpec(memory_space=pltpu.MemorySpace.VMEM)
OUT_PAD = 128  # lane-dense width of the final output; real logits = first 4 cols


# ----------------------------- fused Pallas kernel --------------------------

def _gcn5_fused_kernel(a_ref, x_ref,
                       gw0, gw1, gw2, gw3, gw4,
                       gb0, gb1, gb2, gb3, gb4,
                       mw0, mw1, mw2,
                       mb0, mb1, mb2,
                       o_ref, *, num_graphs, nodes_per_graph):
    a = a_ref[...]                                   # [N, N] bf16
    h = x_ref[...]                                   # [N, F0] f32

    gcn_w = (gw0, gw1, gw2, gw3, gw4)
    gcn_b = (gb0, gb1, gb2, gb3, gb4)
    for i in range(5):
        # (A @ H) @ W — cheaper than A @ (H @ W) because Fin < Fout every layer.
        ah = jnp.dot(a, h.astype(jnp.bfloat16),
                     preferred_element_type=jnp.float32)            # [N, Fin] f32
        y = jnp.dot(ah.astype(jnp.bfloat16), gw := gcn_w[i][...],
                    preferred_element_type=jnp.float32) + gcn_b[i][...]
        if i < 4:
            y = jnp.where(y > 0, y, jnp.float32(0.01) * y)          # LeakyReLU(0.01)
        h = y                                                       # [N, Fout] f32

    # global max pool (batch is contiguous with equal nodes per graph; verified
    # on the host before calling).
    parts = []
    for g in range(num_graphs):
        blk = h[g * nodes_per_graph:(g + 1) * nodes_per_graph, :]   # [npg, C]
        parts.append(jnp.max(blk, axis=0, keepdims=True))           # [1, C]
    pooled = jnp.concatenate(parts, axis=0)                         # [G, C] f32

    # classification head: Linear+ReLU, Linear+ReLU, Linear (padded to 128 lanes)
    z = jnp.dot(pooled.astype(jnp.bfloat16), mw0[...],
                preferred_element_type=jnp.float32) + mb0[...]
    z = jnp.maximum(z, jnp.float32(0.0))
    z = jnp.dot(z.astype(jnp.bfloat16), mw1[...],
                preferred_element_type=jnp.float32) + mb1[...]
    z = jnp.maximum(z, jnp.float32(0.0))
    z = jnp.dot(z.astype(jnp.bfloat16), mw2[...],
                preferred_element_type=jnp.float32) + mb2[...]
    o_ref[...] = z.astype(o_ref.dtype)                              # [G, OUT_PAD]


# ------------------------------ glue (plain JAX) ----------------------------

def normalized_adjacency(edge_index, num_nodes):
    """Dense GCN-normalized adjacency with self loops: D^-1/2 (A+I) D^-1/2."""
    a = jnp.zeros((num_nodes, num_nodes), jnp.float32)
    a = a.at[edge_index[0], edge_index[1]].set(1.0)
    a = a + jnp.eye(num_nodes, dtype=jnp.float32)
    deg = jnp.sum(a, axis=1)
    dinv = jax.lax.rsqrt(deg)
    return a * dinv[:, None] * dinv[None, :]


def init_params(key, feature_dim, hidden_dim=32):
    dims = [feature_dim, hidden_dim, hidden_dim * 2, hidden_dim * 4,
            hidden_dim * 8, hidden_dim * 16]
    params = {"gcn_w": [], "gcn_b": [], "mlp_w": [], "mlp_b": []}
    keys = jax.random.split(key, 16)
    ki = 0
    for i in range(5):
        fin, fout = dims[i], dims[i + 1]
        scale = 1.0 / jnp.sqrt(jnp.float32(fin))
        params["gcn_w"].append(jax.random.normal(keys[ki], (fin, fout), jnp.float32) * scale)
        params["gcn_b"].append(jnp.zeros((fout,), jnp.float32))
        ki += 1
    mlp_dims = [hidden_dim * 16, 1024, 512, 4]
    for i in range(3):
        fin, fout = mlp_dims[i], mlp_dims[i + 1]
        scale = 1.0 / jnp.sqrt(jnp.float32(fin))
        params["mlp_w"].append(jax.random.normal(keys[ki], (fin, fout), jnp.float32) * scale)
        params["mlp_b"].append(jnp.zeros((fout,), jnp.float32))
        ki += 1
    return params


def gcn5_forward(params, x, edge_index, batch, num_graphs):
    n = x.shape[0]
    nodes_per_graph = n // num_graphs

    # Contiguous equal-partition batch is assumed by the in-kernel pooling.
    expected = jnp.repeat(jnp.arange(num_graphs, dtype=batch.dtype), nodes_per_graph)
    if batch.shape[0] != n or not bool(jnp.all(batch == expected)):
        # TODO(synk): non-contiguous / ragged `batch` needs masked or segment pooling.
        raise NotImplementedError("gcn5_forward requires contiguous, equal-size graphs")

    a_norm = normalized_adjacency(edge_index, n).astype(jnp.bfloat16)

    gcn_w = [w.astype(jnp.bfloat16) for w in params["gcn_w"]]
    gcn_b = [b.reshape(1, -1) for b in params["gcn_b"]]            # f32 [1, fout]

    # Pad the final linear to OUT_PAD lanes (zeros), so the output store is
    # lane-dense; the real logits are columns [:4].
    w3 = params["mlp_w"][2]
    b3 = params["mlp_b"][2]
    w3p = jnp.zeros((w3.shape[0], OUT_PAD), w3.dtype).at[:, :w3.shape[1]].set(w3)
    b3p = jnp.zeros((OUT_PAD,), b3.dtype).at[:b3.shape[0]].set(b3)

    mlp_w = [params["mlp_w"][0].astype(jnp.bfloat16),
             params["mlp_w"][1].astype(jnp.bfloat16),
             w3p.astype(jnp.bfloat16)]
    mlp_b = [params["mlp_b"][0].reshape(1, -1),
             params["mlp_b"][1].reshape(1, -1),
             b3p.reshape(1, -1)]

    args = [a_norm, x, *gcn_w, *gcn_b, *mlp_w, *mlp_b]

    # Advisory cost estimate for the fused call.
    flops = 0
    for w in params["gcn_w"]:
        fin, fout = w.shape
        flops += 2 * n * n * fin + 2 * n * fin * fout
    for w in mlp_w:
        fin, fout = w.shape
        flops += 2 * num_graphs * fin * fout
    bytes_accessed = sum(int(a.size) * a.dtype.itemsize for a in args)
    bytes_accessed += num_graphs * OUT_PAD * 4
    cost = pl.CostEstimate(flops=flops, transcendentals=0,
                           bytes_accessed=bytes_accessed)

    out_padded = pl.pallas_call(
        functools.partial(_gcn5_fused_kernel,
                          num_graphs=num_graphs,
                          nodes_per_graph=nodes_per_graph),
        out_shape=jax.ShapeDtypeStruct((num_graphs, OUT_PAD), jnp.float32),
        in_specs=[VMEM_SPEC] * len(args),
        out_specs=VMEM_SPEC,
        cost_estimate=cost,
    )(*args)

    return out_padded[:, :4]


# ---------------------------------- main -----------------------------------

if __name__ == "__main__":
    key = jax.random.PRNGKey(0)
    k_feat, k_param = jax.random.split(key)

    feature_dim = 16
    hidden_dim = 32
    num_graphs = 2
    nodes_per_graph = 16
    num_nodes = num_graphs * nodes_per_graph   # 32 nodes total

    # deterministic node features
    x = jax.random.normal(k_feat, (num_nodes, feature_dim), jnp.float32)

    # deterministic ring graph inside each graph of the batch (both directions)
    srcs, dsts = [], []
    for g in range(num_graphs):
        base = g * nodes_per_graph
        for i in range(nodes_per_graph):
            u = base + i
            v = base + (i + 1) % nodes_per_graph
            srcs += [u, v]
            dsts += [v, u]
    edge_index = jnp.array([srcs, dsts], dtype=jnp.int32)   # [2, E]

    batch = jnp.repeat(jnp.arange(num_graphs, dtype=jnp.int32), nodes_per_graph)

    params = init_params(k_param, feature_dim, hidden_dim)

    out = gcn5_forward(params, x, edge_index, batch, num_graphs)
    out = jax.block_until_ready(out)
    assert out.shape == (num_graphs, 4), out.shape
    print("KERNEL_OK")
</pallas_src>

<mosaic_0001>
module attributes {stable_mosaic.version = 11 : i64} {
  func.func @_gcn5_fused_kernel(%arg0: memref<32x32xbf16, #tpu.memory_space<vmem>>, %arg1: memref<32x16xf32, #tpu.memory_space<vmem>>, %arg2: memref<16x32xbf16, #tpu.memory_space<vmem>>, %arg3: memref<32x64xbf16, #tpu.memory_space<vmem>>, %arg4: memref<64x128xbf16, #tpu.memory_space<vmem>>, %arg5: memref<128x256xbf16, #tpu.memory_space<vmem>>, %arg6: memref<256x512xbf16, #tpu.memory_space<vmem>>, %arg7: memref<1x32xf32, #tpu.memory_space<vmem>>, %arg8: memref<1x64xf32, #tpu.memory_space<vmem>>, %arg9: memref<1x128xf32, #tpu.memory_space<vmem>>, %arg10: memref<1x256xf32, #tpu.memory_space<vmem>>, %arg11: memref<1x512xf32, #tpu.memory_space<vmem>>, %arg12: memref<512x1024xbf16, #tpu.memory_space<vmem>>, %arg13: memref<1024x512xbf16, #tpu.memory_space<vmem>>, %arg14: memref<512x128xbf16, #tpu.memory_space<vmem>>, %arg15: memref<1x1024xf32, #tpu.memory_space<vmem>>, %arg16: memref<1x512xf32, #tpu.memory_space<vmem>>, %arg17: memref<1x128xf32, #tpu.memory_space<vmem>>, %arg18: memref<2x128xf32, #tpu.memory_space<vmem>>) attributes {dimension_semantics = [], scalar_prefetch = 0 : i64, scratch_operands = 0 : i64, tpu.core_type = #tpu.core_type<tc>} {
    %c0 = arith.constant 0 : index
    %c0_0 = arith.constant 0 : index
    %0 = vector.load %arg0[%c0, %c0_0] : memref<32x32xbf16, #tpu.memory_space<vmem>>, vector<32x32xbf16>
    %c0_1 = arith.constant 0 : index
    %c0_2 = arith.constant 0 : index
    %1 = vector.load %arg1[%c0_1, %c0_2] : memref<32x16xf32, #tpu.memory_space<vmem>>, vector<32x16xf32>
    %2 = arith.truncf %1 : vector<32x16xf32> to vector<32x16xbf16>
    %cst = arith.constant dense<0.000000e+00> : vector<32x16xf32>
    %3 = tpu.matmul %0, %2, %cst {dimension_numbers = #tpu.dot_dimension_numbers<[1], [0], [0], [1], [0, 0, 1, 1], [], []>} : vector<32x32xbf16>, vector<32x16xbf16>, vector<32x16xf32> -> vector<32x16xf32>
    %4 = arith.truncf %3 : vector<32x16xf32> to vector<32x16xbf16>
    %c0_3 = arith.constant 0 : index
    %c0_4 = arith.constant 0 : index
    %5 = vector.load %arg2[%c0_3, %c0_4] : memref<16x32xbf16, #tpu.memory_space<vmem>>, vector<16x32xbf16>
    %cst_5 = arith.constant dense<0.000000e+00> : vector<32x32xf32>
    %6 = tpu.matmul %4, %5, %cst_5 {dimension_numbers = #tpu.dot_dimension_numbers<[1], [0], [0], [1], [0, 0, 1, 1], [], []>} : vector<32x16xbf16>, vector<16x32xbf16>, vector<32x32xf32> -> vector<32x32xf32>
    %c0_6 = arith.constant 0 : index
    %c0_7 = arith.constant 0 : index
    %7 = vector.load %arg7[%c0_6, %c0_7] : memref<1x32xf32, #tpu.memory_space<vmem>>, vector<1x32xf32>
    %8 = vector.broadcast %7 : vector<1x32xf32> to vector<32x32xf32>
    %9 = arith.addf %6, %8 : vector<32x32xf32>
    %cst_8 = arith.constant 0.000000e+00 : f32
    %10 = vector.broadcast %cst_8 : f32 to vector<32x32xf32>
    %11 = arith.cmpf ogt, %9, %10 : vector<32x32xf32>
    %cst_9 = arith.constant 0.00999999977 : f32
    %12 = vector.broadcast %cst_9 : f32 to vector<32x32xf32>
    %13 = arith.mulf %12, %9 : vector<32x32xf32>
    %14 = arith.select %11, %9, %13 : vector<32x32xi1>, vector<32x32xf32>
    %15 = arith.truncf %14 : vector<32x32xf32> to vector<32x32xbf16>
    %cst_10 = arith.constant dense<0.000000e+00> : vector<32x32xf32>
    %16 = tpu.matmul %0, %15, %cst_10 {dimension_numbers = #tpu.dot_dimension_numbers<[1], [0], [0], [1], [0, 0, 1, 1], [], []>} : vector<32x32xbf16>, vector<32x32xbf16>, vector<32x32xf32> -> vector<32x32xf32>
    %17 = arith.truncf %16 : vector<32x32xf32> to vector<32x32xbf16>
    %c0_11 = arith.constant 0 : index
    %c0_12 = arith.constant 0 : index
    %18 = vector.load %arg3[%c0_11, %c0_12] : memref<32x64xbf16, #tpu.memory_space<vmem>>, vector<32x64xbf16>
    %cst_13 = arith.constant dense<0.000000e+00> : vector<32x64xf32>
    %19 = tpu.matmul %17, %18, %cst_13 {dimension_numbers = #tpu.dot_dimension_numbers<[1], [0], [0], [1], [0, 0, 1, 1], [], []>} : vector<32x32xbf16>, vector<32x64xbf16>, vector<32x64xf32> -> vector<32x64xf32>
    %c0_14 = arith.constant 0 : index
    %c0_15 = arith.constant 0 : index
    %20 = vector.load %arg8[%c0_14, %c0_15] : memref<1x64xf32, #tpu.memory_space<vmem>>, vector<1x64xf32>
    %21 = vector.broadcast %20 : vector<1x64xf32> to vector<32x64xf32>
    %22 = arith.addf %19, %21 : vector<32x64xf32>
    %cst_16 = arith.constant 0.000000e+00 : f32
    %23 = vector.broadcast %cst_16 : f32 to vector<32x64xf32>
    %24 = arith.cmpf ogt, %22, %23 : vector<32x64xf32>
    %cst_17 = arith.constant 0.00999999977 : f32
    %25 = vector.broadcast %cst_17 : f32 to vector<32x64xf32>
    %26 = arith.mulf %25, %22 : vector<32x64xf32>
    %27 = arith.select %24, %22, %26 : vector<32x64xi1>, vector<32x64xf32>
    %28 = arith.truncf %27 : vector<32x64xf32> to vector<32x64xbf16>
    %cst_18 = arith.constant dense<0.000000e+00> : vector<32x64xf32>
    %29 = tpu.matmul %0, %28, %cst_18 {dimension_numbers = #tpu.dot_dimension_numbers<[1], [0], [0], [1], [0, 0, 1, 1], [], []>} : vector<32x32xbf16>, vector<32x64xbf16>, vector<32x64xf32> -> vector<32x64xf32>
    %30 = arith.truncf %29 : vector<32x64xf32> to vector<32x64xbf16>
    %c0_19 = arith.constant 0 : index
    %c0_20 = arith.constant 0 : index
    %31 = vector.load %arg4[%c0_19, %c0_20] : memref<64x128xbf16, #tpu.memory_space<vmem>>, vector<64x128xbf16>
    %cst_21 = arith.constant dense<0.000000e+00> : vector<32x128xf32>
    %32 = tpu.matmul %30, %31, %cst_21 {dimension_numbers = #tpu.dot_dimension_numbers<[1], [0], [0], [1], [0, 0, 1, 1], [], []>} : vector<32x64xbf16>, vector<64x128xbf16>, vector<32x128xf32> -> vector<32x128xf32>
    %c0_22 = arith.constant 0 : index
    %c0_23 = arith.constant 0 : index
    %33 = vector.load %arg9[%c0_22, %c0_23] : memref<1x128xf32, #tpu.memory_space<vmem>>, vector<1x128xf32>
    %34 = vector.broadcast %33 : vector<1x128xf32> to vector<32x128xf32>
    %35 = arith.addf %32, %34 : vector<32x128xf32>
    %cst_24 = arith.constant 0.000000e+00 : f32
    %36 = vector.broadcast %cst_24 : f32 to vector<32x128xf32>
    %37 = arith.cmpf ogt, %35, %36 : vector<32x128xf32>
    %cst_25 = arith.constant 0.00999999977 : f32
    %38 = vector.broadcast %cst_25 : f32 to vector<32x128xf32>
    %39 = arith.mulf %38, %35 : vector<32x128xf32>
    %40 = arith.select %37, %35, %39 : vector<32x128xi1>, vector<32x128xf32>
    %41 = arith.truncf %40 : vector<32x128xf32> to vector<32x128xbf16>
    %cst_26 = arith.constant dense<0.000000e+00> : vector<32x128xf32>
    %42 = tpu.matmul %0, %41, %cst_26 {dimension_numbers = #tpu.dot_dimension_numbers<[1], [0], [0], [1], [0, 0, 1, 1], [], []>} : vector<32x32xbf16>, vector<32x128xbf16>, vector<32x128xf32> -> vector<32x128xf32>
    %43 = arith.truncf %42 : vector<32x128xf32> to vector<32x128xbf16>
    %c0_27 = arith.constant 0 : index
    %c0_28 = arith.constant 0 : index
    %44 = vector.load %arg5[%c0_27, %c0_28] : memref<128x256xbf16, #tpu.memory_space<vmem>>, vector<128x256xbf16>
    %cst_29 = arith.constant dense<0.000000e+00> : vector<32x256xf32>
    %45 = tpu.matmul %43, %44, %cst_29 {dimension_numbers = #tpu.dot_dimension_numbers<[1], [0], [0], [1], [0, 0, 1, 1], [], []>} : vector<32x128xbf16>, vector<128x256xbf16>, vector<32x256xf32> -> vector<32x256xf32>
    %c0_30 = arith.constant 0 : index
    %c0_31 = arith.constant 0 : index
    %46 = vector.load %arg10[%c0_30, %c0_31] : memref<1x256xf32, #tpu.memory_space<vmem>>, vector<1x256xf32>
    %47 = vector.broadcast %46 : vector<1x256xf32> to vector<32x256xf32>
    %48 = arith.addf %45, %47 : vector<32x256xf32>
    %cst_32 = arith.constant 0.000000e+00 : f32
    %49 = vector.broadcast %cst_32 : f32 to vector<32x256xf32>
    %50 = arith.cmpf ogt, %48, %49 : vector<32x256xf32>
    %cst_33 = arith.constant 0.00999999977 : f32
    %51 = vector.broadcast %cst_33 : f32 to vector<32x256xf32>
    %52 = arith.mulf %51, %48 : vector<32x256xf32>
    %53 = arith.select %50, %48, %52 : vector<32x256xi1>, vector<32x256xf32>
    %54 = arith.truncf %53 : vector<32x256xf32> to vector<32x256xbf16>
    %cst_34 = arith.constant dense<0.000000e+00> : vector<32x256xf32>
    %55 = tpu.matmul %0, %54, %cst_34 {dimension_numbers = #tpu.dot_dimension_numbers<[1], [0], [0], [1], [0, 0, 1, 1], [], []>} : vector<32x32xbf16>, vector<32x256xbf16>, vector<32x256xf32> -> vector<32x256xf32>
    %56 = arith.truncf %55 : vector<32x256xf32> to vector<32x256xbf16>
    %c0_35 = arith.constant 0 : index
    %c0_36 = arith.constant 0 : index
    %57 = vector.load %arg6[%c0_35, %c0_36] : memref<256x512xbf16, #tpu.memory_space<vmem>>, vector<256x512xbf16>
    %cst_37 = arith.constant dense<0.000000e+00> : vector<32x512xf32>
    %58 = tpu.matmul %56, %57, %cst_37 {dimension_numbers = #tpu.dot_dimension_numbers<[1], [0], [0], [1], [0, 0, 1, 1], [], []>} : vector<32x256xbf16>, vector<256x512xbf16>, vector<32x512xf32> -> vector<32x512xf32>
    %c0_38 = arith.constant 0 : index
    %c0_39 = arith.constant 0 : index
    %59 = vector.load %arg11[%c0_38, %c0_39] : memref<1x512xf32, #tpu.memory_space<vmem>>, vector<1x512xf32>
    %60 = vector.broadcast %59 : vector<1x512xf32> to vector<32x512xf32>
    %61 = arith.addf %58, %60 : vector<32x512xf32>
    %62 = vector.extract_strided_slice %61 {offsets = [0, 0], sizes = [16, 512], strides = [1, 1]} : vector<32x512xf32> to vector<16x512xf32>
    %cst_40 = arith.constant dense<0xFF800000> : vector<512xf32>
    %63 = vector.multi_reduction <maximumf>, %62, %cst_40 [0] : vector<16x512xf32> to vector<512xf32>
    %64 = vector.shape_cast %63 : vector<512xf32> to vector<1x512xf32>
    %65 = vector.extract_strided_slice %61 {offsets = [16, 0], sizes = [16, 512], strides = [1, 1]} : vector<32x512xf32> to vector<16x512xf32>
    %cst_41 = arith.constant dense<0xFF800000> : vector<512xf32>
    %66 = vector.multi_reduction <maximumf>, %65, %cst_41 [0] : vector<16x512xf32> to vector<512xf32>
    %67 = vector.shape_cast %66 : vector<512xf32> to vector<1x512xf32>
    %68 = tpu.concatenate %64, %67 in 0 : vector<1x512xf32>, vector<1x512xf32> -> vector<2x512xf32>
    %69 = arith.truncf %68 : vector<2x512xf32> to vector<2x512xbf16>
    %c0_42 = arith.constant 0 : index
    %c0_43 = arith.constant 0 : index
    %70 = vector.load %arg12[%c0_42, %c0_43] : memref<512x1024xbf16, #tpu.memory_space<vmem>>, vector<512x1024xbf16>
    %cst_44 = arith.constant dense<0.000000e+00> : vector<2x1024xf32>
    %71 = tpu.matmul %69, %70, %cst_44 {dimension_numbers = #tpu.dot_dimension_numbers<[1], [0], [0], [1], [0, 0, 1, 1], [], []>} : vector<2x512xbf16>, vector<512x1024xbf16>, vector<2x1024xf32> -> vector<2x1024xf32>
    %c0_45 = arith.constant 0 : index
    %c0_46 = arith.constant 0 : index
    %72 = vector.load %arg15[%c0_45, %c0_46] : memref<1x1024xf32, #tpu.memory_space<vmem>>, vector<1x1024xf32>
    %73 = vector.broadcast %72 : vector<1x1024xf32> to vector<2x1024xf32>
    %74 = arith.addf %71, %73 : vector<2x1024xf32>
    %cst_47 = arith.constant 0.000000e+00 : f32
    %75 = vector.broadcast %cst_47 : f32 to vector<2x1024xf32>
    %76 = arith.maximumf %74, %75 : vector<2x1024xf32>
    %77 = arith.truncf %76 : vector<2x1024xf32> to vector<2x1024xbf16>
    %c0_48 = arith.constant 0 : index
    %c0_49 = arith.constant 0 : index
    %78 = vector.load %arg13[%c0_48, %c0_49] : memref<1024x512xbf16, #tpu.memory_space<vmem>>, vector<1024x512xbf16>
    %cst_50 = arith.constant dense<0.000000e+00> : vector<2x512xf32>
    %79 = tpu.matmul %77, %78, %cst_50 {dimension_numbers = #tpu.dot_dimension_numbers<[1], [0], [0], [1], [0, 0, 1, 1], [], []>} : vector<2x1024xbf16>, vector<1024x512xbf16>, vector<2x512xf32> -> vector<2x512xf32>
    %c0_51 = arith.constant 0 : index
    %c0_52 = arith.constant 0 : index
    %80 = vector.load %arg16[%c0_51, %c0_52] : memref<1x512xf32, #tpu.memory_space<vmem>>, vector<1x512xf32>
    %81 = vector.broadcast %80 : vector<1x512xf32> to vector<2x512xf32>
    %82 = arith.addf %79, %81 : vector<2x512xf32>
    %cst_53 = arith.constant 0.000000e+00 : f32
    %83 = vector.broadcast %cst_53 : f32 to vector<2x512xf32>
    %84 = arith.maximumf %82, %83 : vector<2x512xf32>
    %85 = arith.truncf %84 : vector<2x512xf32> to vector<2x512xbf16>
    %c0_54 = arith.constant 0 : index
    %c0_55 = arith.constant 0 : index
    %86 = vector.load %arg14[%c0_54, %c0_55] : memref<512x128xbf16, #tpu.memory_space<vmem>>, vector<512x128xbf16>
    %cst_56 = arith.constant dense<0.000000e+00> : vector<2x128xf32>
    %87 = tpu.matmul %85, %86, %cst_56 {dimension_numbers = #tpu.dot_dimension_numbers<[1], [0], [0], [1], [0, 0, 1, 1], [], []>} : vector<2x512xbf16>, vector<512x128xbf16>, vector<2x128xf32> -> vector<2x128xf32>
    %c0_57 = arith.constant 0 : index
    %c0_58 = arith.constant 0 : index
    %88 = vector.load %arg17[%c0_57, %c0_58] : memref<1x128xf32, #tpu.memory_space<vmem>>, vector<1x128xf32>
    %89 = vector.broadcast %88 : vector<1x128xf32> to vector<2x128xf32>
    %90 = arith.addf %87, %89 : vector<2x128xf32>
    %c0_59 = arith.constant 0 : index
    %c0_60 = arith.constant 0 : index
    %91 = vector.load %arg18[%c0_59, %c0_60] : memref<2x128xf32, #tpu.memory_space<vmem>>, vector<2x128xf32>
    tpu.vector_store %arg18[%c0_59, %c0_60], %90 {strides = array<i32>} : memref<2x128xf32, #tpu.memory_space<vmem>>, vector<2x128xf32>,
    return
  }
}

</mosaic_0001>

<bundles_post_ra>
// kernel: tpu_custom_call.1
= control target key start
LH: loop header
LB: loop body
LE: loop exit
PB: predicated region body
PF: predicated region fallthrough
CT: control target
= control target key end

     0   :  { %s7679_s0 = inlined_call_operand.vmem [shape: bf16[32,32], index: 0, kind: input, shape index: {}]   ;;  %s7680_s1 = inlined_call_operand.vmem [shape: f32[32,16], index: 1, kind: input, shape index: {}]   ;;  %s7681_s2 = inlined_call_operand.vmem [shape: bf16[16,32], index: 2, kind: input, shape index: {}]   ;;  %s7682_s3 = inlined_call_operand.hbm [shape: bf16[32,64], index: 3, kind: input, shape index: {}]   ;;  %s7683_s4 = inlined_call_operand.vmem [shape: bf16[64,128], index: 4, kind: input, shape index: {}]   ;;  %s7684_s5 = inlined_call_operand.hbm [shape: bf16[128,256], index: 5, kind: input, shape index: {}]   ;;  %s7685_s6 = inlined_call_operand.hbm [shape: bf16[256,512], index: 6, kind: input, shape index: {}]   ;;  %s7686_s7 = inlined_call_operand.hbm [shape: f32[1,32], index: 7, kind: input, shape index: {}]   ;;  %s7687_s8 = inlined_call_operand.vmem [shape: f32[1,64], index: 8, kind: input, shape index: {}]   ;;  %s7688_s9 = inlined_call_operand.vmem [shape: f32[1,128], index: 9, kind: input, shape index: {}]   ;;  %s7689_s10 = inlined_call_operand.vmem [shape: f32[1,256], index: 10, kind: input, shape index: {}]   ;;  %s7690_s11 = inlined_call_operand.vmem [shape: f32[1,512], index: 11, kind: input, shape index: {}]   ;;  %s7691_s12 = inlined_call_operand.hbm [shape: bf16[512,1024], index: 12, kind: input, shape index: {}]   ;;  %s7692_s13 = inlined_call_operand.hbm [shape: bf16[1024,512], index: 13, kind: input, shape index: {}]   ;;  %s7693_s14 = inlined_call_operand.hbm [shape: bf16[512,128], index: 14, kind: input, shape index: {}]   ;;  %s7694_s15 = inlined_call_operand.vmem [shape: f32[1,1024], index: 15, kind: input, shape index: {}]   ;;  %s7695_s16 = inlined_call_operand.vmem [shape: f32[1,512], index: 16, kind: input, shape index: {}]   ;;  %s7696_s17 = inlined_call_operand.vmem [shape: f32[1,128], index: 17, kind: input, shape index: {}]   ;;  %s7697_s18 = inlined_call_operand.hbm [shape: f32[2,128], index: 18, kind: output, shape index: {}]  }
   0x1   :  { %7700 = sst [smem:[#allocation20_spill]] %s7679_s0 }
   0x2   :  { %7701 = sst [smem:[#allocation21_spill]] %s7680_s1 }
   0x3   :  { %7702 = sst [smem:[#allocation22_spill]] %s7681_s2 }
   0x4   :  { %23 = vsyncpa [#allocation3], 0 }
   0x5   :  { %24 = vsyncpa [#allocation6], 0 }
   0x6   :  { %25 = vsyncpa [#allocation9], 0 }
   0x7   :  { %26 = vsyncpa [#allocation12], 0 }
   0x8   :  { %27 = vsyncpa [#allocation4], 0  ;;  %s7258_s27 = smov [#allocation5]   ;;  %s7072_s0 = scalar_lea.hbm %s7684_s5, 2048 }
   0x9   :  { %s53_s28 = sshll.u32 %s7258_s27, 4  ;;  %p7073_p0 = scmp.ne.s32.totalorder %s7684_s5, %s7072_s0  ;;  %s54_s28 = int_to_ptr.vmem [resolvable:$true] %s53_s28 }
   0xa   :  { %p7076_p1 = scmp.lt.u32.totalorder %s7072_s0, %s7684_s5 }
   0xc   :  { %p7078_p2 = pnand %p7076_p1, %p7073_p0 }
   0xe   :  { %7081 = shalt.err (!%p7078_p2)
}
   0xf   :  { %s7082_s22 = scalar_lea.vmem %s54_s28, 2048  ;;  %p7087_p4 = scmp.lt.s32.totalorder %s54_s28, %s54_s28 }
  0x10   :  { %p7083_p3 = scmp.ne.s32.totalorder %s54_s28, %s7082_s22  ;;  %p7088_p5 = scmp.lt.s32.totalorder %s7082_s22, %s7082_s22 }
  0x12   :  { %p7089_p6 = por %p7088_p5, %p7087_p4 }
  0x14   :  { %p7090_p7 = pnand %p7089_p6, %p7083_p3 }
  0x16   :  { %7093 = shalt.err (!%p7090_p7)
}
  0x17   :  { %s7259_s2 = smov 128   ;;  %s7260_s23 = smov 8  }
  0x18   :  { %59 = dma.hbm_to_vmem [thread:$0]  %s7684_s5, 2048, %s54_s28, [#allocation6], %s7259_s2, %s7259_s2, %s7260_s23  }
  0x19   :  { %s7261_s26 = smov [#allocation8]   ;;  %s7094_s0 = scalar_lea.hbm %s7686_s7, 16 }
  0x1a   :  { %s78_s27 = sshll.u32 %s7261_s26, 4  ;;  %p7095_p8 = scmp.ne.s32.totalorder %s7686_s7, %s7094_s0  ;;  %s79_s27 = int_to_ptr.vmem [resolvable:$true] %s78_s27 }
  0x1b   :  { %p7098_p9 = scmp.lt.u32.totalorder %s7094_s0, %s7686_s7 }
  0x1d   :  { %p7100_p10 = pnand %p7098_p9, %p7095_p8 }
  0x1f   :  { %7103 = shalt.err (!%p7100_p10)
}
  0x20   :  { %s7104_s22 = scalar_lea.vmem %s79_s27, 16  ;;  %s7108_s5 = scalar_lea.vmem %s79_s27, 32 }
  0x21   :  { %p7105_p11 = scmp.ne.s32.totalorder %s79_s27, %s7104_s22  ;;  %p7109_p12 = scmp.lt.s32.totalorder %s79_s27, %s79_s27 }
  0x22   :  { %p7110_p13 = scmp.lt.s32.totalorder %s7108_s5, %s7104_s22 }
  0x24   :  { %p7111_p0 = por %p7110_p13, %p7109_p12 }
  0x26   :  { %p7112_p1 = pnand %p7111_p0, %p7105_p11 }
  0x28   :  { %7115 = shalt.err (!%p7112_p1)
}
  0x29   :  { %81 = dma.hbm_to_vmem [thread:$0]  %s7686_s7, 16, %s79_s27, [#allocation9]  }
  0x2a   :  { %s7262_s23 = smov [#allocation11]   ;;  %s7263_s25 = smov [#allocation2]  }
  0x2b   :  { %s107_s24 = sshll.u32 %s7262_s23, 4  ;;  %s39_s26 = sshll.u32 %s7263_s25, 4  ;;  %s108_s24 = int_to_ptr.vmem [resolvable:$true] %s107_s24  ;;  %s7394_s26 = int_to_ptr.vmem [resolvable:$true] %s39_s26 }
  0x2c   :  { %s7116_s0 = scalar_lea.hbm %s7692_s13, 32768 }
  0x2d   :  { %p7117_p2 = scmp.ne.s32.totalorder %s7692_s13, %s7116_s0  ;;  %p7120_p3 = scmp.lt.u32.totalorder %s7116_s0, %s7692_s13 }
  0x2f   :  { %p7122_p4 = pnand %p7120_p3, %p7117_p2 }
  0x31   :  { %7125 = shalt.err (!%p7122_p4)
}
  0x32   :  { %s7126_s7 = scalar_lea.vmem %s108_s24, 32768  ;;  %p7131_p6 = scmp.lt.s32.totalorder %s108_s24, %s108_s24 }
  0x33   :  { %p7127_p5 = scmp.ne.s32.totalorder %s108_s24, %s7126_s7  ;;  %p7132_p7 = scmp.lt.s32.totalorder %s7126_s7, %s7126_s7 }
  0x35   :  { %p7133_p8 = por %p7132_p7, %p7131_p6 }
  0x37   :  { %p7134_p9 = pnand %p7133_p8, %p7127_p5 }
  0x39   :  { %7137 = shalt.err (!%p7134_p9)
}
  0x3a   :  { %s7264_s27 = smov 256   ;;  %s7265_s22 = smov 16  }
  0x3b   :  { %113 = dma.hbm_to_vmem [thread:$0]  %s7692_s13, 32768, %s108_s24, [#allocation12], %s7264_s27, %s7264_s27, %s7265_s22  }
  0x3c   :  { %s7138_s25 = scalar_lea.hbm %s7682_s3, 256 }
  0x3d   :  { %p7139_p10 = scmp.ne.s32.totalorder %s7682_s3, %s7138_s25  ;;  %p7142_p11 = scmp.lt.u32.totalorder %s7138_s25, %s7682_s3 }
  0x3f   :  { %p7144_p12 = pnand %p7142_p11, %p7139_p10 }
  0x41   :  { %7147 = shalt.err (!%p7144_p12)
}
  0x42   :  { %s7148_s1 = scalar_lea.vmem %s7394_s26, 256  ;;  %p7153_p0 = scmp.lt.s32.totalorder %s7394_s26, %s7394_s26 }
  0x43   :  { %p7149_p13 = scmp.ne.s32.totalorder %s7394_s26, %s7148_s1  ;;  %p7154_p1 = scmp.lt.s32.totalorder %s7148_s1, %s7148_s1 }
  0x45   :  { %p7155_p2 = por %p7154_p1, %p7153_p0 }
  0x47   :  { %p7156_p3 = pnand %p7155_p2, %p7149_p13 }
  0x49   :  { %7159 = shalt.err (!%p7156_p3)
}
  0x4a   :  { %s7266_s13 = smov 64   ;;  %s7267_s24 = smov 4  }
  0x4b   :  { %45 = dma.hbm_to_vmem [thread:$0]  %s7682_s3, 256, %s7394_s26, [#allocation3], %s7266_s13, %s7266_s13, %s7267_s24  }
  0x4c   :  { %s7268_s7 = smov [#allocation7]   ;;  %s7269_s28 = smov [#allocation10]  }
  0x4d   :  { %s65_s5 = sshll.u32 %s7268_s7, 4  ;;  %s95_s2 = sshll.u32 %s7269_s28, 4  ;;  %s66_s5 = int_to_ptr.vmem [resolvable:$true] %s65_s5  ;;  %s7431_s2 = int_to_ptr.vmem [resolvable:$true] %s95_s2 }
  0x4e   :  { %s7160_s29 = scalar_lea.hbm %s7685_s6, 8192 }
  0x4f   :  { %p7161_p4 = scmp.ne.s32.totalorder %s7685_s6, %s7160_s29  ;;  %p7164_p5 = scmp.lt.u32.totalorder %s7160_s29, %s7685_s6 }
  0x51   :  { %p7166_p6 = pnand %p7164_p5, %p7161_p4 }
  0x53   :  { %7169 = shalt.err (!%p7166_p6)
}
  0x54   :  { %s7170_s3 = scalar_lea.vmem %s66_s5, 8192  ;;  %p7175_p8 = scmp.lt.s32.totalorder %s66_s5, %s66_s5 }
  0x55   :  { %p7171_p7 = scmp.ne.s32.totalorder %s66_s5, %s7170_s3  ;;  %p7176_p9 = scmp.lt.s32.totalorder %s7170_s3, %s7170_s3 }
  0x57   :  { %p7177_p10 = por %p7176_p9, %p7175_p8 }
  0x59   :  { %p7178_p11 = pnand %p7177_p10, %p7171_p7 }
  0x5b   :  { %7181 = shalt.err (!%p7178_p11)
}
  0x5c   :  { %71 = dma.hbm_to_vmem [thread:$0]  %s7685_s6, 8192, %s66_s5, [#allocation6], %s7264_s27, %s7264_s27, %s7265_s22  }
  0x5d   :  { %s7182_s28 = scalar_lea.hbm %s7691_s12, 32768 }
  0x5e   :  { %p7183_p12 = scmp.ne.s32.totalorder %s7691_s12, %s7182_s28  ;;  %p7186_p13 = scmp.lt.u32.totalorder %s7182_s28, %s7691_s12 }
  0x60   :  { %p7188_p0 = pnand %p7186_p13, %p7183_p12 }
  0x62   :  { %7191 = shalt.err (!%p7188_p0)
}
  0x63   :  { %s7192_s0 = scalar_lea.vmem %s7431_s2, 32768  ;;  %p7197_p2 = scmp.lt.s32.totalorder %s7431_s2, %s7431_s2 }
  0x64   :  { %p7193_p1 = scmp.ne.s32.totalorder %s7431_s2, %s7192_s0  ;;  %p7198_p3 = scmp.lt.s32.totalorder %s7192_s0, %s7192_s0 }
  0x66   :  { %p7199_p4 = por %p7198_p3, %p7197_p2 }
  0x68   :  { %p7200_p5 = pnand %p7199_p4, %p7193_p1 }
  0x6a   :  { %7203 = shalt.err (!%p7200_p5)
}
  0x6b   :  { %s7270_s6 = smov 512   ;;  %s7271_s27 = smov 32  }
  0x6c   :  { %101 = dma.hbm_to_vmem [thread:$0]  %s7691_s12, 32768, %s7431_s2, [#allocation9], %s7270_s6, %s7270_s6, %s7271_s27  }
  0x6d   :  { %s7272_s19 = smov [#allocation13]   ;;  %s7204_s20 = scalar_lea.hbm %s7693_s14, 4096 }
  0x6e   :  { %s119_s1 = sshll.u32 %s7272_s19, 4  ;;  %p7205_p6 = scmp.ne.s32.totalorder %s7693_s14, %s7204_s20  ;;  %s120_s1 = int_to_ptr.vmem [resolvable:$true] %s119_s1 }
  0x6f   :  { %p7208_p7 = scmp.lt.u32.totalorder %s7204_s20, %s7693_s14 }
  0x71   :  { %p7210_p8 = pnand %p7208_p7, %p7205_p6 }
  0x73   :  { %7213 = shalt.err (!%p7210_p8)
}
  0x74   :  { %s7214_s25 = scalar_lea.vmem %s120_s1, 4096  ;;  %p7219_p10 = scmp.lt.s32.totalorder %s120_s1, %s120_s1 }
  0x75   :  { %p7215_p9 = scmp.ne.s32.totalorder %s120_s1, %s7214_s25  ;;  %p7220_p11 = scmp.lt.s32.totalorder %s7214_s25, %s7214_s25 }
  0x77   :  { %p7221_p12 = por %p7220_p11, %p7219_p10 }
  0x79   :  { %p7222_p13 = pnand %p7221_p12, %p7215_p9 }
  0x7b   :  { %7225 = shalt.err (!%p7222_p13)
}
  0x7c   :  { %125 = dma.hbm_to_vmem [thread:$0]  %s7693_s14, 4096, %s120_s1, [#allocation12], %s7266_s13, %s7266_s13, %s7267_s24  }
  0x7d   :  { %7248 = dma.done.wait [#allocation3], 256  }
  0x7e   :  { %7249 = vsyncadd [#allocation3], 4294967040 }
  0x7f   :  { %7250 = dma.done.wait [#allocation6], 10240  }
  0x80   :  { %7251 = vsyncadd [#allocation6], 4294957056 }
  0x81   :  { %7252 = dma.done.wait [#allocation9], 32784  }
  0x82   :  { %7253 = vsyncadd [#allocation9], 4294934512 }
  0x83   :  { %7254 = dma.done.wait [#allocation12], 36864  }
  0x84   :  { %7255 = vsyncadd [#allocation12], 4294930432  ;;  %s7703_s0 = sld [smem:[#allocation21_spill]]  ;;  %vm174_vm0 = vcmask 261120   ;;  %s7704_s1 = sld [smem:[#allocation20_spill]]  ;;  %vm247_vm1 = vcmask 130048  }
  0x85   :  { %s7705_s7 = sld [smem:[#allocation22_spill]]  ;;  %v5676_v15 = vld [vmem:[#allocation8] ss:$0 sm:$0xff]  ;;  %v6528_v34 = vld [vmem:[#allocation2] sm:$0xff]   ;;  %v6529_v35 = vld [vmem:[#allocation2 + $0x8] sm:$0xff]   ;;  %vm550_vm10 = vcmask 523264  }
  0x86   :  { %v6530_v42 = vld [vmem:[%s7683_s4] sm:$0xff]   ;;  %v6531_v43 = vld [vmem:[%s7683_s4 + $0x8] sm:$0xff]   ;;  %v6532_v44 = vld [vmem:[%s7683_s4 + $0x10] sm:$0xff]   ;;  %s7274_s20 = smov [#allocation14]  }
  0x87   :  { %v5682_v45 = vld [vmem:[%s7687_s8] ss:$0 sm:$0xff]  ;;  %s5660_s21 = sshll.u32 %s7274_s20, 4  ;;  %s5661_s21 = int_to_ptr.vmem [resolvable:$true] %s5660_s21 }
  0x88   :  { %p7231_p1 = scmp.lt.s32.totalorder %s5661_s21, %s5661_s21 }
  0x8a   :  { %v158_v0 = vld [vmem:[%s7703_s0] sm:$0xff]  ;;  %v159_v1 = vld [vmem:[%s7703_s0 + $0x8] sm:$0xff]  ;;  %v160_v2 = vld [vmem:[%s7703_s0 + $0x10] sm:$0xff] }
  0x8b   :  { %v162_v3 = vpack.c.bf16 %v159_v1, %v158_v0  ;;  %v161_v4 = vld [vmem:[%s7703_s0 + $0x18] sm:$0xff]  ;;  %v6525_v6 = vld [vmem:[%s7704_s1] sm:$0xff]   ;;  %v7499_v7 = vld [vmem:[%s7704_s1 + $0x8] sm:$0xff]  }
  0x8c   :  { %v163_v5 = vpack.c.bf16 %v161_v4, %v160_v2  ;;  %6402 = vmatprep.mubr.msk.bf16.mxu0 %vm174_vm0, %v6525_v6  ;;  %v6527_v8 = vld [vmem:[%s7705_s7] sm:$0xff]   ;;  %v6533_v1 = vld [vmem:[%s7683_s4 + $0x18] sm:$0xff]   ;;  %s7226_s7 = scalar_lea.vmem %s5661_s21, 32 }
  0x8d   :  { %6398 = vmatprep.subr.bf16.mxu0 %v162_v3  ;;  %6406 = vmatprep.subr.bf16.mxu1 %v6527_v8  ;;  %v7529_v0 = vld [vmem:[%s7704_s1] sm:$0xff]   ;;  %p7227_p0 = scmp.ne.s32.totalorder %s5661_s21, %s7226_s7  ;;  %p7232_p2 = scmp.lt.s32.totalorder %s7226_s7, %s7226_s7 }
  0x8e   :  { %6399 = vmatpush3.bf16.msra.mxu0 %v162_v3  ;;  %6407 = vmatpush3.bf16.msra.mxu1 %v6527_v8  ;;  %v5689_v8 = vld [vmem:[%s7688_s9] ss:$0 sm:$0xff] }
  0x8f   :  { %6400 = vmatprep.subr.bf16.mxu0 %v163_v5  ;;  %p7233_p3 = por %p7232_p2, %p7231_p1 }
  0x91   :  { %p7234_p4 = pnand %p7233_p3, %p7227_p0 }
  0x92   :  { %6401 = vmatpush3.bf16.msra.mxu0 %v163_v5 }
  0x95   :  { %6403 = vmatmul.mubr.msk.bf16.vlgmr.msra.gmra.mrb[0].mxu0 %vm174_vm0, %v7499_v7 }
  0x96   :  { %6416 = vmatprep.mubr.msk.bf16.mxu0 %vm174_vm0, %v6525_v6 }
 0x168   :  { %v6404_v9 = vpop.f32.mrb[0].mxu0 }
 0x169   :  { %v215_v10 = vpop.f32.mrb[1].mxu0 }
 0x16a   :  { %v6405_v11 = vpop.f32.mrb[2].mxu0 }
 0x16b   :  { %v231_v12 = vpack.c.bf16 %v6405_v11, %v6404_v9  ;;  %v218_v13 = vpop.f32.mrb[3].mxu0 }
 0x16c   :  { %v230_v14 = vpack.c.bf16 %v218_v13, %v215_v10 }
 0x16e   :  { %6408 = vmatprep.mubr.msk.bf16.mxu1 %vm247_vm1, %v230_v14 }
 0x16f   :  { %6409 = vmatmul.mubr.msk.bf16.vlgmr.msra.gmra.mrb[0].mxu1 %vm247_vm1, %v231_v12 }
 0x170   :  { %6432 = vmatprep.mubr.msk.bf16.mxu1 %vm174_vm0, %v6525_v6 }
 0x242   :  { %v6410_v16 = vpop.f32.mrb[0].mxu1 }
 0x243   :  { %v297_v17 = vadd.f32 %v6410_v16, %v5676_v15  ;;  %v288_v18 = vpop.f32.mrb[1].mxu1 }
 0x244   :  { %v289_v19 = vadd.f32 %v5676_v15, %v288_v18  ;;  %v6411_v20 = vpop.f32.mrb[2].mxu1 }
 0x245   :  { %v309_v21 = vmul.f32 0.01, %v297_v17  ;;  %v300_v22 = vadd.f32 %v6411_v20, %v5676_v15  ;;  %v291_v23 = vpop.f32.mrb[3].mxu1  ;;  %vm305_vm2 = vcmp.gt.f32.partialorder %v297_v17, 0.0 }
 0x246   :  { %v307_v24 = vmul.f32 0.01, %v289_v19  ;;  %v292_v25 = vadd.f32 %v5676_v15, %v291_v23  ;;  %vm303_vm3 = vcmp.gt.f32.partialorder %v289_v19, 0.0 }
 0x247   :  { %vm306_vm4 = vcmp.gt.f32.partialorder %v300_v22, 0.0  ;;  %v310_v26 = vmul.f32 0.01, %v300_v22  ;;  %v313_v28 = vsel %vm305_vm2, %v297_v17, %v309_v21 }
 0x248   :  { %vm304_vm5 = vcmp.gt.f32.partialorder %v292_v25, 0.0  ;;  %v308_v27 = vmul.f32 0.01, %v292_v25  ;;  %v311_v30 = vsel %vm303_vm3, %v289_v19, %v307_v24 }
 0x249   :  { %v314_v29 = vsel %vm306_vm4, %v300_v22, %v310_v26 }
 0x24a   :  { %v312_v31 = vsel %vm304_vm5, %v292_v25, %v308_v27  ;;  %v316_v32 = vpack.c.bf16 %v314_v29, %v313_v28  ;;  %v6536_v27 = vld [vmem:[#allocation5 + $0x4] ss:$8 sps:$4 sm:$0xff]   ;;  %v6534_v28 = vld [vmem:[#allocation5] ss:$8 sps:$4 sm:$0xff]   ;;  %v6539_v29 = vld [vmem:[#allocation5 + $0x14] ss:$8 sps:$4 sm:$0xff]  }
 0x24b   :  { %v315_v33 = vpack.c.bf16 %v312_v31, %v311_v30  ;;  %v7542_v30 = vld [vmem:[%s7704_s1 + $0x8] sm:$0xff]  }
 0x24c   :  { %v6537_v31 = vld [vmem:[#allocation5 + $0x10] ss:$8 sps:$4 sm:$0xff]  }
 0x24d   :  { %6412 = vmatprep.subr.bf16.mxu0 %v315_v33 }
 0x24e   :  { %6413 = vmatpush3.bf16.msra.mxu0 %v315_v33  ;;  %v6540_v33 = vld [vmem:[#allocation5 + $0x20] ss:$8 sps:$4 sm:$0xff]  }
 0x24f   :  { %6414 = vmatprep.subr.bf16.mxu0 %v316_v32 }
 0x252   :  { %6415 = vmatpush3.bf16.msra.mxu0 %v316_v32  ;;  %v6542_v32 = vld [vmem:[#allocation5 + $0x24] ss:$8 sps:$4 sm:$0xff]  }
 0x253   :  { %6420 = vmatprep.subr.bf16.mxu0 %v6528_v34 }
 0x255   :  { %6417 = vmatmul.mubr.msk.bf16.vlgmr.msra.gmra.mrb[4].mxu0 %vm174_vm0, %v7499_v7 }
 0x256   :  { %6421 = vmatpush3.bf16.msra.mxu0 %v6528_v34  ;;  %v6545_v34 = vld [vmem:[#allocation5 + $0x34] ss:$8 sps:$4 sm:$0xff]  }
 0x257   :  { %6422 = vmatprep.subr.bf16.mxu0 %v6529_v35 }
 0x25a   :  { %6423 = vmatpush3.bf16.msra.mxu0 %v6529_v35  ;;  %v6543_v35 = vld [vmem:[#allocation5 + $0x30] ss:$8 sps:$4 sm:$0xff]  }
 0x25b   :  { %6436 = vmatprep.subr.bf16.mxu0 %v6530_v42 }
 0x328   :  { %v6418_v36 = vpop.f32.mrb[4].mxu0 }
 0x329   :  { %v351_v37 = vpop.f32.mrb[5].mxu0 }
 0x32a   :  { %v6419_v38 = vpop.f32.mrb[6].mxu0 }
 0x32b   :  { %v367_v39 = vpack.c.bf16 %v6419_v38, %v6418_v36  ;;  %v354_v40 = vpop.f32.mrb[7].mxu0  ;;  %v6548_v36 = vld [vmem:[#allocation5 + $0x44] ss:$8 sps:$4 sm:$0xff]   ;;  %v6551_v38 = vld [vmem:[#allocation5 + $0x54] ss:$8 sps:$4 sm:$0xff]  }
 0x32c   :  { %v366_v41 = vpack.c.bf16 %v354_v40, %v351_v37  ;;  %v6546_v37 = vld [vmem:[#allocation5 + $0x40] ss:$8 sps:$4 sm:$0xff]   ;;  %v6554_v40 = vld [vmem:[#allocation5 + $0x64] ss:$8 sps:$4 sm:$0xff]  }
 0x32e   :  { %6424 = vmatprep.mubr.msk.bf16.mxu0 %vm174_vm0, %v366_v41  ;;  %v6552_v41 = vld [vmem:[#allocation5 + $0x60] ss:$8 sps:$4 sm:$0xff]  }
 0x32f   :  { %6425 = vmatmul.mubr.msk.bf16.vlgmr.msra.gmra.mrb[8].mxu0 %vm174_vm0, %v367_v39  ;;  %v6549_v39 = vld [vmem:[#allocation5 + $0x50] ss:$8 sps:$4 sm:$0xff]  }
 0x330   :  { %6437 = vmatpush3.bf16.msra.mxu0 %v6530_v42  ;;  %v6557_v42 = vld [vmem:[#allocation5 + $0x74] ss:$8 sps:$4 sm:$0xff]  }
 0x331   :  { %6438 = vmatprep.subr.bf16.mxu0 %v6531_v43 }
 0x334   :  { %6439 = vmatpush3.bf16.msra.mxu0 %v6531_v43  ;;  %v6555_v43 = vld [vmem:[#allocation5 + $0x70] ss:$8 sps:$4 sm:$0xff]  }
 0x335   :  { %6440 = vmatprep.subr.bf16.mxu0 %v6532_v44 }
 0x338   :  { %6441 = vmatpush3.bf16.msra.mxu0 %v6532_v44  ;;  %v7273_v44 = vmov 0  }
 0x339   :  { %6442 = vmatprep.subr.bf16.mxu0 %v6533_v1 }
 0x33c   :  { %6443 = vmatpush3.bf16.msra.mxu0 %v6533_v1  ;;  %v6597_v1 = vld [vmem:[#allocation7 + $0xc8] ss:$16 sps:$4 sm:$0xff]  }
 0x402   :  { %v6426_v46 = vpop.f32.mrb[8].mxu0 }
 0x403   :  { %v440_v47 = vadd.f32 %v6426_v46, %v5682_v45  ;;  %v431_v48 = vpop.f32.mrb[9].mxu0 }
 0x404   :  { %v432_v49 = vadd.f32 %v5682_v45, %v431_v48  ;;  %v6427_v50 = vpop.f32.mrb[10].mxu0 }
 0x405   :  { %v452_v51 = vmul.f32 0.01, %v440_v47  ;;  %v443_v52 = vadd.f32 %v6427_v50, %v5682_v45  ;;  %v434_v53 = vpop.f32.mrb[11].mxu0  ;;  %vm448_vm6 = vcmp.gt.f32.partialorder %v440_v47, 0.0 }
 0x406   :  { %v450_v54 = vmul.f32 0.01, %v432_v49  ;;  %v435_v55 = vadd.f32 %v5682_v45, %v434_v53  ;;  %vm446_vm7 = vcmp.gt.f32.partialorder %v432_v49, 0.0  ;;  %v6569_v53 = vld [vmem:[#allocation7 + $0x2c] ss:$16 sps:$4 sm:$0xff]  }
 0x407   :  { %vm449_vm8 = vcmp.gt.f32.partialorder %v443_v52, 0.0  ;;  %v453_v56 = vmul.f32 0.01, %v443_v52  ;;  %v456_v58 = vsel %vm448_vm6, %v440_v47, %v452_v51  ;;  %v6561_v51 = vld [vmem:[#allocation7 + $0x8] ss:$16 sps:$4 sm:$0xff]  }
 0x408   :  { %vm447_vm9 = vcmp.gt.f32.partialorder %v435_v55, 0.0  ;;  %v451_v57 = vmul.f32 0.01, %v435_v55  ;;  %v454_v60 = vsel %vm446_vm7, %v432_v49, %v450_v54  ;;  %v6567_v54 = vld [vmem:[#allocation7 + $0x28] ss:$16 sps:$4 sm:$0xff]  }
 0x409   :  { %v457_v59 = vsel %vm449_vm8, %v443_v52, %v453_v56  ;;  %v6563_v52 = vld [vmem:[#allocation7 + $0xc] ss:$16 sps:$4 sm:$0xff]   ;;  %v6573_v56 = vld [vmem:[#allocation7 + $0x48] ss:$16 sps:$4 sm:$0xff]  }
 0x40a   :  { %v455_v61 = vsel %vm447_vm9, %v435_v55, %v451_v57  ;;  %v459_v62 = vpack.c.bf16 %v457_v59, %v456_v58  ;;  %v6575_v55 = vld [vmem:[#allocation7 + $0x4c] ss:$16 sps:$4 sm:$0xff]   ;;  %v6579_v58 = vld [vmem:[#allocation7 + $0x68] ss:$16 sps:$4 sm:$0xff]  }
 0x40b   :  { %v458_v63 = vpack.c.bf16 %v455_v61, %v454_v60  ;;  %v6581_v57 = vld [vmem:[#allocation7 + $0x6c] ss:$16 sps:$4 sm:$0xff]   ;;  %v6585_v60 = vld [vmem:[#allocation7 + $0x88] ss:$16 sps:$4 sm:$0xff]  }
 0x40c   :  { %v6587_v59 = vld [vmem:[#allocation7 + $0x8c] ss:$16 sps:$4 sm:$0xff]  }
 0x40d   :  { %6428 = vmatprep.subr.bf16.mxu1 %v458_v63  ;;  %v6593_v61 = vld [vmem:[#allocation7 + $0xac] ss:$16 sps:$4 sm:$0xff]  }
 0x40e   :  { %6429 = vmatpush3.bf16.msra.mxu1 %v458_v63  ;;  %v6599_v63 = vld [vmem:[#allocation7 + $0xcc] ss:$16 sps:$4 sm:$0xff]  }
 0x40f   :  { %6430 = vmatprep.subr.bf16.mxu1 %v459_v62 }
 0x412   :  { %6431 = vmatpush3.bf16.msra.mxu1 %v459_v62  ;;  %v6591_v62 = vld [vmem:[#allocation7 + $0xa8] ss:$16 sps:$4 sm:$0xff]  }
 0x415   :  { %6433 = vmatmul.mubr.msk.bf16.vlgmr.msra.gmra.mrb[4].mxu1 %vm174_vm0, %v7499_v7 }
 0x416   :  { %6452 = vmatprep.mubr.msk.bf16.mxu1 %vm174_vm0, %v7529_v0 }
 0x4e8   :  { %v6434_v2 = vpop.f32.mrb[4].mxu1 }
 0x4e9   :  { %v494_v3 = vpop.f32.mrb[5].mxu1 }
 0x4ea   :  { %v6435_v4 = vpop.f32.mrb[6].mxu1 }
 0x4eb   :  { %v510_v5 = vpack.c.bf16 %v6435_v4, %v6434_v2  ;;  %v497_v6 = vpop.f32.mrb[7].mxu1  ;;  %v6605_v2 = vld [vmem:[#allocation7 + $0xec] ss:$16 sps:$4 sm:$0xff]  }
 0x4ec   :  { %v509_v7 = vpack.c.bf16 %v497_v6, %v494_v3  ;;  %v6603_v3 = vld [vmem:[#allocation7 + $0xe8] ss:$16 sps:$4 sm:$0xff]   ;;  %v6611_v4 = vld [vmem:[#allocation7 + $0x10c] ss:$16 sps:$4 sm:$0xff]  }
 0x4ed   :  { %v6617_v6 = vld [vmem:[#allocation7 + $0x12c] ss:$16 sps:$4 sm:$0xff]  }
 0x4ee   :  { %6444 = vmatprep.mubr.msk.bf16.mxu0 %vm550_vm10, %v509_v7  ;;  %v6615_v7 = vld [vmem:[#allocation7 + $0x128] ss:$16 sps:$4 sm:$0xff]  }
 0x4ef   :  { %6445 = vmatmul.mubr.msk.bf16.vlgmr.msra.gmra.mrb[12].mxu0 %vm550_vm10, %v510_v5  ;;  %v6609_v5 = vld [vmem:[#allocation7 + $0x108] ss:$16 sps:$4 sm:$0xff]  }
 0x4f0   :  { %892 = vmatprep.mubr.bf16.mxu0 %v7273_v44 }
 0x5c2   :  { %v6446_v9 = vpop.f32.mrb[12].mxu0 }
 0x5c3   :  { %v600_v10 = vadd.f32 %v6446_v9, %v5689_v8  ;;  %v591_v11 = vpop.f32.mrb[13].mxu0  ;;  %v6621_v9 = vld [vmem:[#allocation7 + $0x148] ss:$16 sps:$4 sm:$0xff]  }
 0x5c4   :  { %v592_v12 = vadd.f32 %v5689_v8, %v591_v11  ;;  %v6447_v13 = vpop.f32.mrb[14].mxu0  ;;  %v6627_v11 = vld [vmem:[#allocation7 + $0x168] ss:$16 sps:$4 sm:$0xff]  }
 0x5c5   :  { %v612_v14 = vmul.f32 0.01, %v600_v10  ;;  %v603_v15 = vadd.f32 %v6447_v13, %v5689_v8  ;;  %v594_v16 = vpop.f32.mrb[15].mxu0  ;;  %vm608_vm11 = vcmp.gt.f32.partialorder %v600_v10, 0.0  ;;  %v6633_v13 = vld [vmem:[#allocation7 + $0x188] ss:$16 sps:$4 sm:$0xff]  }
 0x5c6   :  { %v610_v17 = vmul.f32 0.01, %v592_v12  ;;  %v595_v18 = vadd.f32 %v5689_v8, %v594_v16  ;;  %vm606_vm12 = vcmp.gt.f32.partialorder %v592_v12, 0.0  ;;  %v6623_v8 = vld [vmem:[#allocation7 + $0x14c] ss:$16 sps:$4 sm:$0xff]  }
 0x5c7   :  { %vm609_vm13 = vcmp.gt.f32.partialorder %v603_v15, 0.0  ;;  %v613_v19 = vmul.f32 0.01, %v603_v15  ;;  %v616_v21 = vsel %vm608_vm11, %v600_v10, %v612_v14  ;;  %v6629_v10 = vld [vmem:[#allocation7 + $0x16c] ss:$16 sps:$4 sm:$0xff]  }
 0x5c8   :  { %vm607_vm14 = vcmp.gt.f32.partialorder %v595_v18, 0.0  ;;  %v611_v20 = vmul.f32 0.01, %v595_v18  ;;  %v614_v23 = vsel %vm606_vm12, %v592_v12, %v610_v17  ;;  %v6635_v12 = vld [vmem:[#allocation7 + $0x18c] ss:$16 sps:$4 sm:$0xff]  }
 0x5c9   :  { %v617_v22 = vsel %vm609_vm13, %v603_v15, %v613_v19  ;;  %v6641_v14 = vld [vmem:[#allocation7 + $0x1ac] ss:$16 sps:$4 sm:$0xff]   ;;  %v6639_v15 = vld [vmem:[#allocation7 + $0x1a8] ss:$16 sps:$4 sm:$0xff]  }
 0x5ca   :  { %v615_v24 = vsel %vm607_vm14, %v595_v18, %v611_v20  ;;  %v619_v25 = vpack.c.bf16 %v617_v22, %v616_v21  ;;  %v6647_v16 = vld [vmem:[#allocation7 + $0x1cc] ss:$16 sps:$4 sm:$0xff]   ;;  %v6645_v17 = vld [vmem:[#allocation7 + $0x1c8] ss:$16 sps:$4 sm:$0xff]   ;;  %v689_v18 = vlaneseq  ;;  %v687_v21 = vld [vmem:[%s7689_s10] sm:$0x3] }
 0x5cb   :  { %v618_v26 = vpack.c.bf16 %v615_v24, %v614_v23 }
 0x5cc   :  { %v7549_v19 = vshrl.u32 %v689_v18, 7  ;;  %v6618_v18 = vld [vmem:[#allocation7 + $0x140] ss:$16 sps:$4 sm:$0xff]  }
 0x5cd   :  { %6448 = vmatprep.subr.bf16.mxu1 %v618_v26 }
 0x5ce   :  { %6449 = vmatpush3.bf16.msra.mxu1 %v618_v26  ;;  %v7552_v20 = vsub.s32 0, %v7549_v19  ;;  %v7558_v22 = vsub.s32 1, %v7549_v19 }
 0x5cf   :  { %6450 = vmatprep.subr.bf16.mxu1 %v619_v25 }
 0x5d0   :  { %v692_v23 = vrot.slane %v687_v21, %v7552_v20  ;;  %v696_v24 = vrot.slane %v687_v21, %v7558_v22  ;;  %v6626_v21 = vld [vmem:[#allocation7 + $0x164] ss:$16 sps:$4 sm:$0xff]  }
 0x5d2   :  { %6451 = vmatpush3.bf16.msra.mxu1 %v619_v25 }
 0x5d3   :  { %779 = vmatprep.subr.bf16.mxu1 %v6536_v27 }
 0x5d5   :  { %6453 = vmatmul.mubr.msk.bf16.vlgmr.msra.gmra.mrb[8].mxu1 %vm174_vm0, %v7542_v30 }
 0x5d6   :  { %780 = vmatpush1.bf16.msra.mxu1 %v6534_v28  ;;  %811 = vmatprep.mubr.bf16.mxu1 %v7273_v44 }
 0x5d7   :  { %781 = vmatprep.subr.bf16.mxu1 %v6539_v29 }
 0x5da   :  { %782 = vmatpush1.bf16.msra.mxu1 %v6537_v31 }
 0x5db   :  { %783 = vmatprep.subr.bf16.mxu1 %v6542_v32 }
 0x5de   :  { %784 = vmatpush1.bf16.msra.mxu1 %v6540_v33 }
 0x5df   :  { %785 = vmatprep.subr.bf16.mxu1 %v6545_v34 }
 0x5e2   :  { %786 = vmatpush1.bf16.msra.mxu1 %v6543_v35 }
 0x5e3   :  { %787 = vmatprep.subr.bf16.mxu1 %v6548_v36 }
 0x5e6   :  { %788 = vmatpush1.bf16.msra.mxu1 %v6546_v37 }
 0x5e7   :  { %789 = vmatprep.subr.bf16.mxu1 %v6551_v38 }
 0x5ea   :  { %790 = vmatpush1.bf16.msra.mxu1 %v6549_v39 }
 0x5eb   :  { %791 = vmatprep.subr.bf16.mxu1 %v6554_v40 }
 0x5ee   :  { %792 = vmatpush1.bf16.msra.mxu1 %v6552_v41 }
 0x5ef   :  { %793 = vmatprep.subr.bf16.mxu1 %v6557_v42 }
 0x5f2   :  { %794 = vmatpush1.bf16.msra.mxu1 %v6555_v43 }
 0x5f3   :  { %1376 = vmatprep.subr.bf16.mxu1 %v6563_v52 }
 0x6a8   :  { %v6454_v45 = vpop.f32.mrb[8].mxu1 }
 0x6a9   :  { %v654_v46 = vpop.f32.mrb[9].mxu1 }
 0x6aa   :  { %v6455_v47 = vpop.f32.mrb[10].mxu1 }
 0x6ab   :  { %v670_v48 = vpack.c.bf16 %v6455_v47, %v6454_v45  ;;  %v657_v49 = vpop.f32.mrb[11].mxu1 }
 0x6ac   :  { %v669_v50 = vpack.c.bf16 %v657_v49, %v654_v46 }
 0x6ae   :  { %812 = vmatmul.mubr.bf16.vlgmr.msra.gmra.mrb[12].mxu1 %v669_v50 }
 0x6af   :  { %821 = vmatprep.mubr.bf16.mxu1 %v7273_v44  ;;  %1377 = vmatpush1.bf16.msra.mxu1 %v6561_v51 }
 0x6b0   :  { %1378 = vmatprep.subr.bf16.mxu1 %v6569_v53 }
 0x6b3   :  { %1379 = vmatpush1.bf16.msra.mxu1 %v6567_v54 }
 0x6b4   :  { %1380 = vmatprep.subr.bf16.mxu1 %v6575_v55 }
 0x6b6   :  { %822 = vmatmul.mubr.bf16.gmra.mrb[16].mxu1 %v670_v48 }
 0x6b7   :  { %1381 = vmatpush1.bf16.msra.mxu1 %v6573_v56 }
 0x6b8   :  { %1382 = vmatprep.subr.bf16.mxu1 %v6581_v57 }
 0x6bb   :  { %1383 = vmatpush1.bf16.msra.mxu1 %v6579_v58 }
 0x6bc   :  { %1384 = vmatprep.subr.bf16.mxu1 %v6587_v59 }
 0x6bf   :  { %1385 = vmatpush1.bf16.msra.mxu1 %v6585_v60 }
 0x6c0   :  { %1386 = vmatprep.subr.bf16.mxu1 %v6593_v61 }
 0x6c3   :  { %1387 = vmatpush1.bf16.msra.mxu1 %v6591_v62 }
 0x6c4   :  { %1388 = vmatprep.subr.bf16.mxu1 %v6599_v63  ;;  %v6560_v63 = vld [vmem:[#allocation7 + $0x4] ss:$16 sps:$4 sm:$0xff]  }
 0x6c7   :  { %1389 = vmatpush1.bf16.msra.mxu1 %v6597_v1  ;;  %v6558_v1 = vld [vmem:[#allocation7] ss:$16 sps:$4 sm:$0xff]  }
 0x6c8   :  { %1390 = vmatprep.subr.bf16.mxu1 %v6605_v2  ;;  %v6566_v2 = vld [vmem:[#allocation7 + $0x24] ss:$16 sps:$4 sm:$0xff]  }
 0x6cb   :  { %1391 = vmatpush1.bf16.msra.mxu1 %v6603_v3  ;;  %v6564_v3 = vld [vmem:[#allocation7 + $0x20] ss:$16 sps:$4 sm:$0xff]  }
 0x6cc   :  { %1392 = vmatprep.subr.bf16.mxu1 %v6611_v4  ;;  %v6572_v4 = vld [vmem:[#allocation7 + $0x44] ss:$16 sps:$4 sm:$0xff]  }
 0x6cf   :  { %1393 = vmatpush1.bf16.msra.mxu1 %v6609_v5  ;;  %v6570_v5 = vld [vmem:[#allocation7 + $0x40] ss:$16 sps:$4 sm:$0xff]  }
 0x6d0   :  { %1394 = vmatprep.subr.bf16.mxu1 %v6617_v6  ;;  %v6578_v6 = vld [vmem:[#allocation7 + $0x64] ss:$16 sps:$4 sm:$0xff]  }
 0x6d3   :  { %1395 = vmatpush1.bf16.msra.mxu1 %v6615_v7  ;;  %v6576_v7 = vld [vmem:[#allocation7 + $0x60] ss:$16 sps:$4 sm:$0xff]  }
 0x6d4   :  { %1396 = vmatprep.subr.bf16.mxu1 %v6623_v8  ;;  %v6584_v8 = vld [vmem:[#allocation7 + $0x84] ss:$16 sps:$4 sm:$0xff]  }
 0x6d7   :  { %1397 = vmatpush1.bf16.msra.mxu1 %v6621_v9  ;;  %v6582_v9 = vld [vmem:[#allocation7 + $0x80] ss:$16 sps:$4 sm:$0xff]  }
 0x6d8   :  { %1398 = vmatprep.subr.bf16.mxu1 %v6629_v10  ;;  %v6596_v10 = vld [vmem:[#allocation7 + $0xc4] ss:$16 sps:$4 sm:$0xff]  }
 0x6db   :  { %1399 = vmatpush1.bf16.msra.mxu1 %v6627_v11  ;;  %v6594_v11 = vld [vmem:[#allocation7 + $0xc0] ss:$16 sps:$4 sm:$0xff]  }
 0x6dc   :  { %1400 = vmatprep.subr.bf16.mxu1 %v6635_v12  ;;  %v6602_v12 = vld [vmem:[#allocation7 + $0xe4] ss:$16 sps:$4 sm:$0xff]  }
 0x6df   :  { %1401 = vmatpush1.bf16.msra.mxu1 %v6633_v13  ;;  %v6600_v13 = vld [vmem:[#allocation7 + $0xe0] ss:$16 sps:$4 sm:$0xff]  }
 0x6e0   :  { %1402 = vmatprep.subr.bf16.mxu1 %v6641_v14  ;;  %v6606_v14 = vld [vmem:[#allocation7 + $0x100] ss:$16 sps:$4 sm:$0xff]  }
 0x6e3   :  { %1403 = vmatpush1.bf16.msra.mxu1 %v6639_v15  ;;  %v6614_v15 = vld [vmem:[#allocation7 + $0x124] ss:$16 sps:$4 sm:$0xff]  }
 0x6e4   :  { %1404 = vmatprep.subr.bf16.mxu1 %v6647_v16  ;;  %v6612_v16 = vld [vmem:[#allocation7 + $0x120] ss:$16 sps:$4 sm:$0xff]  }
 0x6e7   :  { %1405 = vmatpush1.bf16.msra.mxu1 %v6645_v17  ;;  %v6620_v17 = vld [vmem:[#allocation7 + $0x144] ss:$16 sps:$4 sm:$0xff]  }
 0x781   :  { %v813_v25 = vpop.f32.mrb[12].mxu1 }
 0x782   :  { %v814_v26 = vadd.f32 %v813_v25, %v692_v23  ;;  %v815_v27 = vpop.f32.mrb[13].mxu1  ;;  %v6630_v25 = vld [vmem:[#allocation7 + $0x180] ss:$16 sps:$4 sm:$0xff]  }
 0x783   :  { %v816_v28 = vadd.f32 %v815_v27, %v696_v24  ;;  %v817_v29 = vpop.f32.mrb[14].mxu1  ;;  %v6636_v27 = vld [vmem:[#allocation7 + $0x1a0] ss:$16 sps:$4 sm:$0xff]  }
 0x784   :  { %v840_v31 = vmul.f32 0.01, %v814_v26  ;;  %v818_v32 = vadd.f32 %v817_v29, %v692_v23  ;;  %v819_v33 = vpop.f32.mrb[15].mxu1  ;;  %vm832_vm15 = vcmp.gt.f32.partialorder %v814_v26, 0.0  ;;  %v6642_v29 = vld [vmem:[#allocation7 + $0x1c0] ss:$16 sps:$4 sm:$0xff]  }
 0x785   :  { %v841_v34 = vmul.f32 0.01, %v816_v28  ;;  %v820_v35 = vadd.f32 %v819_v33, %v696_v24  ;;  %vm833_vm1 = vcmp.gt.f32.partialorder %v816_v28, 0.0  ;;  %v6648_v33 = vld [vmem:[#allocation7 + $0x1e0] ss:$16 sps:$4 sm:$0xff]  }
 0x786   :  { %vm834_vm2 = vcmp.gt.f32.partialorder %v818_v32, 0.0  ;;  %v842_v36 = vmul.f32 0.01, %v818_v32  ;;  %v848_v38 = vsel %vm832_vm15, %v814_v26, %v840_v31  ;;  %v6638_v26 = vld [vmem:[#allocation7 + $0x1a4] ss:$16 sps:$4 sm:$0xff]  }
 0x787   :  { %vm835_vm3 = vcmp.gt.f32.partialorder %v820_v35, 0.0  ;;  %v843_v37 = vmul.f32 0.01, %v820_v35  ;;  %v849_v42 = vsel %vm833_vm1, %v816_v28, %v841_v34  ;;  %v6644_v28 = vld [vmem:[#allocation7 + $0x1c4] ss:$16 sps:$4 sm:$0xff]  }
 0x788   :  { %v850_v39 = vsel %vm834_vm2, %v818_v32, %v842_v36  ;;  %v6650_v31 = vld [vmem:[#allocation7 + $0x1e4] ss:$16 sps:$4 sm:$0xff]   ;;  %v6653_v32 = vld [vmem:[#allocation7 + $0x1ec] ss:$16 sps:$4 sm:$0xff]   ;;  %v6651_v34 = vld [vmem:[#allocation7 + $0x1e8] ss:$16 sps:$4 sm:$0xff]  }
 0x789   :  { %v856_v40 = vpack.c.bf16 %v850_v39, %v848_v38  ;;  %v823_v41 = vpop.f32.mrb[16].mxu1  ;;  %v851_v43 = vsel %vm835_vm3, %v820_v35, %v843_v37  ;;  %1406 = vmatprep.subr.bf16.mxu1 %v6653_v32  ;;  %v1494_v35 = vld [vmem:[#allocation10] sm:$0xff]  ;;  %v1495_v37 = vld [vmem:[#allocation10 + $0x8] sm:$0xff] }
 0x78a   :  { %v824_v45 = vadd.f32 %v823_v41, %v692_v23  ;;  %v825_v46 = vpop.f32.mrb[17].mxu1  ;;  %v857_v47 = vpack.c.bf16 %v851_v43, %v849_v42  ;;  %1407 = vmatpush1.bf16.msra.mxu1 %v6651_v34  ;;  %v1498_v36 = vld [vmem:[#allocation10 + $0x20] sm:$0xff]  ;;  %v1543_v34 = vld [vmem:[#allocation10 + $0x188] sm:$0xff] }
 0x78b   :  { %v826_v48 = vadd.f32 %v825_v46, %v696_v24  ;;  %v827_v49 = vpop.f32.mrb[18].mxu1  ;;  %v5780_v38 = vcombine.low %v1494_v35, %v1498_v36  ;;  %v5781_v39 = vcombine.high %v1494_v35, %v1498_v36  ;;  %v1502_v46 = vld [vmem:[#allocation10 + $0x40] sm:$0xff]  ;;  %v1547_v35 = vld [vmem:[#allocation10 + $0x1a8] sm:$0xff] }
 0x78c   :  { %v844_v50 = vmul.f32 0.01, %v824_v45  ;;  %v828_v51 = vadd.f32 %v827_v49, %v692_v23  ;;  %v829_v52 = vpop.f32.mrb[19].mxu1  ;;  %860 = vmatprep.subr.bf16.mxu0 %v857_v47  ;;  %vm836_vm4 = vcmp.gt.f32.partialorder %v824_v45, 0.0  ;;  %v6624_v23 = vld [vmem:[#allocation7 + $0x160] ss:$16 sps:$4 sm:$0xff]  }
 0x78d   :  { %v845_v53 = vmul.f32 0.01, %v826_v48  ;;  %v830_v54 = vadd.f32 %v829_v52, %v696_v24  ;;  %861 = vmatpush1.bf16.msra.mxu0 %v856_v40  ;;  %vm837_vm5 = vcmp.gt.f32.partialorder %v826_v48, 0.0  ;;  %v6632_v24 = vld [vmem:[#allocation7 + $0x184] ss:$16 sps:$4 sm:$0xff]   ;;  %v1499_v40 = vld [vmem:[#allocation10 + $0x28] sm:$0xff] }
 0x78e   :  { %vm838_vm6 = vcmp.gt.f32.partialorder %v828_v51, 0.0  ;;  %v846_v55 = vmul.f32 0.01, %v828_v51  ;;  %v852_v57 = vsel %vm836_vm4, %v824_v45, %v844_v50  ;;  %v5782_v41 = vcombine.low %v1495_v37, %v1499_v40  ;;  %v1503_v49 = vld [vmem:[#allocation10 + $0x48] sm:$0xff]  ;;  %v1542_v32 = vld [vmem:[#allocation10 + $0x180] sm:$0xff] }
 0x78f   :  { %vm839_vm7 = vcmp.gt.f32.partialorder %v830_v54, 0.0  ;;  %v847_v56 = vmul.f32 0.01, %v830_v54  ;;  %v853_v60 = vsel %vm837_vm5, %v826_v48, %v845_v53  ;;  %v5783_v42 = vcombine.high %v1495_v37, %v1499_v40  ;;  %v1506_v48 = vld [vmem:[#allocation10 + $0x60] sm:$0xff]  ;;  %v1507_v50 = vld [vmem:[#allocation10 + $0x68] sm:$0xff] }
 0x790   :  { %v854_v58 = vsel %vm838_vm6, %v828_v51, %v846_v55  ;;  %v5791_v55 = vcombine.high %v1503_v49, %v1507_v50  ;;  %v1550_v40 = vld [vmem:[#allocation10 + $0x1c0] sm:$0xff] }
 0x791   :  { %v858_v59 = vpack.c.bf16 %v854_v58, %v852_v57  ;;  %v855_v61 = vsel %vm839_vm7, %v830_v54, %v847_v56  ;;  %3154 = vmatprep.subr.bf16.mxu1 %v5783_v42  ;;  %v5789_v54 = vcombine.high %v1502_v46, %v1506_v48  ;;  %v1510_v56 = vld [vmem:[#allocation10 + $0x80] sm:$0xff]  ;;  %v1511_v58 = vld [vmem:[#allocation10 + $0x88] sm:$0xff] }
 0x792   :  { %v859_v62 = vpack.c.bf16 %v855_v61, %v853_v60  ;;  %v1514_v57 = vld [vmem:[#allocation10 + $0xa0] sm:$0xff]  ;;  %v5788_v61 = vcombine.low %v1502_v46, %v1506_v48  ;;  %v1551_v42 = vld [vmem:[#allocation10 + $0x1c8] sm:$0xff]  ;;  %v5830_v46 = vcombine.low %v1543_v34, %v1547_v35 }
 0x794   :  { %862 = vmatprep.subr.bf16.mxu0 %v859_v62  ;;  %v5790_v62 = vcombine.low %v1503_v49, %v1507_v50  ;;  %v1558_v49 = vld [vmem:[#allocation10 + $0x200] sm:$0xff] }
 0x795   :  { %863 = vmatpush1.bf16.msra.mxu0 %v858_v59  ;;  %v1515_v59 = vld [vmem:[#allocation10 + $0xa8] sm:$0xff]  ;;  %v1562_v50 = vld [vmem:[#allocation10 + $0x220] sm:$0xff] }
 0x796   :  { %1323 = vmatprep.subr.bf16.mxu0 %v6560_v63 }
 0x798   :  { %5714 = vmatmul.mubr.msk.bf16.vlgmr.msra.gmra.mrb[16].mxu0 %vm174_vm0, %v7529_v0  ;;  %v6590_v0 = vld [vmem:[#allocation7 + $0xa4] ss:$16 sps:$4 sm:$0xff]  }
 0x799   :  { %902 = vmatprep.mubr.bf16.mxu0 %v7273_v44  ;;  %1324 = vmatpush1.bf16.msra.mxu0 %v6558_v1  ;;  %v6588_v44 = vld [vmem:[#allocation7 + $0xa0] ss:$16 sps:$4 sm:$0xff]   ;;  %v5797_v1 = vcombine.high %v1510_v56, %v1514_v57 }
 0x79a   :  { %1325 = vmatprep.subr.bf16.mxu0 %v6566_v2  ;;  %v5799_v2 = vcombine.high %v1511_v58, %v1515_v59 }
 0x79d   :  { %1326 = vmatpush1.bf16.msra.mxu0 %v6564_v3  ;;  %v1518_v3 = vld [vmem:[#allocation10 + $0xc0] sm:$0xff] }
 0x79e   :  { %1327 = vmatprep.subr.bf16.mxu0 %v6572_v4 }
 0x7a0   :  { %5715 = vmatmul.mubr.msk.bf16.gmra.mrb[20].mxu0 %vm174_vm0, %v7542_v30  ;;  %v6608_v30 = vld [vmem:[#allocation7 + $0x104] ss:$16 sps:$4 sm:$0xff]   ;;  %vm1485_vm0 = vcmask 1040384  }
 0x7a1   :  { %1328 = vmatpush1.bf16.msra.mxu0 %v6570_v5  ;;  %v1522_v5 = vld [vmem:[#allocation10 + $0xe0] sm:$0xff] }
 0x7a2   :  { %1329 = vmatprep.subr.bf16.mxu0 %v6578_v6  ;;  %v1519_v6 = vld [vmem:[#allocation10 + $0xc8] sm:$0xff] }
 0x7a5   :  { %1330 = vmatpush1.bf16.msra.mxu0 %v6576_v7  ;;  %v1523_v7 = vld [vmem:[#allocation10 + $0xe8] sm:$0xff] }
 0x7a6   :  { %1331 = vmatprep.subr.bf16.mxu0 %v6584_v8 }
 0x7a9   :  { %1332 = vmatpush1.bf16.msra.mxu0 %v6582_v9 }
 0x7aa   :  { %1333 = vmatprep.subr.bf16.mxu0 %v6590_v0 }
 0x7ad   :  { %1334 = vmatpush1.bf16.msra.mxu0 %v6588_v44  ;;  %v5796_v44 = vcombine.low %v1510_v56, %v1514_v57  ;;  %v5844_v57 = vcombine.low %v1558_v49, %v1562_v50 }
 0x7ae   :  { %1335 = vmatprep.subr.bf16.mxu0 %v6596_v10  ;;  %v5798_v10 = vcombine.low %v1511_v58, %v1515_v59  ;;  %v1566_v59 = vld [vmem:[#allocation10 + $0x240] sm:$0xff] }
 0x7b1   :  { %1336 = vmatpush1.bf16.msra.mxu0 %v6594_v11  ;;  %v5805_v11 = vcombine.high %v1518_v3, %v1522_v5 }
 0x7b2   :  { %1337 = vmatprep.subr.bf16.mxu0 %v6602_v12  ;;  %v5807_v12 = vcombine.high %v1519_v6, %v1523_v7 }
 0x7b5   :  { %1338 = vmatpush1.bf16.msra.mxu0 %v6600_v13  ;;  %v1526_v13 = vld [vmem:[#allocation10 + $0x100] sm:$0xff] }
 0x7b6   :  { %1339 = vmatprep.subr.bf16.mxu0 %v6608_v30  ;;  %v1530_v30 = vld [vmem:[#allocation10 + $0x120] sm:$0xff] }
 0x7b9   :  { %1340 = vmatpush1.bf16.msra.mxu0 %v6606_v14  ;;  %v1527_v14 = vld [vmem:[#allocation10 + $0x108] sm:$0xff] }
 0x7ba   :  { %1341 = vmatprep.subr.bf16.mxu0 %v6614_v15  ;;  %v1531_v15 = vld [vmem:[#allocation10 + $0x128] sm:$0xff] }
 0x7bd   :  { %1342 = vmatpush1.bf16.msra.mxu0 %v6612_v16  ;;  %v5804_v16 = vcombine.low %v1518_v3, %v1522_v5  ;;  %v1578_v5 = vld [vmem:[#allocation10 + $0x2a0] sm:$0xff] }
 0x7be   :  { %1343 = vmatprep.subr.bf16.mxu0 %v6620_v17  ;;  %v5806_v17 = vcombine.low %v1519_v6, %v1523_v7  ;;  %v1575_v6 = vld [vmem:[#allocation10 + $0x288] sm:$0xff] }
 0x7c1   :  { %1344 = vmatpush1.bf16.msra.mxu0 %v6618_v18  ;;  %v5813_v18 = vcombine.high %v1526_v13, %v1530_v30 }
 0x7c2   :  { %1345 = vmatprep.subr.bf16.mxu0 %v6626_v21  ;;  %v5815_v21 = vcombine.high %v1527_v14, %v1531_v15 }
 0x7c5   :  { %1346 = vmatpush1.bf16.msra.mxu0 %v6624_v23  ;;  %v1534_v23 = vld [vmem:[#allocation10 + $0x140] sm:$0xff] }
 0x7c6   :  { %1347 = vmatprep.subr.bf16.mxu0 %v6632_v24  ;;  %v1538_v24 = vld [vmem:[#allocation10 + $0x160] sm:$0xff] }
 0x7c7   :  { %v5820_v36 = vcombine.low %v1534_v23, %v1538_v24 }
 0x7c9   :  { %1348 = vmatpush1.bf16.msra.mxu0 %v6630_v25  ;;  %v1535_v25 = vld [vmem:[#allocation10 + $0x148] sm:$0xff] }
 0x7ca   :  { %1349 = vmatprep.subr.bf16.mxu0 %v6638_v26  ;;  %v1539_v26 = vld [vmem:[#allocation10 + $0x168] sm:$0xff] }
 0x7cb   :  { %v5822_v37 = vcombine.low %v1535_v25, %v1539_v26 }
 0x7cd   :  { %1350 = vmatpush1.bf16.msra.mxu0 %v6636_v27  ;;  %v5812_v27 = vcombine.low %v1526_v13, %v1530_v30  ;;  %v1587_v30 = vld [vmem:[#allocation10 + $0x2e8] sm:$0xff] }
 0x7ce   :  { %1351 = vmatprep.subr.bf16.mxu0 %v6644_v28  ;;  %v5814_v28 = vcombine.low %v1527_v14, %v1531_v15 }
 0x7d1   :  { %1352 = vmatpush1.bf16.msra.mxu0 %v6642_v29  ;;  %v5821_v29 = vcombine.high %v1534_v23, %v1538_v24  ;;  %v1595_v24 = vld [vmem:[#allocation10 + $0x328] sm:$0xff] }
 0x7d2   :  { %1353 = vmatprep.subr.bf16.mxu0 %v6650_v31  ;;  %v5823_v31 = vcombine.high %v1535_v25, %v1539_v26 }
 0x7d5   :  { %1354 = vmatpush1.bf16.msra.mxu0 %v6648_v33  ;;  %v1546_v33 = vld [vmem:[#allocation10 + $0x1a0] sm:$0xff] }
 0x7d6   :  { %3072 = vmatprep.subr.bf16.mxu0 %v5781_v39  ;;  %v5831_v39 = vcombine.high %v1543_v34, %v1547_v35 }
 0x86b   :  { %v894_v43 = vpop.f32.mrb[16].mxu0 }
 0x86c   :  { %v896_v45 = vpop.f32.mrb[17].mxu0 }
 0x86d   :  { %v898_v47 = vpop.f32.mrb[18].mxu0 }
 0x86e   :  { %v913_v51 = vpack.c.bf16 %v898_v47, %v894_v43  ;;  %v900_v52 = vpop.f32.mrb[19].mxu0  ;;  %v1555_v43 = vld [vmem:[#allocation10 + $0x1e8] sm:$0xff] }
 0x86f   :  { %v914_v53 = vpack.c.bf16 %v900_v52, %v896_v45  ;;  %v5828_v45 = vcombine.low %v1542_v32, %v1546_v33  ;;  %v5839_v48 = vcombine.high %v1551_v42, %v1555_v43  ;;  %v1563_v52 = vld [vmem:[#allocation10 + $0x228] sm:$0xff] }
 0x871   :  { %1355 = vmatprep.mubr.bf16.mxu0 %v914_v53  ;;  %1408 = vmatprep.mubr.bf16.mxu1 %v914_v53 }
 0x872   :  { %1356 = vmatmul.mubr.bf16.vlgmr.msra.gmra.mrb[24].mxu0 %v913_v51  ;;  %1409 = vmatmul.mubr.bf16.vlgmr.msra.gmra.mrb[20].mxu1 %v913_v51  ;;  %v1559_v51 = vld [vmem:[#allocation10 + $0x208] sm:$0xff] }
 0x873   :  { %v904_v60 = vpop.f32.mrb[20].mxu0  ;;  %3073 = vmatpush1.bf16.msra.mxu0 %v5780_v38  ;;  %3155 = vmatpush1.bf16.msra.mxu1 %v5782_v41  ;;  %v5829_v38 = vcombine.high %v1542_v32, %v1546_v33  ;;  %v1554_v41 = vld [vmem:[#allocation10 + $0x1e0] sm:$0xff]  ;;  %v5847_v56 = vcombine.high %v1559_v51, %v1563_v52  ;;  %v5846_v58 = vcombine.low %v1559_v51, %v1563_v52  ;;  %v1603_v33 = vld [vmem:[#allocation10 + $0x368] sm:$0xff] }
 0x874   :  { %v906_v63 = vpop.f32.mrb[21].mxu0  ;;  %3074 = vmatprep.subr.bf16.mxu0 %v5789_v54  ;;  %3156 = vmatprep.subr.bf16.mxu1 %v5791_v55  ;;  %v5837_v47 = vcombine.high %v1550_v40, %v1554_v41  ;;  %v5836_v53 = vcombine.low %v1550_v40, %v1554_v41  ;;  %v5838_v54 = vcombine.low %v1551_v42, %v1555_v43  ;;  %v1611_v41 = vld [vmem:[#allocation10 + $0x3a8] sm:$0xff] }
 0x875   :  { %v908_v4 = vpop.f32.mrb[22].mxu0  ;;  %v5845_v55 = vcombine.high %v1558_v49, %v1562_v50  ;;  %v1619_v50 = vld [vmem:[#allocation10 + $0x3e8] sm:$0xff] }
 0x876   :  { %v915_v8 = vpack.c.bf16 %v908_v4, %v904_v60  ;;  %v910_v9 = vpop.f32.mrb[23].mxu0  ;;  %v1570_v60 = vld [vmem:[#allocation10 + $0x260] sm:$0xff] }
 0x877   :  { %v916_v0 = vpack.c.bf16 %v910_v9, %v906_v63  ;;  %3075 = vmatpush1.bf16.msra.mxu0 %v5788_v61  ;;  %3157 = vmatpush1.bf16.msra.mxu1 %v5790_v62  ;;  %v1567_v61 = vld [vmem:[#allocation10 + $0x248] sm:$0xff]  ;;  %v5853_v62 = vcombine.high %v1566_v59, %v1570_v60  ;;  %v1574_v4 = vld [vmem:[#allocation10 + $0x280] sm:$0xff] }
 0x878   :  { %3076 = vmatprep.subr.bf16.mxu0 %v5797_v1  ;;  %3158 = vmatprep.subr.bf16.mxu1 %v5799_v2  ;;  %v1571_v63 = vld [vmem:[#allocation10 + $0x268] sm:$0xff]  ;;  %v5852_v1 = vcombine.low %v1566_v59, %v1570_v60  ;;  %v5861_v7 = vcombine.high %v1574_v4, %v1578_v5  ;;  %v5860_v9 = vcombine.low %v1574_v4, %v1578_v5 }
 0x879   :  { %1365 = vmatprep.mubr.bf16.mxu0 %v916_v0  ;;  %1418 = vmatprep.mubr.bf16.mxu1 %v916_v0  ;;  %v5854_v2 = vcombine.low %v1567_v61, %v1571_v63  ;;  %v5855_v3 = vcombine.high %v1567_v61, %v1571_v63  ;;  %v981_v63 = vld [vmem:[%s7690_s11] sm:$0xf] }
 0x87a   :  { %1366 = vmatmul.mubr.bf16.gmra.mrb[28].mxu0 %v915_v8  ;;  %1419 = vmatmul.mubr.bf16.gmra.mrb[24].mxu1 %v915_v8  ;;  %v1579_v8 = vld [vmem:[#allocation10 + $0x2a8] sm:$0xff] }
 0x87b   :  { %3077 = vmatpush1.bf16.msra.mxu0 %v5796_v44  ;;  %3159 = vmatpush1.bf16.msra.mxu1 %v5798_v10  ;;  %v5862_v0 = vcombine.low %v1575_v6, %v1579_v8  ;;  %v5863_v44 = vcombine.high %v1575_v6, %v1579_v8  ;;  %v1582_v10 = vld [vmem:[#allocation10 + $0x2c0] sm:$0xff]  ;;  %v990_v6 = vrot.slane %v981_v63, %v7558_v22 }
 0x87c   :  { %3078 = vmatprep.subr.bf16.mxu0 %v5805_v11  ;;  %3160 = vmatprep.subr.bf16.mxu1 %v5807_v12  ;;  %v1586_v11 = vld [vmem:[#allocation10 + $0x2e0] sm:$0xff]  ;;  %v1583_v12 = vld [vmem:[#allocation10 + $0x2c8] sm:$0xff] }
 0x87d   :  { %v5869_v13 = vcombine.high %v1582_v10, %v1586_v11  ;;  %v5868_v14 = vcombine.low %v1582_v10, %v1586_v11  ;;  %v5870_v15 = vcombine.low %v1583_v12, %v1587_v30 }
 0x87f   :  { %3079 = vmatpush1.bf16.msra.mxu0 %v5804_v16  ;;  %3161 = vmatpush1.bf16.msra.mxu1 %v5806_v17  ;;  %v5871_v16 = vcombine.high %v1583_v12, %v1587_v30  ;;  %v1590_v17 = vld [vmem:[#allocation10 + $0x300] sm:$0xff] }
 0x880   :  { %3080 = vmatprep.subr.bf16.mxu0 %v5813_v18  ;;  %3162 = vmatprep.subr.bf16.mxu1 %v5815_v21  ;;  %v1594_v18 = vld [vmem:[#allocation10 + $0x320] sm:$0xff]  ;;  %v1591_v21 = vld [vmem:[#allocation10 + $0x308] sm:$0xff] }
 0x881   :  { %v5877_v23 = vcombine.high %v1590_v17, %v1594_v18  ;;  %v5876_v25 = vcombine.low %v1590_v17, %v1594_v18  ;;  %v5878_v26 = vcombine.low %v1591_v21, %v1595_v24 }
 0x883   :  { %3081 = vmatpush1.bf16.msra.mxu0 %v5812_v27  ;;  %3163 = vmatpush1.bf16.msra.mxu1 %v5814_v28  ;;  %v5879_v27 = vcombine.high %v1591_v21, %v1595_v24  ;;  %v1598_v28 = vld [vmem:[#allocation10 + $0x340] sm:$0xff] }
 0x884   :  { %3082 = vmatprep.subr.bf16.mxu0 %v5821_v29  ;;  %3164 = vmatprep.subr.bf16.mxu1 %v5823_v31  ;;  %v1602_v29 = vld [vmem:[#allocation10 + $0x360] sm:$0xff]  ;;  %v1599_v31 = vld [vmem:[#allocation10 + $0x348] sm:$0xff] }
 0x885   :  { %v5885_v32 = vcombine.high %v1598_v28, %v1602_v29  ;;  %v5884_v34 = vcombine.low %v1598_v28, %v1602_v29  ;;  %v5886_v35 = vcombine.low %v1599_v31, %v1603_v33 }
 0x887   :  { %3083 = vmatpush1.bf16.msra.mxu0 %v5820_v36  ;;  %3165 = vmatpush1.bf16.msra.mxu1 %v5822_v37  ;;  %v5887_v36 = vcombine.high %v1599_v31, %v1603_v33  ;;  %v1606_v37 = vld [vmem:[#allocation10 + $0x380] sm:$0xff] }
 0x888   :  { %3084 = vmatprep.subr.bf16.mxu0 %v5829_v38  ;;  %3166 = vmatprep.subr.bf16.mxu1 %v5831_v39  ;;  %v1610_v38 = vld [vmem:[#allocation10 + $0x3a0] sm:$0xff]  ;;  %v1607_v39 = vld [vmem:[#allocation10 + $0x388] sm:$0xff] }
 0x889   :  { %v5893_v40 = vcombine.high %v1606_v37, %v1610_v38  ;;  %v5892_v42 = vcombine.low %v1606_v37, %v1610_v38  ;;  %v5894_v43 = vcombine.low %v1607_v39, %v1611_v41 }
 0x88b   :  { %3085 = vmatpush1.bf16.msra.mxu0 %v5828_v45  ;;  %3167 = vmatpush1.bf16.msra.mxu1 %v5830_v46  ;;  %v5895_v45 = vcombine.high %v1607_v39, %v1611_v41  ;;  %v1614_v46 = vld [vmem:[#allocation10 + $0x3c0] sm:$0xff] }
 0x88c   :  { %3086 = vmatprep.subr.bf16.mxu0 %v5837_v47  ;;  %3168 = vmatprep.subr.bf16.mxu1 %v5839_v48  ;;  %v1618_v47 = vld [vmem:[#allocation10 + $0x3e0] sm:$0xff]  ;;  %v1615_v48 = vld [vmem:[#allocation10 + $0x3c8] sm:$0xff] }
 0x88d   :  { %v5901_v49 = vcombine.high %v1614_v46, %v1618_v47  ;;  %v5900_v51 = vcombine.low %v1614_v46, %v1618_v47  ;;  %v5902_v52 = vcombine.low %v1615_v48, %v1619_v50 }
 0x88f   :  { %3087 = vmatpush1.bf16.msra.mxu0 %v5836_v53  ;;  %3169 = vmatpush1.bf16.msra.mxu1 %v5838_v54  ;;  %v5903_v53 = vcombine.high %v1615_v48, %v1619_v50  ;;  %v7567_v54 = vld [vmem:[#allocation10 + $0x400] sm:$0xff] }
 0x890   :  { %3088 = vmatprep.subr.bf16.mxu0 %v5845_v55  ;;  %3170 = vmatprep.subr.bf16.mxu1 %v5847_v56  ;;  %v7569_v55 = vld [vmem:[#allocation10 + $0x420] sm:$0xff]  ;;  %v7571_v56 = vld [vmem:[#allocation10 + $0x408] sm:$0xff] }
 0x891   :  { %v5908_v59 = vcombine.low %v7567_v54, %v7569_v55 }
 0x893   :  { %3089 = vmatpush1.bf16.msra.mxu0 %v5844_v57  ;;  %3171 = vmatpush1.bf16.msra.mxu1 %v5846_v58  ;;  %v5909_v57 = vcombine.high %v7567_v54, %v7569_v55  ;;  %v7575_v58 = vld [vmem:[#allocation10 + $0x428] sm:$0xff] }
 0x894   :  { %3090 = vmatprep.subr.bf16.mxu0 %v5853_v62  ;;  %3172 = vmatprep.subr.bf16.mxu1 %v5855_v3  ;;  %v5910_v60 = vcombine.low %v7571_v56, %v7575_v58  ;;  %v5911_v61 = vcombine.high %v7571_v56, %v7575_v58  ;;  %v7584_v62 = vsub.s32 2, %v7549_v19 }
 0x896   :  { %v994_v3 = vrot.slane %v981_v63, %v7584_v62 }
 0x897   :  { %3091 = vmatpush1.bf16.msra.mxu0 %v5852_v1  ;;  %3173 = vmatpush1.bf16.msra.mxu1 %v5854_v2  ;;  %v7590_v1 = vsub.s32 3, %v7549_v19  ;;  %v986_v2 = vrot.slane %v981_v63, %v7552_v20 }
 0x898   :  { %3092 = vmatprep.subr.bf16.mxu0 %v5861_v7  ;;  %3174 = vmatprep.subr.bf16.mxu1 %v5863_v44 }
 0x899   :  { %v998_v7 = vrot.slane %v981_v63, %v7590_v1 }
 0x89b   :  { %3093 = vmatpush1.bf16.msra.mxu0 %v5860_v9  ;;  %3175 = vmatpush1.bf16.msra.mxu1 %v5862_v0 }
 0x89c   :  { %3094 = vmatprep.subr.bf16.mxu0 %v5869_v13  ;;  %3176 = vmatprep.subr.bf16.mxu1 %v5871_v16 }
 0x89f   :  { %3095 = vmatpush1.bf16.msra.mxu0 %v5868_v14  ;;  %3177 = vmatpush1.bf16.msra.mxu1 %v5870_v15 }
 0x8a0   :  { %3096 = vmatprep.subr.bf16.mxu0 %v5877_v23  ;;  %3178 = vmatprep.subr.bf16.mxu1 %v5879_v27 }
 0x8a3   :  { %3097 = vmatpush1.bf16.msra.mxu0 %v5876_v25  ;;  %3179 = vmatpush1.bf16.msra.mxu1 %v5878_v26 }
 0x8a4   :  { %3098 = vmatprep.subr.bf16.mxu0 %v5885_v32  ;;  %3180 = vmatprep.subr.bf16.mxu1 %v5887_v36 }
 0x8a7   :  { %3099 = vmatpush1.bf16.msra.mxu0 %v5884_v34  ;;  %3181 = vmatpush1.bf16.msra.mxu1 %v5886_v35 }
 0x8a8   :  { %3100 = vmatprep.subr.bf16.mxu0 %v5893_v40  ;;  %3182 = vmatprep.subr.bf16.mxu1 %v5895_v45 }
 0x8ab   :  { %3101 = vmatpush1.bf16.msra.mxu0 %v5892_v42  ;;  %3183 = vmatpush1.bf16.msra.mxu1 %v5894_v43 }
 0x8ac   :  { %3102 = vmatprep.subr.bf16.mxu0 %v5901_v49  ;;  %3184 = vmatprep.subr.bf16.mxu1 %v5903_v53 }
 0x8af   :  { %3103 = vmatpush1.bf16.msra.mxu0 %v5900_v51  ;;  %3185 = vmatpush1.bf16.msra.mxu1 %v5902_v52 }
 0x8b0   :  { %3113 = vmatprep.subr.bf16.mxu0 %v5909_v57  ;;  %3195 = vmatprep.subr.bf16.mxu1 %v5911_v61 }
 0x945   :  { %v1357_v4 = vpop.f32.mrb[24].mxu0  ;;  %v1410_v5 = vpop.f32.mrb[20].mxu1 }
 0x946   :  { %v1359_v8 = vpop.f32.mrb[25].mxu0  ;;  %v1412_v9 = vpop.f32.mrb[21].mxu1  ;;  %v1358_v10 = vadd.f32 %v1357_v4, %v986_v2  ;;  %v1411_v11 = vadd.f32 %v1410_v5, %v994_v3 }
 0x947   :  { %v1361_v0 = vpop.f32.mrb[26].mxu0  ;;  %v1414_v44 = vpop.f32.mrb[22].mxu1  ;;  %v1360_v15 = vadd.f32 %v1359_v8, %v990_v6  ;;  %v1413_v16 = vadd.f32 %v1412_v9, %v998_v7 }
 0x948   :  { %v1362_v12 = vadd.f32 %v1361_v0, %v986_v2  ;;  %v1415_v13 = vadd.f32 %v1414_v44, %v994_v3  ;;  %v1363_v30 = vpop.f32.mrb[27].mxu0  ;;  %v1416_v14 = vpop.f32.mrb[23].mxu1 }
 0x949   :  { %v1364_v17 = vadd.f32 %v1363_v30, %v990_v6  ;;  %v1417_v18 = vadd.f32 %v1416_v14, %v998_v7 }
 0x94a   :  { %v1429_v21 = vmax.f32 %v1358_v10, %v1362_v12  ;;  %v1443_v23 = vmax.f32 %v1411_v11, %v1415_v13 }
 0x94b   :  { %v1436_v24 = vmax.f32 %v1360_v15, %v1364_v17  ;;  %v1450_v25 = vmax.f32 %v1413_v16, %v1417_v18 }
 0x94c   :  { %v1430_v26 = vrot.slane %v1429_v21, 4  ;;  %v1444_v27 = vrot.slane %v1443_v23, 4 }
 0x94d   :  { %v1437_v28 = vrot.slane %v1436_v24, 4  ;;  %v1451_v29 = vrot.slane %v1450_v25, 4  ;;  %v1367_v31 = vpop.f32.mrb[28].mxu0  ;;  %v1420_v32 = vpop.f32.mrb[24].mxu1 }
 0x94e   :  { %v1431_v33 = vmax.f32 %v1429_v21, %v1430_v26  ;;  %v1445_v34 = vmax.f32 %v1443_v23, %v1444_v27  ;;  %v1369_v35 = vpop.f32.mrb[29].mxu0  ;;  %v1422_v36 = vpop.f32.mrb[25].mxu1  ;;  %v1368_v41 = vadd.f32 %v1367_v31, %v986_v2  ;;  %v1421_v42 = vadd.f32 %v1420_v32, %v994_v3 }
 0x94f   :  { %v1438_v37 = vmax.f32 %v1436_v24, %v1437_v28  ;;  %v1452_v38 = vmax.f32 %v1450_v25, %v1451_v29  ;;  %v1371_v39 = vpop.f32.mrb[30].mxu0  ;;  %v1424_v40 = vpop.f32.mrb[26].mxu1  ;;  %v1370_v48 = vadd.f32 %v1369_v35, %v990_v6  ;;  %v1423_v49 = vadd.f32 %v1422_v36, %v998_v7 }
 0x950   :  { %v1372_v43 = vadd.f32 %v1371_v39, %v986_v2  ;;  %v1425_v45 = vadd.f32 %v1424_v40, %v994_v3  ;;  %v1373_v46 = vpop.f32.mrb[31].mxu0  ;;  %v1426_v47 = vpop.f32.mrb[27].mxu1  ;;  %v1432_v52 = vrot.slane %v1431_v33, 2  ;;  %v1446_v53 = vrot.slane %v1445_v34, 2 }
 0x951   :  { %v1374_v50 = vadd.f32 %v1373_v46, %v990_v6  ;;  %v1427_v51 = vadd.f32 %v1426_v47, %v998_v7  ;;  %v1439_v63 = vrot.slane %v1438_v37, 2  ;;  %v1453_v4 = vrot.slane %v1452_v38, 2 }
 0x952   :  { %v1457_v57 = vmax.f32 %v1368_v41, %v1372_v43  ;;  %v1471_v61 = vmax.f32 %v1421_v42, %v1425_v45  ;;  %v1433_v2 = vmax.f32 %v1431_v33, %v1432_v52  ;;  %v1447_v3 = vmax.f32 %v1445_v34, %v1446_v53  ;;  %v1630_v43 = vld [vmem:[#allocation10 + $0x440] sm:$0xff] }
 0x953   :  { %v1464_v5 = vmax.f32 %v1370_v48, %v1374_v50  ;;  %v1478_v8 = vmax.f32 %v1423_v49, %v1427_v51  ;;  %v1440_v13 = vmax.f32 %v1438_v37, %v1439_v63  ;;  %v1454_v30 = vmax.f32 %v1452_v38, %v1453_v4  ;;  %v1634_v48 = vld [vmem:[#allocation10 + $0x460] sm:$0xff]  ;;  %v1631_v49 = vld [vmem:[#allocation10 + $0x448] sm:$0xff] }
 0x954   :  { %v1458_v9 = vrot.slane %v1457_v57, 4  ;;  %v1472_v0 = vrot.slane %v1471_v61, 4  ;;  %v1434_v18 = vrot.slane %v1433_v2, 1  ;;  %v1448_v21 = vrot.slane %v1447_v3, 1  ;;  %v1635_v50 = vld [vmem:[#allocation10 + $0x468] sm:$0xff]  ;;  %v1638_v53 = vld [vmem:[#allocation10 + $0x480] sm:$0xff] }
 0x955   :  { %v1465_v44 = vrot.slane %v1464_v5, 4  ;;  %v1479_v10 = vrot.slane %v1478_v8, 4  ;;  %v1441_v25 = vrot.slane %v1440_v13, 1  ;;  %v1455_v26 = vrot.slane %v1454_v30, 1  ;;  %v1642_v63 = vld [vmem:[#allocation10 + $0x4a0] sm:$0xff]  ;;  %v1639_v4 = vld [vmem:[#allocation10 + $0x488] sm:$0xff] }
 0x956   :  { %v1459_v11 = vmax.f32 %v1457_v57, %v1458_v9  ;;  %v1473_v12 = vmax.f32 %v1471_v61, %v1472_v0  ;;  %v1435_v34 = vmax.f32 %v1433_v2, %v1434_v18  ;;  %v1449_v35 = vmax.f32 %v1447_v3, %v1448_v21  ;;  %v1646_v2 = vld [vmem:[#allocation10 + $0x4c0] sm:$0xff]  ;;  %v1663_v18 = vld [vmem:[#allocation10 + $0x548] sm:$0xff] }
 0x957   :  { %v1466_v6 = vmax.f32 %v1464_v5, %v1465_v44  ;;  %v1480_v7 = vmax.f32 %v1478_v8, %v1479_v10  ;;  %v1442_v38 = vmax.f32 %v1440_v13, %v1441_v25  ;;  %v1456_v39 = vmax.f32 %v1454_v30, %v1455_v26  ;;  %v1643_v5 = vld [vmem:[#allocation10 + $0x4a8] sm:$0xff]  ;;  %v1650_v3 = vld [vmem:[#allocation10 + $0x4e0] sm:$0xff] }
 0x958   :  { %v1460_v14 = vrot.slane %v1459_v11, 2  ;;  %v1474_v15 = vrot.slane %v1473_v12, 2  ;;  %v5917_v57 = vcombine.high %v1630_v43, %v1634_v48  ;;  %v5919_v61 = vcombine.high %v1631_v49, %v1635_v50  ;;  %v1655_v13 = vld [vmem:[#allocation10 + $0x508] sm:$0xff] }
 0x959   :  { %v1467_v16 = vrot.slane %v1466_v6, 2  ;;  %v1481_v17 = vrot.slane %v1480_v7, 2  ;;  %v5916_v9 = vcombine.low %v1630_v43, %v1634_v48  ;;  %v5918_v0 = vcombine.low %v1631_v49, %v1635_v50  ;;  %v1659_v30 = vld [vmem:[#allocation10 + $0x528] sm:$0xff] }
 0x95a   :  { %v1461_v23 = vmax.f32 %v1459_v11, %v1460_v14  ;;  %v1475_v24 = vmax.f32 %v1473_v12, %v1474_v15  ;;  %v5925_v44 = vcombine.high %v1638_v53, %v1642_v63  ;;  %v5927_v10 = vcombine.high %v1639_v4, %v1643_v5  ;;  %v1647_v11 = vld [vmem:[#allocation10 + $0x4c8] sm:$0xff] }
 0x95b   :  { %v1468_v27 = vmax.f32 %v1466_v6, %v1467_v16  ;;  %v1482_v28 = vmax.f32 %v1480_v7, %v1481_v17  ;;  %v1651_v12 = vld [vmem:[#allocation10 + $0x4e8] sm:$0xff]  ;;  %v5924_v54 = vcombine.low %v1638_v53, %v1642_v63  ;;  %v5926_v55 = vcombine.low %v1639_v4, %v1643_v5  ;;  %v1662_v16 = vld [vmem:[#allocation10 + $0x540] sm:$0xff] }
 0x95c   :  { %v1462_v29 = vrot.slane %v1461_v23, 1  ;;  %v1476_v31 = vrot.slane %v1475_v24, 1  ;;  %v5933_v56 = vcombine.high %v1646_v2, %v1650_v3  ;;  %v5935_v58 = vcombine.high %v1647_v11, %v1651_v12  ;;  %v1666_v17 = vld [vmem:[#allocation10 + $0x560] sm:$0xff]  ;;  %v1667_v21 = vld [vmem:[#allocation10 + $0x568] sm:$0xff] }
 0x95d   :  { %v1469_v32 = vrot.slane %v1468_v27, 1  ;;  %v1483_v33 = vrot.slane %v1482_v28, 1  ;;  %v5932_v6 = vcombine.low %v1646_v2, %v1650_v3  ;;  %v5934_v7 = vcombine.low %v1647_v11, %v1651_v12  ;;  %v1687_v48 = vld [vmem:[#allocation10 + $0x608] sm:$0xff]  ;;  %v1694_v63 = vld [vmem:[#allocation10 + $0x640] sm:$0xff] }
 0x95e   :  { %v1463_v36 = vmax.f32 %v1461_v23, %v1462_v29  ;;  %v1477_v37 = vmax.f32 %v1475_v24, %v1476_v31  ;;  %v5943_v15 = vcombine.high %v1655_v13, %v1659_v30  ;;  %v5942_v24 = vcombine.low %v1655_v13, %v1659_v30  ;;  %v1671_v29 = vld [vmem:[#allocation10 + $0x588] sm:$0xff]  ;;  %v1698_v4 = vld [vmem:[#allocation10 + $0x660] sm:$0xff] }
 0x95f   :  { %v1470_v40 = vmax.f32 %v1468_v27, %v1469_v32  ;;  %v1484_v41 = vmax.f32 %v1482_v28, %v1483_v33  ;;  %v5949_v25 = vcombine.high %v1662_v16, %v1666_v17  ;;  %v5951_v26 = vcombine.high %v1663_v18, %v1667_v21  ;;  %v1670_v27 = vld [vmem:[#allocation10 + $0x580] sm:$0xff]  ;;  %v1675_v31 = vld [vmem:[#allocation10 + $0x5a8] sm:$0xff] }
 0x960   :  { %v1486_v42 = vsel %vm1485_vm0, %v1435_v34, %v1463_v36  ;;  %v7596_v45 = vsel %vm1485_vm0, %v1449_v35, %v1477_v37  ;;  %v1674_v28 = vld [vmem:[#allocation10 + $0x5a0] sm:$0xff]  ;;  %v5948_v32 = vcombine.low %v1662_v16, %v1666_v17  ;;  %v5950_v33 = vcombine.low %v1663_v18, %v1667_v21  ;;  %v1691_v49 = vld [vmem:[#allocation10 + $0x628] sm:$0xff] }
 0x961   :  { %v1487_v46 = vsel %vm1485_vm0, %v1442_v38, %v1470_v40  ;;  %v1489_v47 = vsel %vm1485_vm0, %v1456_v39, %v1484_v41  ;;  %v7600_v52 = vpack.c.bf16 %v1486_v42, %v1486_v42  ;;  %v5957_v34 = vcombine.high %v1670_v27, %v1674_v28  ;;  %v1678_v36 = vld [vmem:[#allocation10 + $0x5c0] sm:$0xff]  ;;  %v1679_v38 = vld [vmem:[#allocation10 + $0x5c8] sm:$0xff] }
 0x962   :  { %v7598_v51 = vpack.c.bf16 %v1487_v46, %v1487_v46  ;;  %v7606_v8 = vpack.c.bf16 %v1489_v47, %v1489_v47  ;;  %v5959_v35 = vcombine.high %v1671_v29, %v1675_v31  ;;  %v1682_v37 = vld [vmem:[#allocation10 + $0x5e0] sm:$0xff]  ;;  %v1683_v39 = vld [vmem:[#allocation10 + $0x5e8] sm:$0xff]  ;;  %v5956_v40 = vcombine.low %v1670_v27, %v1674_v28 }
 0x963   :  { %v5958_v41 = vcombine.low %v1671_v29, %v1675_v31  ;;  %v5965_v42 = vcombine.high %v1678_v36, %v1682_v37  ;;  %v5967_v43 = vcombine.high %v1679_v38, %v1683_v39  ;;  %v1686_v46 = vld [vmem:[#allocation10 + $0x600] sm:$0xff]  ;;  %v5964_v50 = vcombine.low %v1678_v36, %v1682_v37  ;;  %v1695_v5 = vld [vmem:[#allocation10 + $0x648] sm:$0xff] }
 0x964   :  { %3104 = vmatprep.mubr.bf16.mxu0 %v7598_v51  ;;  %3186 = vmatprep.mubr.bf16.mxu1 %v7598_v51  ;;  %v1690_v47 = vld [vmem:[#allocation10 + $0x620] sm:$0xff]  ;;  %v5966_v53 = vcombine.low %v1679_v38, %v1683_v39  ;;  %v1703_v12 = vld [vmem:[#allocation10 + $0x688] sm:$0xff] }
 0x965   :  { %3105 = vmatmul.mubr.bf16.vlgmr.msra.gmra.mrb[32].mxu0 %v7600_v52  ;;  %3187 = vmatmul.mubr.bf16.vlgmr.msra.gmra.mrb[28].mxu1 %v7600_v52  ;;  %v1702_v3 = vld [vmem:[#allocation10 + $0x680] sm:$0xff]  ;;  %v1711_v30 = vld [vmem:[#allocation10 + $0x6c8] sm:$0xff] }
 0x966   :  { %3114 = vmatpush1.bf16.msra.mxu0 %v5908_v59  ;;  %3196 = vmatpush1.bf16.msra.mxu1 %v5910_v60  ;;  %v1654_v59 = vld [vmem:[#allocation10 + $0x500] sm:$0xff]  ;;  %v1719_v21 = vld [vmem:[#allocation10 + $0x708] sm:$0xff] }
 0x967   :  { %3145 = vmatprep.mubr.bf16.mxu0 %v7606_v8  ;;  %3227 = vmatprep.mubr.bf16.mxu1 %v7606_v8  ;;  %v1658_v60 = vld [vmem:[#allocation10 + $0x520] sm:$0xff]  ;;  %v1727_v31 = vld [vmem:[#allocation10 + $0x748] sm:$0xff] }
 0x968   :  { %3115 = vmatprep.subr.bf16.mxu0 %v5917_v57  ;;  %3197 = vmatprep.subr.bf16.mxu1 %v5919_v61  ;;  %v5941_v14 = vcombine.high %v1654_v59, %v1658_v60  ;;  %v5940_v23 = vcombine.low %v1654_v59, %v1658_v60  ;;  %v5973_v57 = vcombine.high %v1686_v46, %v1690_v47  ;;  %v1706_v11 = vld [vmem:[#allocation10 + $0x6a0] sm:$0xff]  ;;  %v1735_v39 = vld [vmem:[#allocation10 + $0x788] sm:$0xff] }
 0x969   :  { %v5975_v61 = vcombine.high %v1687_v48, %v1691_v49  ;;  %v1710_v60 = vld [vmem:[#allocation10 + $0x6c0] sm:$0xff] }
 0x96a   :  { %3116 = vmatpush1.bf16.msra.mxu0 %v5916_v9  ;;  %3198 = vmatpush1.bf16.msra.mxu1 %v5918_v0  ;;  %v1699_v9 = vld [vmem:[#allocation10 + $0x668] sm:$0xff]  ;;  %v5972_v0 = vcombine.low %v1686_v46, %v1690_v47  ;;  %v1714_v13 = vld [vmem:[#allocation10 + $0x6e0] sm:$0xff] }
 0x96b   :  { %3117 = vmatprep.subr.bf16.mxu0 %v5925_v44  ;;  %3199 = vmatprep.subr.bf16.mxu1 %v5927_v10  ;;  %v5974_v44 = vcombine.low %v1687_v48, %v1691_v49  ;;  %v5981_v10 = vcombine.high %v1694_v63, %v1698_v4  ;;  %v5983_v2 = vcombine.high %v1695_v5, %v1699_v9  ;;  %v1718_v17 = vld [vmem:[#allocation10 + $0x700] sm:$0xff]  ;;  %v1743_v49 = vld [vmem:[#allocation10 + $0x7c8] sm:$0xff] }
 0x96c   :  { %v1722_v18 = vld [vmem:[#allocation10 + $0x720] sm:$0xff] }
 0x96d   :  { %v1726_v28 = vld [vmem:[#allocation10 + $0x740] sm:$0xff] }
 0x96e   :  { %3118 = vmatpush1.bf16.msra.mxu0 %v5924_v54  ;;  %3200 = vmatpush1.bf16.msra.mxu1 %v5926_v55  ;;  %v1707_v54 = vld [vmem:[#allocation10 + $0x6a8] sm:$0xff]  ;;  %v5980_v55 = vcombine.low %v1694_v63, %v1698_v4  ;;  %v1730_v29 = vld [vmem:[#allocation10 + $0x760] sm:$0xff]  ;;  %v1496_v4 = vld [vmem:[#allocation10 + $0x10] sm:$0xff] }
 0x96f   :  { %3119 = vmatprep.subr.bf16.mxu0 %v5933_v56  ;;  %3201 = vmatprep.subr.bf16.mxu1 %v5935_v58  ;;  %v5982_v56 = vcombine.low %v1695_v5, %v1699_v9  ;;  %v5989_v58 = vcombine.high %v1702_v3, %v1706_v11  ;;  %v5991_v59 = vcombine.high %v1703_v12, %v1707_v54  ;;  %v1734_v37 = vld [vmem:[#allocation10 + $0x780] sm:$0xff]  ;;  %v1500_v5 = vld [vmem:[#allocation10 + $0x30] sm:$0xff]  ;;  %v1497_v9 = vld [vmem:[#allocation10 + $0x18] sm:$0xff] }
 0x970   :  { %v1738_v38 = vld [vmem:[#allocation10 + $0x7a0] sm:$0xff] }
 0x971   :  { %v1742_v47 = vld [vmem:[#allocation10 + $0x7c0] sm:$0xff] }
 0x972   :  { %3120 = vmatpush1.bf16.msra.mxu0 %v5932_v6  ;;  %3202 = vmatpush1.bf16.msra.mxu1 %v5934_v7  ;;  %v1715_v6 = vld [vmem:[#allocation10 + $0x6e8] sm:$0xff]  ;;  %v5988_v7 = vcombine.low %v1702_v3, %v1706_v11  ;;  %v1746_v48 = vld [vmem:[#allocation10 + $0x7e0] sm:$0xff]  ;;  %v1504_v11 = vld [vmem:[#allocation10 + $0x50] sm:$0xff] }
 0x973   :  { %3121 = vmatprep.subr.bf16.mxu0 %v5941_v14  ;;  %3203 = vmatprep.subr.bf16.mxu1 %v5943_v15  ;;  %v5990_v14 = vcombine.low %v1703_v12, %v1707_v54  ;;  %v5997_v15 = vcombine.high %v1710_v60, %v1714_v13  ;;  %v5999_v16 = vcombine.high %v1711_v30, %v1715_v6  ;;  %v1508_v12 = vld [vmem:[#allocation10 + $0x70] sm:$0xff]  ;;  %v1505_v54 = vld [vmem:[#allocation10 + $0x58] sm:$0xff] }
 0x976   :  { %3122 = vmatpush1.bf16.msra.mxu0 %v5940_v23  ;;  %3204 = vmatpush1.bf16.msra.mxu1 %v5942_v24  ;;  %v1723_v23 = vld [vmem:[#allocation10 + $0x728] sm:$0xff]  ;;  %v5996_v24 = vcombine.low %v1710_v60, %v1714_v13  ;;  %v5793_v60 = vcombine.high %v1504_v11, %v1508_v12 }
 0x977   :  { %3123 = vmatprep.subr.bf16.mxu0 %v5949_v25  ;;  %3205 = vmatprep.subr.bf16.mxu1 %v5951_v26  ;;  %v5998_v25 = vcombine.low %v1711_v30, %v1715_v6  ;;  %v6005_v26 = vcombine.high %v1718_v17, %v1722_v18  ;;  %v6007_v27 = vcombine.high %v1719_v21, %v1723_v23  ;;  %v1512_v30 = vld [vmem:[#allocation10 + $0x90] sm:$0xff] }
 0x978   :  { %v1516_v6 = vld [vmem:[#allocation10 + $0xb0] sm:$0xff] }
 0x97a   :  { %3124 = vmatpush1.bf16.msra.mxu0 %v5948_v32  ;;  %3206 = vmatpush1.bf16.msra.mxu1 %v5950_v33  ;;  %v1731_v32 = vld [vmem:[#allocation10 + $0x768] sm:$0xff]  ;;  %v6004_v33 = vcombine.low %v1718_v17, %v1722_v18  ;;  %v1520_v18 = vld [vmem:[#allocation10 + $0xd0] sm:$0xff] }
 0x97b   :  { %3125 = vmatprep.subr.bf16.mxu0 %v5957_v34  ;;  %3207 = vmatprep.subr.bf16.mxu1 %v5959_v35  ;;  %v6006_v34 = vcombine.low %v1719_v21, %v1723_v23  ;;  %v6013_v35 = vcombine.high %v1726_v28, %v1730_v29  ;;  %v6015_v36 = vcombine.high %v1727_v31, %v1731_v32  ;;  %v1524_v21 = vld [vmem:[#allocation10 + $0xf0] sm:$0xff]  ;;  %v1521_v23 = vld [vmem:[#allocation10 + $0xd8] sm:$0xff] }
 0x97e   :  { %3126 = vmatpush1.bf16.msra.mxu0 %v5956_v40  ;;  %3208 = vmatpush1.bf16.msra.mxu1 %v5958_v41  ;;  %v1739_v40 = vld [vmem:[#allocation10 + $0x7a8] sm:$0xff]  ;;  %v6012_v41 = vcombine.low %v1726_v28, %v1730_v29  ;;  %v1528_v29 = vld [vmem:[#allocation10 + $0x110] sm:$0xff] }
 0x97f   :  { %3127 = vmatprep.subr.bf16.mxu0 %v5965_v42  ;;  %3209 = vmatprep.subr.bf16.mxu1 %v5967_v43  ;;  %v6014_v42 = vcombine.low %v1727_v31, %v1731_v32  ;;  %v6021_v43 = vcombine.high %v1734_v37, %v1738_v38  ;;  %v6023_v46 = vcombine.high %v1735_v39, %v1739_v40  ;;  %v1532_v31 = vld [vmem:[#allocation10 + $0x130] sm:$0xff]  ;;  %v1533_v32 = vld [vmem:[#allocation10 + $0x138] sm:$0xff] }
 0x982   :  { %3128 = vmatpush1.bf16.msra.mxu0 %v5964_v50  ;;  %3210 = vmatpush1.bf16.msra.mxu1 %v5966_v53  ;;  %v1747_v50 = vld [vmem:[#allocation10 + $0x7e8] sm:$0xff]  ;;  %v6020_v53 = vcombine.low %v1734_v37, %v1738_v38  ;;  %v1536_v37 = vld [vmem:[#allocation10 + $0x150] sm:$0xff] }
 0x983   :  { %3129 = vmatprep.subr.bf16.mxu0 %v5973_v57  ;;  %3211 = vmatprep.subr.bf16.mxu1 %v5975_v61  ;;  %v6022_v57 = vcombine.low %v1735_v39, %v1739_v40  ;;  %v6029_v61 = vcombine.high %v1742_v47, %v1746_v48  ;;  %v6031_v63 = vcombine.high %v1743_v49, %v1747_v50  ;;  %v1540_v38 = vld [vmem:[#allocation10 + $0x170] sm:$0xff]  ;;  %v1537_v39 = vld [vmem:[#allocation10 + $0x158] sm:$0xff] }
 0x984   :  { %v1541_v40 = vld [vmem:[#allocation10 + $0x178] sm:$0xff] }
 0x986   :  { %3130 = vmatpush1.bf16.msra.mxu0 %v5972_v0  ;;  %3212 = vmatpush1.bf16.msra.mxu1 %v5974_v44  ;;  %v1501_v0 = vld [vmem:[#allocation10 + $0x38] sm:$0xff]  ;;  %v6028_v44 = vcombine.low %v1742_v47, %v1746_v48  ;;  %v1544_v47 = vld [vmem:[#allocation10 + $0x190] sm:$0xff] }
 0x987   :  { %3131 = vmatprep.subr.bf16.mxu0 %v5981_v10  ;;  %3213 = vmatprep.subr.bf16.mxu1 %v5983_v2  ;;  %v6030_v10 = vcombine.low %v1743_v49, %v1747_v50  ;;  %v5785_v2 = vcombine.high %v1496_v4, %v1500_v5  ;;  %v5787_v3 = vcombine.high %v1497_v9, %v1501_v0  ;;  %v1548_v48 = vld [vmem:[#allocation10 + $0x1b0] sm:$0xff]  ;;  %v1545_v49 = vld [vmem:[#allocation10 + $0x198] sm:$0xff] }
 0x988   :  { %v1549_v50 = vld [vmem:[#allocation10 + $0x1b8] sm:$0xff] }
 0x98a   :  { %3132 = vmatpush1.bf16.msra.mxu0 %v5980_v55  ;;  %3214 = vmatpush1.bf16.msra.mxu1 %v5982_v56  ;;  %v1509_v55 = vld [vmem:[#allocation10 + $0x78] sm:$0xff]  ;;  %v5784_v56 = vcombine.low %v1496_v4, %v1500_v5  ;;  %v1552_v4 = vld [vmem:[#allocation10 + $0x1d0] sm:$0xff] }
 0x98b   :  { %3133 = vmatprep.subr.bf16.mxu0 %v5989_v58  ;;  %3215 = vmatprep.subr.bf16.mxu1 %v5991_v59  ;;  %v7618_v58 = vpack.c.bf16 %v7596_v45, %v7596_v45  ;;  %v5786_v59 = vcombine.low %v1497_v9, %v1501_v0  ;;  %v5795_v13 = vcombine.high %v1505_v54, %v1509_v55  ;;  %v1556_v5 = vld [vmem:[#allocation10 + $0x1f0] sm:$0xff]  ;;  %v1553_v9 = vld [vmem:[#allocation10 + $0x1d8] sm:$0xff] }
 0x98c   :  { %v5794_v45 = vcombine.low %v1505_v54, %v1509_v55  ;;  %v1557_v0 = vld [vmem:[#allocation10 + $0x1f8] sm:$0xff] }
 0x98d   :  { %v1561_v54 = vld [vmem:[#allocation10 + $0x218] sm:$0xff] }
 0x98e   :  { %3134 = vmatpush1.bf16.msra.mxu0 %v5988_v7  ;;  %3216 = vmatpush1.bf16.msra.mxu1 %v5990_v14  ;;  %v1513_v7 = vld [vmem:[#allocation10 + $0x98] sm:$0xff] }
 0x98f   :  { %3135 = vmatprep.subr.bf16.mxu0 %v5997_v15  ;;  %3217 = vmatprep.subr.bf16.mxu1 %v5999_v16  ;;  %v1517_v14 = vld [vmem:[#allocation10 + $0xb8] sm:$0xff]  ;;  %v5792_v15 = vcombine.low %v1504_v11, %v1508_v12  ;;  %v5801_v16 = vcombine.high %v1512_v30, %v1516_v6  ;;  %v1560_v11 = vld [vmem:[#allocation10 + $0x210] sm:$0xff] }
 0x990   :  { %v5803_v17 = vcombine.high %v1513_v7, %v1517_v14  ;;  %v1564_v12 = vld [vmem:[#allocation10 + $0x230] sm:$0xff]  ;;  %v1565_v55 = vld [vmem:[#allocation10 + $0x238] sm:$0xff] }
 0x992   :  { %3136 = vmatpush1.bf16.msra.mxu0 %v5996_v24  ;;  %3218 = vmatpush1.bf16.msra.mxu1 %v5998_v25  ;;  %v1525_v24 = vld [vmem:[#allocation10 + $0xf8] sm:$0xff]  ;;  %v5800_v25 = vcombine.low %v1512_v30, %v1516_v6  ;;  %v1568_v30 = vld [vmem:[#allocation10 + $0x250] sm:$0xff] }
 0x993   :  { %3137 = vmatprep.subr.bf16.mxu0 %v6005_v26  ;;  %3219 = vmatprep.subr.bf16.mxu1 %v6007_v27  ;;  %v5802_v26 = vcombine.low %v1513_v7, %v1517_v14  ;;  %v5809_v27 = vcombine.high %v1520_v18, %v1524_v21  ;;  %v5811_v28 = vcombine.high %v1521_v23, %v1525_v24  ;;  %v1572_v6 = vld [vmem:[#allocation10 + $0x270] sm:$0xff]  ;;  %v1569_v7 = vld [vmem:[#allocation10 + $0x258] sm:$0xff] }
 0x994   :  { %v1573_v14 = vld [vmem:[#allocation10 + $0x278] sm:$0xff] }
 0x996   :  { %3138 = vmatpush1.bf16.msra.mxu0 %v6004_v33  ;;  %3220 = vmatpush1.bf16.msra.mxu1 %v6006_v34  ;;  %v5808_v33 = vcombine.low %v1520_v18, %v1524_v21  ;;  %v5810_v34 = vcombine.low %v1521_v23, %v1525_v24  ;;  %v1576_v18 = vld [vmem:[#allocation10 + $0x290] sm:$0xff]  ;;  %v1577_v23 = vld [vmem:[#allocation10 + $0x298] sm:$0xff] }
 0x997   :  { %3139 = vmatprep.subr.bf16.mxu0 %v6013_v35  ;;  %3221 = vmatprep.subr.bf16.mxu1 %v6015_v36  ;;  %v5817_v35 = vcombine.high %v1528_v29, %v1532_v31  ;;  %v1580_v21 = vld [vmem:[#allocation10 + $0x2b0] sm:$0xff]  ;;  %v1581_v24 = vld [vmem:[#allocation10 + $0x2b8] sm:$0xff] }
 0x99a   :  { %3140 = vmatpush1.bf16.msra.mxu0 %v6012_v41  ;;  %3222 = vmatpush1.bf16.msra.mxu1 %v6014_v42  ;;  %v5816_v41 = vcombine.low %v1528_v29, %v1532_v31  ;;  %v1584_v29 = vld [vmem:[#allocation10 + $0x2d0] sm:$0xff] }
 0x99b   :  { %3141 = vmatprep.subr.bf16.mxu0 %v6021_v43  ;;  %3223 = vmatprep.subr.bf16.mxu1 %v6023_v46  ;;  %v5825_v43 = vcombine.high %v1536_v37, %v1540_v38  ;;  %v5827_v46 = vcombine.high %v1537_v39, %v1541_v40  ;;  %v1588_v31 = vld [vmem:[#allocation10 + $0x2f0] sm:$0xff] }
 0x99e   :  { %3142 = vmatpush1.bf16.msra.mxu0 %v6020_v53  ;;  %3224 = vmatpush1.bf16.msra.mxu1 %v6022_v57  ;;  %v5824_v53 = vcombine.low %v1536_v37, %v1540_v38  ;;  %v5826_v57 = vcombine.low %v1537_v39, %v1541_v40  ;;  %v1592_v37 = vld [vmem:[#allocation10 + $0x310] sm:$0xff]  ;;  %v1593_v39 = vld [vmem:[#allocation10 + $0x318] sm:$0xff] }
 0x99f   :  { %3143 = vmatprep.subr.bf16.mxu0 %v6029_v61  ;;  %3225 = vmatprep.subr.bf16.mxu1 %v6031_v63  ;;  %v5833_v61 = vcombine.high %v1544_v47, %v1548_v48  ;;  %v5835_v63 = vcombine.high %v1545_v49, %v1549_v50  ;;  %v1596_v38 = vld [vmem:[#allocation10 + $0x330] sm:$0xff]  ;;  %v1597_v40 = vld [vmem:[#allocation10 + $0x338] sm:$0xff] }
 0x9a2   :  { %3144 = vmatpush1.bf16.msra.mxu0 %v6028_v44  ;;  %3226 = vmatpush1.bf16.msra.mxu1 %v6030_v10  ;;  %v5832_v44 = vcombine.low %v1544_v47, %v1548_v48  ;;  %v5834_v10 = vcombine.low %v1545_v49, %v1549_v50  ;;  %v1600_v47 = vld [vmem:[#allocation10 + $0x350] sm:$0xff]  ;;  %v1601_v49 = vld [vmem:[#allocation10 + $0x358] sm:$0xff] }
 0x9a3   :  { %3236 = vmatprep.subr.bf16.mxu0 %v5785_v2  ;;  %3318 = vmatprep.subr.bf16.mxu1 %v5787_v3  ;;  %v5841_v2 = vcombine.high %v1552_v4, %v1556_v5  ;;  %v5843_v3 = vcombine.high %v1553_v9, %v1557_v0  ;;  %v1604_v48 = vld [vmem:[#allocation10 + $0x370] sm:$0xff]  ;;  %v1605_v50 = vld [vmem:[#allocation10 + $0x378] sm:$0xff] }
 0x9a5   :  { %3146 = vmatmul.mubr.bf16.vlgmr.msra.gmra.mrb[32].mxu0 %v7618_v58  ;;  %3228 = vmatmul.mubr.bf16.vlgmr.msra.gmra.mrb[28].mxu1 %v7618_v58 }
 0x9a6   :  { %3237 = vmatpush1.bf16.msra.mxu0 %v5784_v56  ;;  %3268 = vmatprep.mubr.bf16.mxu0 %v7598_v51  ;;  %v5840_v56 = vcombine.low %v1552_v4, %v1556_v5  ;;  %v1608_v4 = vld [vmem:[#allocation10 + $0x390] sm:$0xff] }
 0x9a7   :  { %3319 = vmatpush1.bf16.msra.mxu1 %v5786_v59  ;;  %3350 = vmatprep.mubr.bf16.mxu1 %v7598_v51  ;;  %v1529_v51 = vld [vmem:[#allocation10 + $0x118] sm:$0xff]  ;;  %v5842_v59 = vcombine.low %v1553_v9, %v1557_v0  ;;  %v1612_v5 = vld [vmem:[#allocation10 + $0x3b0] sm:$0xff] }
 0x9a8   :  { %3238 = vmatprep.subr.bf16.mxu0 %v5793_v60  ;;  %3320 = vmatprep.subr.bf16.mxu1 %v5795_v13  ;;  %v5819_v36 = vcombine.high %v1529_v51, %v1533_v32  ;;  %v5818_v42 = vcombine.low %v1529_v51, %v1533_v32  ;;  %v5849_v60 = vcombine.high %v1560_v11, %v1564_v12  ;;  %v1585_v51 = vld [vmem:[#allocation10 + $0x2d8] sm:$0xff] }
 0x9a9   :  { %v5851_v13 = vcombine.high %v1561_v54, %v1565_v55  ;;  %v1589_v32 = vld [vmem:[#allocation10 + $0x2f8] sm:$0xff] }
 0x9aa   :  { %3239 = vmatpush1.bf16.msra.mxu0 %v5792_v15  ;;  %v5848_v15 = vcombine.low %v1560_v11, %v1564_v12  ;;  %v1609_v9 = vld [vmem:[#allocation10 + $0x398] sm:$0xff]  ;;  %v1616_v11 = vld [vmem:[#allocation10 + $0x3d0] sm:$0xff] }
 0x9ab   :  { %3321 = vmatpush1.bf16.msra.mxu1 %v5794_v45  ;;  %3240 = vmatprep.subr.bf16.mxu0 %v5801_v16  ;;  %v5850_v45 = vcombine.low %v1561_v54, %v1565_v55  ;;  %v5857_v16 = vcombine.high %v1568_v30, %v1572_v6  ;;  %v1613_v0 = vld [vmem:[#allocation10 + $0x3b8] sm:$0xff]  ;;  %v1620_v12 = vld [vmem:[#allocation10 + $0x3f0] sm:$0xff] }
 0x9ac   :  { %3322 = vmatprep.subr.bf16.mxu1 %v5803_v17  ;;  %v5859_v17 = vcombine.high %v1569_v7, %v1573_v14  ;;  %v1617_v54 = vld [vmem:[#allocation10 + $0x3d8] sm:$0xff] }
 0x9ad   :  { %v1621_v55 = vld [vmem:[#allocation10 + $0x3f8] sm:$0xff] }
 0x9ae   :  { %3241 = vmatpush1.bf16.msra.mxu0 %v5800_v25  ;;  %v5856_v25 = vcombine.low %v1568_v30, %v1572_v6  ;;  %v1624_v30 = vld [vmem:[#allocation10 + $0x410] sm:$0xff] }
 0x9af   :  { %3323 = vmatpush1.bf16.msra.mxu1 %v5802_v26  ;;  %3242 = vmatprep.subr.bf16.mxu0 %v5809_v27  ;;  %v5858_v26 = vcombine.low %v1569_v7, %v1573_v14  ;;  %v5865_v27 = vcombine.high %v1576_v18, %v1580_v21  ;;  %v1628_v6 = vld [vmem:[#allocation10 + $0x430] sm:$0xff]  ;;  %v1625_v7 = vld [vmem:[#allocation10 + $0x418] sm:$0xff] }
 0x9b0   :  { %3324 = vmatprep.subr.bf16.mxu1 %v5811_v28  ;;  %v5867_v28 = vcombine.high %v1577_v23, %v1581_v24  ;;  %v1629_v14 = vld [vmem:[#allocation10 + $0x438] sm:$0xff] }
 0x9b2   :  { %3243 = vmatpush1.bf16.msra.mxu0 %v5808_v33  ;;  %v5864_v33 = vcombine.low %v1576_v18, %v1580_v21  ;;  %v1632_v18 = vld [vmem:[#allocation10 + $0x450] sm:$0xff] }
 0x9b3   :  { %3325 = vmatpush1.bf16.msra.mxu1 %v5810_v34  ;;  %3244 = vmatprep.subr.bf16.mxu0 %v5817_v35  ;;  %v5866_v34 = vcombine.low %v1577_v23, %v1581_v24  ;;  %v5873_v35 = vcombine.high %v1584_v29, %v1588_v31  ;;  %v1636_v21 = vld [vmem:[#allocation10 + $0x470] sm:$0xff]  ;;  %v5912_v23 = vcombine.low %v1624_v30, %v1628_v6  ;;  %v1633_v24 = vld [vmem:[#allocation10 + $0x458] sm:$0xff] }
 0x9b4   :  { %3326 = vmatprep.subr.bf16.mxu1 %v5819_v36  ;;  %v5875_v36 = vcombine.high %v1585_v51, %v1589_v32 }
 0x9b6   :  { %3245 = vmatpush1.bf16.msra.mxu0 %v5816_v41  ;;  %v5872_v41 = vcombine.low %v1584_v29, %v1588_v31  ;;  %v1644_v29 = vld [vmem:[#allocation10 + $0x4b0] sm:$0xff] }
 0x9b7   :  { %3327 = vmatpush1.bf16.msra.mxu1 %v5818_v42  ;;  %3246 = vmatprep.subr.bf16.mxu0 %v5825_v43  ;;  %v5874_v42 = vcombine.low %v1585_v51, %v1589_v32  ;;  %v5881_v43 = vcombine.high %v1592_v37, %v1596_v38  ;;  %v1641_v51 = vld [vmem:[#allocation10 + $0x498] sm:$0xff] }
 0x9b8   :  { %3328 = vmatprep.subr.bf16.mxu1 %v5827_v46  ;;  %v5883_v46 = vcombine.high %v1593_v39, %v1597_v40  ;;  %v1645_v32 = vld [vmem:[#allocation10 + $0x4b8] sm:$0xff] }
 0x9ba   :  { %3247 = vmatpush1.bf16.msra.mxu0 %v5824_v53  ;;  %v5880_v53 = vcombine.low %v1592_v37, %v1596_v38  ;;  %v1648_v37 = vld [vmem:[#allocation10 + $0x4d0] sm:$0xff] }
 0x9bb   :  { %3329 = vmatpush1.bf16.msra.mxu1 %v5826_v57  ;;  %3248 = vmatprep.subr.bf16.mxu0 %v5833_v61  ;;  %v5882_v57 = vcombine.low %v1593_v39, %v1597_v40  ;;  %v5889_v61 = vcombine.high %v1600_v47, %v1604_v48  ;;  %v1652_v38 = vld [vmem:[#allocation10 + $0x4f0] sm:$0xff]  ;;  %v1649_v39 = vld [vmem:[#allocation10 + $0x4d8] sm:$0xff] }
 0x9bc   :  { %3330 = vmatprep.subr.bf16.mxu1 %v5835_v63  ;;  %v5891_v63 = vcombine.high %v1601_v49, %v1605_v50  ;;  %v1653_v40 = vld [vmem:[#allocation10 + $0x4f8] sm:$0xff] }
 0x9be   :  { %3249 = vmatpush1.bf16.msra.mxu0 %v5832_v44  ;;  %v5888_v44 = vcombine.low %v1600_v47, %v1604_v48  ;;  %v1660_v47 = vld [vmem:[#allocation10 + $0x530] sm:$0xff]  ;;  %v1657_v48 = vld [vmem:[#allocation10 + $0x518] sm:$0xff] }
 0x9bf   :  { %3331 = vmatpush1.bf16.msra.mxu1 %v5834_v10  ;;  %3250 = vmatprep.subr.bf16.mxu0 %v5841_v2  ;;  %v5890_v10 = vcombine.low %v1601_v49, %v1605_v50  ;;  %v5897_v2 = vcombine.high %v1608_v4, %v1612_v5  ;;  %v1661_v49 = vld [vmem:[#allocation10 + $0x538] sm:$0xff]  ;;  %v5938_v50 = vcombine.low %v1649_v39, %v1653_v40 }
 0x9c0   :  { %3332 = vmatprep.subr.bf16.mxu1 %v5843_v3  ;;  %v5899_v3 = vcombine.high %v1609_v9, %v1613_v0 }
 0x9c2   :  { %3251 = vmatpush1.bf16.msra.mxu0 %v5840_v56  ;;  %v5896_v56 = vcombine.low %v1608_v4, %v1612_v5  ;;  %v1665_v4 = vld [vmem:[#allocation10 + $0x558] sm:$0xff] }
 0x9c3   :  { %3333 = vmatpush1.bf16.msra.mxu1 %v5842_v59  ;;  %3252 = vmatprep.subr.bf16.mxu0 %v5849_v60  ;;  %v5898_v59 = vcombine.low %v1609_v9, %v1613_v0  ;;  %v5905_v60 = vcombine.high %v1616_v11, %v1620_v12  ;;  %v1669_v5 = vld [vmem:[#allocation10 + $0x578] sm:$0xff]  ;;  %v5946_v0 = vcombine.low %v1657_v48, %v1661_v49 }
 0x9c4   :  { %3334 = vmatprep.subr.bf16.mxu1 %v5851_v13  ;;  %v5907_v13 = vcombine.high %v1617_v54, %v1621_v55 }
 0x9c6   :  { %3253 = vmatpush1.bf16.msra.mxu0 %v5848_v15  ;;  %v5904_v15 = vcombine.low %v1616_v11, %v1620_v12  ;;  %v1673_v11 = vld [vmem:[#allocation10 + $0x598] sm:$0xff] }
 0x9c7   :  { %3335 = vmatpush1.bf16.msra.mxu1 %v5850_v45  ;;  %3254 = vmatprep.subr.bf16.mxu0 %v5857_v16  ;;  %v5906_v45 = vcombine.low %v1617_v54, %v1621_v55  ;;  %v5913_v16 = vcombine.high %v1624_v30, %v1628_v6  ;;  %v1677_v12 = vld [vmem:[#allocation10 + $0x5b8] sm:$0xff]  ;;  %v5954_v55 = vcombine.low %v1665_v4, %v1669_v5 }
 0x9c8   :  { %3336 = vmatprep.subr.bf16.mxu1 %v5859_v17  ;;  %v5915_v17 = vcombine.high %v1625_v7, %v1629_v14  ;;  %v1681_v30 = vld [vmem:[#allocation10 + $0x5d8] sm:$0xff] }
 0x9c9   :  { %v1685_v6 = vld [vmem:[#allocation10 + $0x5f8] sm:$0xff] }
 0x9ca   :  { %3255 = vmatpush1.bf16.msra.mxu0 %v5856_v25  ;;  %v1637_v25 = vld [vmem:[#allocation10 + $0x478] sm:$0xff] }
 0x9cb   :  { %3337 = vmatpush1.bf16.msra.mxu1 %v5858_v26  ;;  %3256 = vmatprep.subr.bf16.mxu0 %v5865_v27  ;;  %v5914_v26 = vcombine.low %v1625_v7, %v1629_v14  ;;  %v5921_v27 = vcombine.high %v1632_v18, %v1636_v21  ;;  %v5923_v31 = vcombine.high %v1633_v24, %v1637_v25 }
 0x9cc   :  { %3338 = vmatprep.subr.bf16.mxu1 %v5867_v28  ;;  %v1640_v28 = vld [vmem:[#allocation10 + $0x490] sm:$0xff]  ;;  %v5962_v14 = vcombine.low %v1673_v11, %v1677_v12 }
 0x9ce   :  { %3257 = vmatpush1.bf16.msra.mxu0 %v5864_v33  ;;  %v5920_v33 = vcombine.low %v1632_v18, %v1636_v21  ;;  %v1689_v18 = vld [vmem:[#allocation10 + $0x618] sm:$0xff] }
 0x9cf   :  { %3339 = vmatpush1.bf16.msra.mxu1 %v5866_v34  ;;  %3258 = vmatprep.subr.bf16.mxu0 %v5873_v35  ;;  %v5922_v34 = vcombine.low %v1633_v24, %v1637_v25  ;;  %v5929_v35 = vcombine.high %v1640_v28, %v1644_v29  ;;  %v1693_v21 = vld [vmem:[#allocation10 + $0x638] sm:$0xff]  ;;  %v5970_v24 = vcombine.low %v1681_v30, %v1685_v6 }
 0x9d0   :  { %3340 = vmatprep.subr.bf16.mxu1 %v5875_v36  ;;  %v5931_v36 = vcombine.high %v1641_v51, %v1645_v32 }
 0x9d2   :  { %3259 = vmatpush1.bf16.msra.mxu0 %v5872_v41  ;;  %v5928_v41 = vcombine.low %v1640_v28, %v1644_v29  ;;  %v1700_v28 = vld [vmem:[#allocation10 + $0x670] sm:$0xff]  ;;  %v1697_v29 = vld [vmem:[#allocation10 + $0x658] sm:$0xff] }
 0x9d3   :  { %3341 = vmatpush1.bf16.msra.mxu1 %v5874_v42  ;;  %3260 = vmatprep.subr.bf16.mxu0 %v5881_v43  ;;  %v5937_v42 = vcombine.high %v1648_v37, %v1652_v38  ;;  %v5939_v43 = vcombine.high %v1649_v39, %v1653_v40 }
 0x9d4   :  { %3342 = vmatprep.subr.bf16.mxu1 %v5883_v46  ;;  %v1656_v46 = vld [vmem:[#allocation10 + $0x510] sm:$0xff] }
 0x9d5   :  { %v5944_v9 = vcombine.low %v1656_v46, %v1660_v47 }
 0x9d6   :  { %3261 = vmatpush1.bf16.msra.mxu0 %v5880_v53  ;;  %v5945_v53 = vcombine.high %v1656_v46, %v1660_v47  ;;  %v1713_v46 = vld [vmem:[#allocation10 + $0x6d8] sm:$0xff] }
 0x9d7   :  { %3343 = vmatpush1.bf16.msra.mxu1 %v5882_v57  ;;  %3262 = vmatprep.subr.bf16.mxu0 %v5889_v61  ;;  %v5947_v57 = vcombine.high %v1657_v48, %v1661_v49  ;;  %v1664_v61 = vld [vmem:[#allocation10 + $0x550] sm:$0xff]  ;;  %v1717_v47 = vld [vmem:[#allocation10 + $0x6f8] sm:$0xff] }
 0x9d8   :  { %3344 = vmatprep.subr.bf16.mxu1 %v5891_v63  ;;  %v1668_v63 = vld [vmem:[#allocation10 + $0x570] sm:$0xff] }
 0x9d9   :  { %v5952_v54 = vcombine.low %v1664_v61, %v1668_v63 }
 0x9da   :  { %3263 = vmatpush1.bf16.msra.mxu0 %v5888_v44  ;;  %v5953_v44 = vcombine.high %v1664_v61, %v1668_v63  ;;  %v1721_v61 = vld [vmem:[#allocation10 + $0x718] sm:$0xff] }
 0x9db   :  { %3345 = vmatpush1.bf16.msra.mxu1 %v5890_v10  ;;  %3264 = vmatprep.subr.bf16.mxu0 %v5897_v2  ;;  %v5955_v10 = vcombine.high %v1665_v4, %v1669_v5  ;;  %v1672_v2 = vld [vmem:[#allocation10 + $0x590] sm:$0xff]  ;;  %v1725_v63 = vld [vmem:[#allocation10 + $0x738] sm:$0xff]  ;;  %v6002_v5 = vcombine.low %v1713_v46, %v1717_v47 }
 0x9dc   :  { %3346 = vmatprep.subr.bf16.mxu1 %v5899_v3  ;;  %v1676_v3 = vld [vmem:[#allocation10 + $0x5b0] sm:$0xff] }
 0x9dd   :  { %v5960_v7 = vcombine.low %v1672_v2, %v1676_v3 }
 0x9de   :  { %3265 = vmatpush1.bf16.msra.mxu0 %v5896_v56  ;;  %v5961_v56 = vcombine.high %v1672_v2, %v1676_v3  ;;  %v1729_v2 = vld [vmem:[#allocation10 + $0x758] sm:$0xff] }
 0x9df   :  { %3347 = vmatpush1.bf16.msra.mxu1 %v5898_v59  ;;  %3266 = vmatprep.subr.bf16.mxu0 %v5905_v60  ;;  %v5963_v59 = vcombine.high %v1673_v11, %v1677_v12  ;;  %v1680_v60 = vld [vmem:[#allocation10 + $0x5d0] sm:$0xff]  ;;  %v1733_v3 = vld [vmem:[#allocation10 + $0x778] sm:$0xff]  ;;  %v6010_v12 = vcombine.low %v1721_v61, %v1725_v63 }
 0x9e0   :  { %3348 = vmatprep.subr.bf16.mxu1 %v5907_v13  ;;  %v1684_v13 = vld [vmem:[#allocation10 + $0x5f0] sm:$0xff] }
 0x9e2   :  { %3267 = vmatpush1.bf16.msra.mxu0 %v5904_v15  ;;  %v5969_v15 = vcombine.high %v1680_v60, %v1684_v13 }
 0x9e3   :  { %3349 = vmatpush1.bf16.msra.mxu1 %v5906_v45  ;;  %3277 = vmatprep.subr.bf16.mxu0 %v5913_v16  ;;  %v5971_v45 = vcombine.high %v1681_v30, %v1685_v6  ;;  %v1688_v16 = vld [vmem:[#allocation10 + $0x610] sm:$0xff]  ;;  %v6018_v6 = vcombine.low %v1729_v2, %v1733_v3 }
 0x9e4   :  { %3359 = vmatprep.subr.bf16.mxu1 %v5915_v17  ;;  %v1692_v17 = vld [vmem:[#allocation10 + $0x630] sm:$0xff] }
 0x9e5   :  { %3269 = vmatmul.mubr.bf16.vlgmr.msra.gmra.mrb[36].mxu0 %v7600_v52  ;;  %v5977_v25 = vcombine.high %v1688_v16, %v1692_v17 }
 0x9e6   :  { %3351 = vmatmul.mubr.bf16.vlgmr.msra.gmra.mrb[32].mxu1 %v7600_v52  ;;  %3278 = vmatpush1.bf16.msra.mxu0 %v5912_v23  ;;  %v5930_v52 = vcombine.low %v1641_v51, %v1645_v32  ;;  %v5968_v23 = vcombine.low %v1680_v60, %v1684_v13  ;;  %v5976_v51 = vcombine.low %v1688_v16, %v1692_v17  ;;  %v1737_v60 = vld [vmem:[#allocation10 + $0x798] sm:$0xff] }
 0x9e7   :  { %3309 = vmatprep.mubr.bf16.mxu0 %v7606_v8  ;;  %3360 = vmatpush1.bf16.msra.mxu1 %v5914_v26  ;;  %v5979_v26 = vcombine.high %v1689_v18, %v1693_v21  ;;  %v5978_v32 = vcombine.low %v1689_v18, %v1693_v21  ;;  %v1741_v13 = vld [vmem:[#allocation10 + $0x7b8] sm:$0xff] }
 0x9e8   :  { %3391 = vmatprep.mubr.bf16.mxu1 %v7606_v8  ;;  %3279 = vmatprep.subr.bf16.mxu0 %v5921_v27  ;;  %v5936_v8 = vcombine.low %v1648_v37, %v1652_v38  ;;  %v1696_v27 = vld [vmem:[#allocation10 + $0x650] sm:$0xff]  ;;  %v1705_v37 = vld [vmem:[#allocation10 + $0x698] sm:$0xff]  ;;  %v6026_v21 = vcombine.low %v1737_v60, %v1741_v13 }
 0x9e9   :  { %3361 = vmatprep.subr.bf16.mxu1 %v5923_v31  ;;  %v1701_v31 = vld [vmem:[#allocation10 + $0x678] sm:$0xff]  ;;  %v5984_v39 = vcombine.low %v1696_v27, %v1700_v28 }
 0x9ea   :  { %3280 = vmatpush1.bf16.msra.mxu0 %v5920_v33  ;;  %v5985_v33 = vcombine.high %v1696_v27, %v1700_v28  ;;  %v1709_v38 = vld [vmem:[#allocation10 + $0x6b8] sm:$0xff]  ;;  %v5986_v40 = vcombine.low %v1697_v29, %v1701_v31  ;;  %v6656_v27 = vld [vmem:[#allocation11 + $0x4] ss:$16 sps:$4 sm:$0xff]  }
 0x9eb   :  { %3362 = vmatpush1.bf16.msra.mxu1 %v5922_v34  ;;  %3281 = vmatprep.subr.bf16.mxu0 %v5929_v35  ;;  %v5987_v34 = vcombine.high %v1697_v29, %v1701_v31  ;;  %v1704_v35 = vld [vmem:[#allocation10 + $0x690] sm:$0xff]  ;;  %v5994_v49 = vcombine.low %v1705_v37, %v1709_v38  ;;  %v1745_v16 = vld [vmem:[#allocation10 + $0x7d8] sm:$0xff] }
 0x9ec   :  { %3363 = vmatprep.subr.bf16.mxu1 %v5931_v36  ;;  %v1708_v36 = vld [vmem:[#allocation10 + $0x6b0] sm:$0xff]  ;;  %v1749_v17 = vld [vmem:[#allocation10 + $0x7f8] sm:$0xff] }
 0x9ed   :  { %v5992_v48 = vcombine.low %v1704_v35, %v1708_v36  ;;  %v6659_v28 = vld [vmem:[#allocation11 + $0xc] ss:$16 sps:$4 sm:$0xff]   ;;  %v6654_v29 = vld [vmem:[#allocation11] ss:$16 sps:$4 sm:$0xff]   ;;  %v6657_v31 = vld [vmem:[#allocation11 + $0x8] ss:$16 sps:$4 sm:$0xff]  }
 0x9ee   :  { %3282 = vmatpush1.bf16.msra.mxu0 %v5928_v41  ;;  %v5993_v41 = vcombine.high %v1704_v35, %v1708_v36  ;;  %v6668_v35 = vld [vmem:[#allocation11 + $0x44] ss:$16 sps:$4 sm:$0xff]   ;;  %v6671_v36 = vld [vmem:[#allocation11 + $0x4c] ss:$16 sps:$4 sm:$0xff]  }
 0x9ef   :  { %3364 = vmatpush1.bf16.msra.mxu1 %v5930_v52  ;;  %3283 = vmatprep.subr.bf16.mxu0 %v5937_v42  ;;  %v5995_v52 = vcombine.high %v1705_v37, %v1709_v38  ;;  %v1712_v42 = vld [vmem:[#allocation10 + $0x6d0] sm:$0xff]  ;;  %v6669_v38 = vld [vmem:[#allocation11 + $0x48] ss:$16 sps:$4 sm:$0xff]  }
 0x9f0   :  { %3365 = vmatprep.subr.bf16.mxu1 %v5939_v43  ;;  %v1716_v43 = vld [vmem:[#allocation10 + $0x6f0] sm:$0xff] }
 0x9f1   :  { %v6000_v4 = vcombine.low %v1712_v42, %v1716_v43  ;;  %v6666_v37 = vld [vmem:[#allocation11 + $0x40] ss:$16 sps:$4 sm:$0xff]  }
 0x9f2   :  { %3284 = vmatpush1.bf16.msra.mxu0 %v5936_v8  ;;  %v6001_v8 = vcombine.high %v1712_v42, %v1716_v43  ;;  %v6683_v42 = vld [vmem:[#allocation11 + $0x8c] ss:$16 sps:$4 sm:$0xff]   ;;  %v6678_v43 = vld [vmem:[#allocation11 + $0x80] ss:$16 sps:$4 sm:$0xff]  }
 0x9f3   :  { %3366 = vmatpush1.bf16.msra.mxu1 %v5938_v50  ;;  %3285 = vmatprep.subr.bf16.mxu0 %v5945_v53  ;;  %v6003_v50 = vcombine.high %v1713_v46, %v1717_v47  ;;  %v1720_v53 = vld [vmem:[#allocation10 + $0x710] sm:$0xff]  ;;  %v6681_v46 = vld [vmem:[#allocation11 + $0x88] ss:$16 sps:$4 sm:$0xff]  }
 0x9f4   :  { %3367 = vmatprep.subr.bf16.mxu1 %v5947_v57  ;;  %v1724_v57 = vld [vmem:[#allocation10 + $0x730] sm:$0xff] }
 0x9f5   :  { %v6008_v11 = vcombine.low %v1720_v53, %v1724_v57  ;;  %v6686_v47 = vld [vmem:[#allocation11 + $0xa4] ss:$16 sps:$4 sm:$0xff]  }
 0x9f6   :  { %3286 = vmatpush1.bf16.msra.mxu0 %v5944_v9  ;;  %v6009_v9 = vcombine.high %v1720_v53, %v1724_v57  ;;  %v6695_v53 = vld [vmem:[#allocation11 + $0xcc] ss:$16 sps:$4 sm:$0xff]   ;;  %v6690_v57 = vld [vmem:[#allocation11 + $0xc0] ss:$16 sps:$4 sm:$0xff]  }
 0x9f7   :  { %3368 = vmatpush1.bf16.msra.mxu1 %v5946_v0  ;;  %3287 = vmatprep.subr.bf16.mxu0 %v5953_v44  ;;  %v6011_v0 = vcombine.high %v1721_v61, %v1725_v63  ;;  %v1728_v44 = vld [vmem:[#allocation10 + $0x750] sm:$0xff]  ;;  %v6693_v61 = vld [vmem:[#allocation11 + $0xc8] ss:$16 sps:$4 sm:$0xff]  }
 0x9f8   :  { %3369 = vmatprep.subr.bf16.mxu1 %v5955_v10  ;;  %v1732_v10 = vld [vmem:[#allocation10 + $0x770] sm:$0xff] }
 0x9f9   :  { %v6016_v30 = vcombine.low %v1728_v44, %v1732_v10  ;;  %v6698_v63 = vld [vmem:[#allocation11 + $0xe4] ss:$16 sps:$4 sm:$0xff]  }
 0x9fa   :  { %3288 = vmatpush1.bf16.msra.mxu0 %v5952_v54  ;;  %v6017_v54 = vcombine.high %v1728_v44, %v1732_v10  ;;  %v6707_v44 = vld [vmem:[#allocation11 + $0x10c] ss:$16 sps:$4 sm:$0xff]   ;;  %v6702_v10 = vld [vmem:[#allocation11 + $0x100] ss:$16 sps:$4 sm:$0xff]  }
 0x9fb   :  { %3370 = vmatpush1.bf16.msra.mxu1 %v5954_v55  ;;  %3289 = vmatprep.subr.bf16.mxu0 %v5961_v56  ;;  %v6019_v55 = vcombine.high %v1729_v2, %v1733_v3  ;;  %v1736_v56 = vld [vmem:[#allocation10 + $0x790] sm:$0xff]  ;;  %v6705_v2 = vld [vmem:[#allocation11 + $0x108] ss:$16 sps:$4 sm:$0xff]  }
 0x9fc   :  { %3371 = vmatprep.subr.bf16.mxu1 %v5963_v59  ;;  %v1740_v59 = vld [vmem:[#allocation10 + $0x7b0] sm:$0xff] }
 0x9fd   :  { %v6024_v18 = vcombine.low %v1736_v56, %v1740_v59  ;;  %v6710_v3 = vld [vmem:[#allocation11 + $0x124] ss:$16 sps:$4 sm:$0xff]  }
 0x9fe   :  { %3290 = vmatpush1.bf16.msra.mxu0 %v5960_v7  ;;  %v6025_v7 = vcombine.high %v1736_v56, %v1740_v59  ;;  %v6719_v56 = vld [vmem:[#allocation11 + $0x14c] ss:$16 sps:$4 sm:$0xff]   ;;  %v6714_v59 = vld [vmem:[#allocation11 + $0x140] ss:$16 sps:$4 sm:$0xff]  }
 0x9ff   :  { %3372 = vmatpush1.bf16.msra.mxu1 %v5962_v14  ;;  %3291 = vmatprep.subr.bf16.mxu0 %v5969_v15  ;;  %v6027_v14 = vcombine.high %v1737_v60, %v1741_v13  ;;  %v1744_v15 = vld [vmem:[#allocation10 + $0x7d0] sm:$0xff]  ;;  %v6717_v60 = vld [vmem:[#allocation11 + $0x148] ss:$16 sps:$4 sm:$0xff]  }
 0xa00   :  { %3373 = vmatprep.subr.bf16.mxu1 %v5971_v45  ;;  %v1748_v45 = vld [vmem:[#allocation10 + $0x7f0] sm:$0xff] }
 0xa01   :  { %v6722_v13 = vld [vmem:[#allocation11 + $0x164] ss:$16 sps:$4 sm:$0xff]  }
 0xa02   :  { %3292 = vmatpush1.bf16.msra.mxu0 %v5968_v23  ;;  %v6033_v23 = vcombine.high %v1744_v15, %v1748_v45 }
 0xa03   :  { %3374 = vmatpush1.bf16.msra.mxu1 %v5970_v24  ;;  %3293 = vmatprep.subr.bf16.mxu0 %v5977_v25  ;;  %v6035_v24 = vcombine.high %v1745_v16, %v1749_v17  ;;  %v6032_v25 = vcombine.low %v1744_v15, %v1748_v45  ;;  %v6731_v15 = vld [vmem:[#allocation11 + $0x18c] ss:$16 sps:$4 sm:$0xff]   ;;  %v6726_v45 = vld [vmem:[#allocation11 + $0x180] ss:$16 sps:$4 sm:$0xff]  }
 0xa04   :  { %3375 = vmatprep.subr.bf16.mxu1 %v5979_v26  ;;  %v6034_v26 = vcombine.low %v1745_v16, %v1749_v17  ;;  %v6729_v16 = vld [vmem:[#allocation11 + $0x188] ss:$16 sps:$4 sm:$0xff]   ;;  %v6734_v17 = vld [vmem:[#allocation11 + $0x1a4] ss:$16 sps:$4 sm:$0xff]  }
 0xa06   :  { %3294 = vmatpush1.bf16.msra.mxu0 %v5976_v51  ;;  %v6662_v51 = vld [vmem:[#allocation11 + $0x24] ss:$16 sps:$4 sm:$0xff]  }
 0xa07   :  { %3376 = vmatpush1.bf16.msra.mxu1 %v5978_v32  ;;  %3295 = vmatprep.subr.bf16.mxu0 %v5985_v33  ;;  %v6665_v32 = vld [vmem:[#allocation11 + $0x2c] ss:$16 sps:$4 sm:$0xff]   ;;  %v6660_v33 = vld [vmem:[#allocation11 + $0x20] ss:$16 sps:$4 sm:$0xff]  }
 0xa08   :  { %3377 = vmatprep.subr.bf16.mxu1 %v5987_v34  ;;  %v6663_v34 = vld [vmem:[#allocation11 + $0x28] ss:$16 sps:$4 sm:$0xff]  }
 0xa0a   :  { %3296 = vmatpush1.bf16.msra.mxu0 %v5984_v39  ;;  %v6674_v39 = vld [vmem:[#allocation11 + $0x64] ss:$16 sps:$4 sm:$0xff]  }
 0xa0b   :  { %3378 = vmatpush1.bf16.msra.mxu1 %v5986_v40  ;;  %3297 = vmatprep.subr.bf16.mxu0 %v5993_v41  ;;  %v6677_v40 = vld [vmem:[#allocation11 + $0x6c] ss:$16 sps:$4 sm:$0xff]   ;;  %v6672_v41 = vld [vmem:[#allocation11 + $0x60] ss:$16 sps:$4 sm:$0xff]  }
 0xa0c   :  { %3379 = vmatprep.subr.bf16.mxu1 %v5995_v52  ;;  %v6680_v52 = vld [vmem:[#allocation11 + $0x84] ss:$16 sps:$4 sm:$0xff]  }
 0xa0e   :  { %3298 = vmatpush1.bf16.msra.mxu0 %v5992_v48  ;;  %v6689_v48 = vld [vmem:[#allocation11 + $0xac] ss:$16 sps:$4 sm:$0xff]  }
 0xa0f   :  { %3380 = vmatpush1.bf16.msra.mxu1 %v5994_v49  ;;  %3299 = vmatprep.subr.bf16.mxu0 %v6001_v8  ;;  %v6684_v49 = vld [vmem:[#allocation11 + $0xa0] ss:$16 sps:$4 sm:$0xff]   ;;  %v6687_v8 = vld [vmem:[#allocation11 + $0xa8] ss:$16 sps:$4 sm:$0xff]  }
 0xa10   :  { %3381 = vmatprep.subr.bf16.mxu1 %v6003_v50  ;;  %v6692_v50 = vld [vmem:[#allocation11 + $0xc4] ss:$16 sps:$4 sm:$0xff]  }
 0xa12   :  { %3300 = vmatpush1.bf16.msra.mxu0 %v6000_v4  ;;  %v6701_v4 = vld [vmem:[#allocation11 + $0xec] ss:$16 sps:$4 sm:$0xff]  }
 0xa13   :  { %3382 = vmatpush1.bf16.msra.mxu1 %v6002_v5  ;;  %3301 = vmatprep.subr.bf16.mxu0 %v6009_v9  ;;  %v6696_v5 = vld [vmem:[#allocation11 + $0xe0] ss:$16 sps:$4 sm:$0xff]   ;;  %v6699_v9 = vld [vmem:[#allocation11 + $0xe8] ss:$16 sps:$4 sm:$0xff]  }
 0xa14   :  { %3383 = vmatprep.subr.bf16.mxu1 %v6011_v0  ;;  %v6704_v0 = vld [vmem:[#allocation11 + $0x104] ss:$16 sps:$4 sm:$0xff]  }
 0xa16   :  { %3302 = vmatpush1.bf16.msra.mxu0 %v6008_v11  ;;  %v6713_v11 = vld [vmem:[#allocation11 + $0x12c] ss:$16 sps:$4 sm:$0xff]  }
 0xa17   :  { %3384 = vmatpush1.bf16.msra.mxu1 %v6010_v12  ;;  %3303 = vmatprep.subr.bf16.mxu0 %v6017_v54  ;;  %v6708_v12 = vld [vmem:[#allocation11 + $0x120] ss:$16 sps:$4 sm:$0xff]   ;;  %v6711_v54 = vld [vmem:[#allocation11 + $0x128] ss:$16 sps:$4 sm:$0xff]  }
 0xa18   :  { %3385 = vmatprep.subr.bf16.mxu1 %v6019_v55  ;;  %v6716_v55 = vld [vmem:[#allocation11 + $0x144] ss:$16 sps:$4 sm:$0xff]  }
 0xa1a   :  { %3304 = vmatpush1.bf16.msra.mxu0 %v6016_v30  ;;  %v6725_v30 = vld [vmem:[#allocation11 + $0x16c] ss:$16 sps:$4 sm:$0xff]  }
 0xa1b   :  { %3386 = vmatpush1.bf16.msra.mxu1 %v6018_v6  ;;  %3305 = vmatprep.subr.bf16.mxu0 %v6025_v7  ;;  %v6720_v6 = vld [vmem:[#allocation11 + $0x160] ss:$16 sps:$4 sm:$0xff]   ;;  %v6723_v7 = vld [vmem:[#allocation11 + $0x168] ss:$16 sps:$4 sm:$0xff]  }
 0xa1c   :  { %3387 = vmatprep.subr.bf16.mxu1 %v6027_v14  ;;  %v6728_v14 = vld [vmem:[#allocation11 + $0x184] ss:$16 sps:$4 sm:$0xff]  }
 0xa1e   :  { %3306 = vmatpush1.bf16.msra.mxu0 %v6024_v18  ;;  %v6737_v18 = vld [vmem:[#allocation11 + $0x1ac] ss:$16 sps:$4 sm:$0xff]  }
 0xa1f   :  { %3388 = vmatpush1.bf16.msra.mxu1 %v6026_v21  ;;  %3307 = vmatprep.subr.bf16.mxu0 %v6033_v23  ;;  %v6732_v21 = vld [vmem:[#allocation11 + $0x1a0] ss:$16 sps:$4 sm:$0xff]   ;;  %v6735_v23 = vld [vmem:[#allocation11 + $0x1a8] ss:$16 sps:$4 sm:$0xff]  }
 0xa20   :  { %3389 = vmatprep.subr.bf16.mxu1 %v6035_v24  ;;  %v6740_v24 = vld [vmem:[#allocation11 + $0x1c4] ss:$16 sps:$4 sm:$0xff]  }
 0xa22   :  { %3308 = vmatpush1.bf16.msra.mxu0 %v6032_v25  ;;  %v6743_v25 = vld [vmem:[#allocation11 + $0x1cc] ss:$16 sps:$4 sm:$0xff]  }
 0xa23   :  { %3390 = vmatpush1.bf16.msra.mxu1 %v6034_v26  ;;  %4974 = vmatprep.subr.bf16.mxu0 %v6656_v27  ;;  %v6738_v26 = vld [vmem:[#allocation11 + $0x1c0] ss:$16 sps:$4 sm:$0xff]   ;;  %v6741_v27 = vld [vmem:[#allocation11 + $0x1c8] ss:$16 sps:$4 sm:$0xff]  }
 0xa24   :  { %5138 = vmatprep.subr.bf16.mxu1 %v6659_v28  ;;  %v6746_v28 = vld [vmem:[#allocation11 + $0x1e4] ss:$16 sps:$4 sm:$0xff]  }
 0xa25   :  { %3310 = vmatmul.mubr.bf16.vlgmr.msra.gmra.mrb[36].mxu0 %v7618_v58 }
 0xa26   :  { %3392 = vmatmul.mubr.bf16.vlgmr.msra.gmra.mrb[32].mxu1 %v7618_v58  ;;  %4975 = vmatpush1.bf16.msra.mxu0 %v6654_v29  ;;  %v6675_v58 = vld [vmem:[#allocation11 + $0x68] ss:$16 sps:$4 sm:$0xff]   ;;  %v6749_v29 = vld [vmem:[#allocation11 + $0x1ec] ss:$16 sps:$4 sm:$0xff]  }
 0xa27   :  { %5139 = vmatpush1.bf16.msra.mxu1 %v6657_v31  ;;  %4976 = vmatprep.subr.bf16.mxu0 %v6662_v51  ;;  %v6744_v31 = vld [vmem:[#allocation11 + $0x1e0] ss:$16 sps:$4 sm:$0xff]   ;;  %v6747_v51 = vld [vmem:[#allocation11 + $0x1e8] ss:$16 sps:$4 sm:$0xff]  }
 0xa28   :  { %5140 = vmatprep.subr.bf16.mxu1 %v6665_v32  ;;  %v6752_v32 = vld [vmem:[#allocation11 + $0x204] ss:$16 sps:$4 sm:$0xff]  }
 0xa2a   :  { %4977 = vmatpush1.bf16.msra.mxu0 %v6660_v33  ;;  %v6755_v33 = vld [vmem:[#allocation11 + $0x20c] ss:$16 sps:$4 sm:$0xff]  }
 0xa2b   :  { %5141 = vmatpush1.bf16.msra.mxu1 %v6663_v34  ;;  %4978 = vmatprep.subr.bf16.mxu0 %v6668_v35  ;;  %v7633_v34 = vld [vmem:[%s7694_s15] sm:$0xff] }
 0xa2c   :  { %5142 = vmatprep.subr.bf16.mxu1 %v6671_v36  ;;  %v1755_v35 = vrot.slane %v7633_v34, %v7552_v20  ;;  %v1759_v36 = vrot.slane %v7633_v34, %v7558_v22 }
 0xa2e   :  { %4979 = vmatpush1.bf16.msra.mxu0 %v6666_v37  ;;  %v1767_v37 = vrot.slane %v7633_v34, %v7590_v1 }
 0xa2f   :  { %5143 = vmatpush1.bf16.msra.mxu1 %v6669_v38  ;;  %4980 = vmatprep.subr.bf16.mxu0 %v6674_v39 }
 0xa30   :  { %5144 = vmatprep.subr.bf16.mxu1 %v6677_v40 }
 0xa32   :  { %4981 = vmatpush1.bf16.msra.mxu0 %v6672_v41 }
 0xa33   :  { %5145 = vmatpush1.bf16.msra.mxu1 %v6675_v58  ;;  %4982 = vmatprep.subr.bf16.mxu0 %v6680_v52 }
 0xa34   :  { %5146 = vmatprep.subr.bf16.mxu1 %v6683_v42 }
 0xa36   :  { %4983 = vmatpush1.bf16.msra.mxu0 %v6678_v43 }
 0xa37   :  { %5147 = vmatpush1.bf16.msra.mxu1 %v6681_v46  ;;  %4984 = vmatprep.subr.bf16.mxu0 %v6686_v47 }
 0xa38   :  { %5148 = vmatprep.subr.bf16.mxu1 %v6689_v48 }
 0xa3a   :  { %4985 = vmatpush1.bf16.msra.mxu0 %v6684_v49 }
 0xa3b   :  { %5149 = vmatpush1.bf16.msra.mxu1 %v6687_v8  ;;  %4986 = vmatprep.subr.bf16.mxu0 %v6692_v50 }
 0xa3c   :  { %5150 = vmatprep.subr.bf16.mxu1 %v6695_v53 }
 0xa3e   :  { %4987 = vmatpush1.bf16.msra.mxu0 %v6690_v57  ;;  %v6750_v57 = vld [vmem:[#allocation11 + $0x200] ss:$16 sps:$4 sm:$0xff]  }
 0xa3f   :  { %5151 = vmatpush1.bf16.msra.mxu1 %v6693_v61  ;;  %4988 = vmatprep.subr.bf16.mxu0 %v6698_v63  ;;  %v6753_v61 = vld [vmem:[#allocation11 + $0x208] ss:$16 sps:$4 sm:$0xff]  }
 0xa40   :  { %5152 = vmatprep.subr.bf16.mxu1 %v6701_v4  ;;  %v6758_v4 = vld [vmem:[#allocation11 + $0x224] ss:$16 sps:$4 sm:$0xff]  }
 0xa42   :  { %4989 = vmatpush1.bf16.msra.mxu0 %v6696_v5  ;;  %v6761_v5 = vld [vmem:[#allocation11 + $0x22c] ss:$16 sps:$4 sm:$0xff]  }
 0xa43   :  { %5153 = vmatpush1.bf16.msra.mxu1 %v6699_v9  ;;  %4990 = vmatprep.subr.bf16.mxu0 %v6704_v0  ;;  %v6756_v0 = vld [vmem:[#allocation11 + $0x220] ss:$16 sps:$4 sm:$0xff]  }
 0xa44   :  { %5154 = vmatprep.subr.bf16.mxu1 %v6707_v44  ;;  %v6759_v44 = vld [vmem:[#allocation11 + $0x228] ss:$16 sps:$4 sm:$0xff]  }
 0xa46   :  { %4991 = vmatpush1.bf16.msra.mxu0 %v6702_v10  ;;  %v6764_v10 = vld [vmem:[#allocation11 + $0x244] ss:$16 sps:$4 sm:$0xff]  }
 0xa47   :  { %5155 = vmatpush1.bf16.msra.mxu1 %v6705_v2  ;;  %4992 = vmatprep.subr.bf16.mxu0 %v6710_v3  ;;  %v6767_v2 = vld [vmem:[#allocation11 + $0x24c] ss:$16 sps:$4 sm:$0xff]   ;;  %v6762_v3 = vld [vmem:[#allocation11 + $0x240] ss:$16 sps:$4 sm:$0xff]  }
 0xa48   :  { %5156 = vmatprep.subr.bf16.mxu1 %v6713_v11  ;;  %v6765_v11 = vld [vmem:[#allocation11 + $0x248] ss:$16 sps:$4 sm:$0xff]  }
 0xa4a   :  { %4993 = vmatpush1.bf16.msra.mxu0 %v6708_v12  ;;  %v6770_v12 = vld [vmem:[#allocation11 + $0x264] ss:$16 sps:$4 sm:$0xff]  }
 0xa4b   :  { %5157 = vmatpush1.bf16.msra.mxu1 %v6711_v54  ;;  %4994 = vmatprep.subr.bf16.mxu0 %v6716_v55  ;;  %v6773_v54 = vld [vmem:[#allocation11 + $0x26c] ss:$16 sps:$4 sm:$0xff]   ;;  %v6768_v55 = vld [vmem:[#allocation11 + $0x260] ss:$16 sps:$4 sm:$0xff]  }
 0xa4c   :  { %5158 = vmatprep.subr.bf16.mxu1 %v6719_v56  ;;  %v6771_v56 = vld [vmem:[#allocation11 + $0x268] ss:$16 sps:$4 sm:$0xff]  }
 0xa4e   :  { %4995 = vmatpush1.bf16.msra.mxu0 %v6714_v59  ;;  %v6776_v59 = vld [vmem:[#allocation11 + $0x284] ss:$16 sps:$4 sm:$0xff]  }
 0xa4f   :  { %5159 = vmatpush1.bf16.msra.mxu1 %v6717_v60  ;;  %4996 = vmatprep.subr.bf16.mxu0 %v6722_v13  ;;  %v6779_v60 = vld [vmem:[#allocation11 + $0x28c] ss:$16 sps:$4 sm:$0xff]   ;;  %v6774_v13 = vld [vmem:[#allocation11 + $0x280] ss:$16 sps:$4 sm:$0xff]  }
 0xa50   :  { %5160 = vmatprep.subr.bf16.mxu1 %v6725_v30  ;;  %v6777_v30 = vld [vmem:[#allocation11 + $0x288] ss:$16 sps:$4 sm:$0xff]  }
 0xa52   :  { %4997 = vmatpush1.bf16.msra.mxu0 %v6720_v6  ;;  %v6782_v6 = vld [vmem:[#allocation11 + $0x2a4] ss:$16 sps:$4 sm:$0xff]  }
 0xa53   :  { %5161 = vmatpush1.bf16.msra.mxu1 %v6723_v7  ;;  %4998 = vmatprep.subr.bf16.mxu0 %v6728_v14  ;;  %v6785_v7 = vld [vmem:[#allocation11 + $0x2ac] ss:$16 sps:$4 sm:$0xff]   ;;  %v6780_v14 = vld [vmem:[#allocation11 + $0x2a0] ss:$16 sps:$4 sm:$0xff]  }
 0xa54   :  { %5162 = vmatprep.subr.bf16.mxu1 %v6731_v15  ;;  %v6783_v15 = vld [vmem:[#allocation11 + $0x2a8] ss:$16 sps:$4 sm:$0xff]  }
 0xa56   :  { %4999 = vmatpush1.bf16.msra.mxu0 %v6726_v45  ;;  %v6788_v45 = vld [vmem:[#allocation11 + $0x2c4] ss:$16 sps:$4 sm:$0xff]  }
 0xa57   :  { %5163 = vmatpush1.bf16.msra.mxu1 %v6729_v16  ;;  %5000 = vmatprep.subr.bf16.mxu0 %v6734_v17  ;;  %v6791_v16 = vld [vmem:[#allocation11 + $0x2cc] ss:$16 sps:$4 sm:$0xff]   ;;  %v6786_v17 = vld [vmem:[#allocation11 + $0x2c0] ss:$16 sps:$4 sm:$0xff]  }
 0xa58   :  { %5164 = vmatprep.subr.bf16.mxu1 %v6737_v18  ;;  %v6789_v18 = vld [vmem:[#allocation11 + $0x2c8] ss:$16 sps:$4 sm:$0xff]  }
 0xa5a   :  { %5001 = vmatpush1.bf16.msra.mxu0 %v6732_v21  ;;  %v6794_v21 = vld [vmem:[#allocation11 + $0x2e4] ss:$16 sps:$4 sm:$0xff]  }
 0xa5b   :  { %5165 = vmatpush1.bf16.msra.mxu1 %v6735_v23  ;;  %5002 = vmatprep.subr.bf16.mxu0 %v6740_v24  ;;  %v6797_v23 = vld [vmem:[#allocation11 + $0x2ec] ss:$16 sps:$4 sm:$0xff]   ;;  %v6792_v24 = vld [vmem:[#allocation11 + $0x2e0] ss:$16 sps:$4 sm:$0xff]  }
 0xa5c   :  { %5166 = vmatprep.subr.bf16.mxu1 %v6743_v25  ;;  %v6795_v25 = vld [vmem:[#allocation11 + $0x2e8] ss:$16 sps:$4 sm:$0xff]  }
 0xa5e   :  { %5003 = vmatpush1.bf16.msra.mxu0 %v6738_v26  ;;  %v6800_v26 = vld [vmem:[#allocation11 + $0x304] ss:$16 sps:$4 sm:$0xff]  }
 0xa5f   :  { %5167 = vmatpush1.bf16.msra.mxu1 %v6741_v27  ;;  %5004 = vmatprep.subr.bf16.mxu0 %v6746_v28  ;;  %v6803_v27 = vld [vmem:[#allocation11 + $0x30c] ss:$16 sps:$4 sm:$0xff]   ;;  %v6798_v28 = vld [vmem:[#allocation11 + $0x300] ss:$16 sps:$4 sm:$0xff]  }
 0xa60   :  { %5168 = vmatprep.subr.bf16.mxu1 %v6749_v29  ;;  %v6801_v29 = vld [vmem:[#allocation11 + $0x308] ss:$16 sps:$4 sm:$0xff]  }
 0xa62   :  { %5005 = vmatpush1.bf16.msra.mxu0 %v6744_v31  ;;  %v6806_v31 = vld [vmem:[#allocation11 + $0x324] ss:$16 sps:$4 sm:$0xff]  }
 0xa63   :  { %5169 = vmatpush1.bf16.msra.mxu1 %v6747_v51  ;;  %5015 = vmatprep.subr.bf16.mxu0 %v6752_v32  ;;  %v6809_v51 = vld [vmem:[#allocation11 + $0x32c] ss:$16 sps:$4 sm:$0xff]   ;;  %v6804_v32 = vld [vmem:[#allocation11 + $0x320] ss:$16 sps:$4 sm:$0xff]  }
 0xa64   :  { %5179 = vmatprep.subr.bf16.mxu1 %v6755_v33  ;;  %v6807_v33 = vld [vmem:[#allocation11 + $0x328] ss:$16 sps:$4 sm:$0xff]  }
 0xa78   :  { %v3147_v38 = vpop.f32.mrb[32].mxu0  ;;  %v7641_v39 = vpop.f32.mrb[28].mxu1 }
 0xa79   :  { %v6456_v40 = vadd.f32 %v3147_v38, %v1755_v35  ;;  %v3149_v41 = vpop.f32.mrb[33].mxu0  ;;  %v3231_v58 = vpop.f32.mrb[29].mxu1  ;;  %v6812_v35 = vld [vmem:[#allocation11 + $0x344] ss:$16 sps:$4 sm:$0xff]   ;;  %v6813_v38 = vld [vmem:[#allocation11 + $0x348] ss:$16 sps:$4 sm:$0xff]  }
 0xa7a   :  { %v6457_v52 = vadd.f32 %v3149_v41, %v1759_v36  ;;  %v6459_v42 = vadd.f32 %v3231_v58, %v1767_v37  ;;  %v3151_v43 = vpop.f32.mrb[34].mxu0  ;;  %v3233_v46 = vpop.f32.mrb[30].mxu1  ;;  %v6815_v36 = vld [vmem:[#allocation11 + $0x34c] ss:$16 sps:$4 sm:$0xff]   ;;  %v6810_v37 = vld [vmem:[#allocation11 + $0x340] ss:$16 sps:$4 sm:$0xff]  }
 0xa7b   :  { %v3400_v47 = vmax.f32 %v6456_v40, 0.0  ;;  %v3152_v48 = vpop.f32.mrb[35].mxu0  ;;  %v3234_v49 = vpop.f32.mrb[31].mxu1  ;;  %v6818_v40 = vld [vmem:[#allocation11 + $0x364] ss:$16 sps:$4 sm:$0xff]  }
 0xa7c   :  { %v3401_v8 = vmax.f32 %v6457_v52, 0.0  ;;  %v3403_v50 = vmax.f32 %v6459_v42, 0.0  ;;  %v6821_v41 = vld [vmem:[#allocation11 + $0x36c] ss:$16 sps:$4 sm:$0xff]   ;;  %v6816_v58 = vld [vmem:[#allocation11 + $0x360] ss:$16 sps:$4 sm:$0xff]  }
 0xa7d   :  { %v3408_v63 = vpack.c.bf16 %v3400_v47, %v3400_v47  ;;  %v6819_v52 = vld [vmem:[#allocation11 + $0x368] ss:$16 sps:$4 sm:$0xff]   ;;  %v6824_v42 = vld [vmem:[#allocation11 + $0x384] ss:$16 sps:$4 sm:$0xff]   ;;  %v6827_v43 = vld [vmem:[#allocation11 + $0x38c] ss:$16 sps:$4 sm:$0xff]  }
 0xa7e   :  { %v3409_v53 = vpack.c.bf16 %v3401_v8, %v3401_v8  ;;  %v3411_v9 = vpack.c.bf16 %v3403_v50, %v3403_v50  ;;  %v6822_v46 = vld [vmem:[#allocation11 + $0x380] ss:$16 sps:$4 sm:$0xff]   ;;  %v6825_v47 = vld [vmem:[#allocation11 + $0x388] ss:$16 sps:$4 sm:$0xff]   ;;  %v6830_v48 = vld [vmem:[#allocation11 + $0x3a4] ss:$16 sps:$4 sm:$0xff]  }
 0xa7f   :  { %v6833_v49 = vld [vmem:[#allocation11 + $0x3ac] ss:$16 sps:$4 sm:$0xff]   ;;  %v6828_v8 = vld [vmem:[#allocation11 + $0x3a0] ss:$16 sps:$4 sm:$0xff]   ;;  %v6831_v50 = vld [vmem:[#allocation11 + $0x3a8] ss:$16 sps:$4 sm:$0xff]  }
 0xa80   :  { %5006 = vmatprep.mubr.bf16.mxu0 %v3409_v53  ;;  %5170 = vmatprep.mubr.bf16.mxu1 %v3409_v53  ;;  %v1763_v53 = vrot.slane %v7633_v34, %v7584_v62 }
 0xa81   :  { %5007 = vmatmul.mubr.bf16.vlgmr.msra.gmra.mrb[40].mxu0 %v3408_v63  ;;  %5171 = vmatmul.mubr.bf16.vlgmr.msra.gmra.mrb[36].mxu1 %v3408_v63  ;;  %v6834_v63 = vld [vmem:[#allocation11 + $0x3c0] ss:$16 sps:$4 sm:$0xff]  }
 0xa82   :  { %5016 = vmatpush1.bf16.msra.mxu0 %v6750_v57  ;;  %5180 = vmatpush1.bf16.msra.mxu1 %v6753_v61  ;;  %v6836_v57 = vld [vmem:[#allocation11 + $0x3c4] ss:$16 sps:$4 sm:$0xff]   ;;  %v6839_v61 = vld [vmem:[#allocation11 + $0x3cc] ss:$16 sps:$4 sm:$0xff]  }
 0xa83   :  { %5047 = vmatprep.mubr.bf16.mxu0 %v3411_v9  ;;  %5211 = vmatprep.mubr.bf16.mxu1 %v3411_v9  ;;  %v6842_v9 = vld [vmem:[#allocation11 + $0x3e4] ss:$16 sps:$4 sm:$0xff]  }
 0xa84   :  { %5017 = vmatprep.subr.bf16.mxu0 %v6758_v4  ;;  %5181 = vmatprep.subr.bf16.mxu1 %v6761_v5  ;;  %v6837_v4 = vld [vmem:[#allocation11 + $0x3c8] ss:$16 sps:$4 sm:$0xff]   ;;  %v6458_v5 = vadd.f32 %v7641_v39, %v1763_v53  ;;  %v6854_v39 = vld [vmem:[#allocation11 + $0x424] ss:$16 sps:$4 sm:$0xff]   ;;  %v6912_v53 = vld [vmem:[#allocation11 + $0x560] ss:$16 sps:$4 sm:$0xff]  }
 0xa86   :  { %5018 = vmatpush1.bf16.msra.mxu0 %v6756_v0  ;;  %5182 = vmatpush1.bf16.msra.mxu1 %v6759_v44  ;;  %v6845_v0 = vld [vmem:[#allocation11 + $0x3ec] ss:$16 sps:$4 sm:$0xff]   ;;  %v6840_v44 = vld [vmem:[#allocation11 + $0x3e0] ss:$16 sps:$4 sm:$0xff]  }
 0xa87   :  { %5019 = vmatprep.subr.bf16.mxu0 %v6764_v10  ;;  %5183 = vmatprep.subr.bf16.mxu1 %v6767_v2  ;;  %v6843_v10 = vld [vmem:[#allocation11 + $0x3e8] ss:$16 sps:$4 sm:$0xff]   ;;  %v3402_v2 = vmax.f32 %v6458_v5, 0.0 }
 0xa88   :  { %v6921_v5 = vld [vmem:[#allocation11 + $0x588] ss:$16 sps:$4 sm:$0xff]  }
 0xa8a   :  { %5020 = vmatpush1.bf16.msra.mxu0 %v6762_v3  ;;  %5184 = vmatpush1.bf16.msra.mxu1 %v6765_v11  ;;  %v6848_v3 = vld [vmem:[#allocation11 + $0x404] ss:$16 sps:$4 sm:$0xff]   ;;  %v6851_v11 = vld [vmem:[#allocation11 + $0x40c] ss:$16 sps:$4 sm:$0xff]  }
 0xa8b   :  { %5021 = vmatprep.subr.bf16.mxu0 %v6770_v12  ;;  %5185 = vmatprep.subr.bf16.mxu1 %v6773_v54  ;;  %v6846_v12 = vld [vmem:[#allocation11 + $0x400] ss:$16 sps:$4 sm:$0xff]   ;;  %v6849_v54 = vld [vmem:[#allocation11 + $0x408] ss:$16 sps:$4 sm:$0xff]  }
 0xa8e   :  { %5022 = vmatpush1.bf16.msra.mxu0 %v6768_v55  ;;  %5186 = vmatpush1.bf16.msra.mxu1 %v6771_v56  ;;  %v3410_v55 = vpack.c.bf16 %v3402_v2, %v3402_v2  ;;  %v6857_v56 = vld [vmem:[#allocation11 + $0x42c] ss:$16 sps:$4 sm:$0xff]   ;;  %v6927_v2 = vld [vmem:[#allocation11 + $0x5a8] ss:$16 sps:$4 sm:$0xff]  }
 0xa8f   :  { %5023 = vmatprep.subr.bf16.mxu0 %v6776_v59  ;;  %5187 = vmatprep.subr.bf16.mxu1 %v6779_v60  ;;  %v6852_v59 = vld [vmem:[#allocation11 + $0x420] ss:$16 sps:$4 sm:$0xff]   ;;  %v6855_v60 = vld [vmem:[#allocation11 + $0x428] ss:$16 sps:$4 sm:$0xff]  }
 0xa92   :  { %5024 = vmatpush1.bf16.msra.mxu0 %v6774_v13  ;;  %5188 = vmatpush1.bf16.msra.mxu1 %v6777_v30  ;;  %v6860_v13 = vld [vmem:[#allocation11 + $0x444] ss:$16 sps:$4 sm:$0xff]   ;;  %v6863_v30 = vld [vmem:[#allocation11 + $0x44c] ss:$16 sps:$4 sm:$0xff]  }
 0xa93   :  { %5025 = vmatprep.subr.bf16.mxu0 %v6782_v6  ;;  %5189 = vmatprep.subr.bf16.mxu1 %v6785_v7  ;;  %v6858_v6 = vld [vmem:[#allocation11 + $0x440] ss:$16 sps:$4 sm:$0xff]   ;;  %v6861_v7 = vld [vmem:[#allocation11 + $0x448] ss:$16 sps:$4 sm:$0xff]  }
 0xa96   :  { %5026 = vmatpush1.bf16.msra.mxu0 %v6780_v14  ;;  %5190 = vmatpush1.bf16.msra.mxu1 %v6783_v15  ;;  %v6866_v14 = vld [vmem:[#allocation11 + $0x464] ss:$16 sps:$4 sm:$0xff]   ;;  %v6869_v15 = vld [vmem:[#allocation11 + $0x46c] ss:$16 sps:$4 sm:$0xff]  }
 0xa97   :  { %5027 = vmatprep.subr.bf16.mxu0 %v6788_v45  ;;  %5191 = vmatprep.subr.bf16.mxu1 %v6791_v16  ;;  %v6864_v45 = vld [vmem:[#allocation11 + $0x460] ss:$16 sps:$4 sm:$0xff]   ;;  %v6867_v16 = vld [vmem:[#allocation11 + $0x468] ss:$16 sps:$4 sm:$0xff]  }
 0xa9a   :  { %5028 = vmatpush1.bf16.msra.mxu0 %v6786_v17  ;;  %5192 = vmatpush1.bf16.msra.mxu1 %v6789_v18  ;;  %v6872_v17 = vld [vmem:[#allocation11 + $0x484] ss:$16 sps:$4 sm:$0xff]   ;;  %v6875_v18 = vld [vmem:[#allocation11 + $0x48c] ss:$16 sps:$4 sm:$0xff]  }
 0xa9b   :  { %5029 = vmatprep.subr.bf16.mxu0 %v6794_v21  ;;  %5193 = vmatprep.subr.bf16.mxu1 %v6797_v23  ;;  %v6870_v21 = vld [vmem:[#allocation11 + $0x480] ss:$16 sps:$4 sm:$0xff]   ;;  %v6873_v23 = vld [vmem:[#allocation11 + $0x488] ss:$16 sps:$4 sm:$0xff]  }
 0xa9e   :  { %5030 = vmatpush1.bf16.msra.mxu0 %v6792_v24  ;;  %5194 = vmatpush1.bf16.msra.mxu1 %v6795_v25  ;;  %v6878_v24 = vld [vmem:[#allocation11 + $0x4a4] ss:$16 sps:$4 sm:$0xff]   ;;  %v6881_v25 = vld [vmem:[#allocation11 + $0x4ac] ss:$16 sps:$4 sm:$0xff]  }
 0xa9f   :  { %5031 = vmatprep.subr.bf16.mxu0 %v6800_v26  ;;  %5195 = vmatprep.subr.bf16.mxu1 %v6803_v27  ;;  %v6876_v26 = vld [vmem:[#allocation11 + $0x4a0] ss:$16 sps:$4 sm:$0xff]   ;;  %v6879_v27 = vld [vmem:[#allocation11 + $0x4a8] ss:$16 sps:$4 sm:$0xff]  }
 0xaa2   :  { %5032 = vmatpush1.bf16.msra.mxu0 %v6798_v28  ;;  %5196 = vmatpush1.bf16.msra.mxu1 %v6801_v29  ;;  %v6884_v28 = vld [vmem:[#allocation11 + $0x4c4] ss:$16 sps:$4 sm:$0xff]   ;;  %v6887_v29 = vld [vmem:[#allocation11 + $0x4cc] ss:$16 sps:$4 sm:$0xff]  }
 0xaa3   :  { %5033 = vmatprep.subr.bf16.mxu0 %v6806_v31  ;;  %5197 = vmatprep.subr.bf16.mxu1 %v6809_v51  ;;  %v6882_v31 = vld [vmem:[#allocation11 + $0x4c0] ss:$16 sps:$4 sm:$0xff]   ;;  %v6885_v51 = vld [vmem:[#allocation11 + $0x4c8] ss:$16 sps:$4 sm:$0xff]  }
 0xaa6   :  { %5034 = vmatpush1.bf16.msra.mxu0 %v6804_v32  ;;  %5198 = vmatpush1.bf16.msra.mxu1 %v6807_v33  ;;  %v6890_v32 = vld [vmem:[#allocation11 + $0x4e4] ss:$16 sps:$4 sm:$0xff]   ;;  %v6893_v33 = vld [vmem:[#allocation11 + $0x4ec] ss:$16 sps:$4 sm:$0xff]  }
 0xaa7   :  { %5035 = vmatprep.subr.bf16.mxu0 %v6812_v35  ;;  %5199 = vmatprep.subr.bf16.mxu1 %v6815_v36  ;;  %v6888_v35 = vld [vmem:[#allocation11 + $0x4e0] ss:$16 sps:$4 sm:$0xff]   ;;  %v6891_v36 = vld [vmem:[#allocation11 + $0x4e8] ss:$16 sps:$4 sm:$0xff]  }
 0xaaa   :  { %5036 = vmatpush1.bf16.msra.mxu0 %v6810_v37  ;;  %5200 = vmatpush1.bf16.msra.mxu1 %v6813_v38  ;;  %v6896_v37 = vld [vmem:[#allocation11 + $0x504] ss:$16 sps:$4 sm:$0xff]   ;;  %v6899_v38 = vld [vmem:[#allocation11 + $0x50c] ss:$16 sps:$4 sm:$0xff]  }
 0xaab   :  { %5037 = vmatprep.subr.bf16.mxu0 %v6818_v40  ;;  %5201 = vmatprep.subr.bf16.mxu1 %v6821_v41  ;;  %v6894_v40 = vld [vmem:[#allocation11 + $0x500] ss:$16 sps:$4 sm:$0xff]   ;;  %v6897_v41 = vld [vmem:[#allocation11 + $0x508] ss:$16 sps:$4 sm:$0xff]  }
 0xaae   :  { %5038 = vmatpush1.bf16.msra.mxu0 %v6816_v58  ;;  %5202 = vmatpush1.bf16.msra.mxu1 %v6819_v52  ;;  %v6902_v58 = vld [vmem:[#allocation11 + $0x524] ss:$16 sps:$4 sm:$0xff]   ;;  %v6905_v52 = vld [vmem:[#allocation11 + $0x52c] ss:$16 sps:$4 sm:$0xff]  }
 0xaaf   :  { %5039 = vmatprep.subr.bf16.mxu0 %v6824_v42  ;;  %5203 = vmatprep.subr.bf16.mxu1 %v6827_v43  ;;  %v6900_v42 = vld [vmem:[#allocation11 + $0x520] ss:$16 sps:$4 sm:$0xff]   ;;  %v6903_v43 = vld [vmem:[#allocation11 + $0x528] ss:$16 sps:$4 sm:$0xff]  }
 0xab2   :  { %5040 = vmatpush1.bf16.msra.mxu0 %v6822_v46  ;;  %5204 = vmatpush1.bf16.msra.mxu1 %v6825_v47  ;;  %v6908_v46 = vld [vmem:[#allocation11 + $0x544] ss:$16 sps:$4 sm:$0xff]   ;;  %v6911_v47 = vld [vmem:[#allocation11 + $0x54c] ss:$16 sps:$4 sm:$0xff]  }
 0xab3   :  { %5041 = vmatprep.subr.bf16.mxu0 %v6830_v48  ;;  %5205 = vmatprep.subr.bf16.mxu1 %v6833_v49  ;;  %v6906_v48 = vld [vmem:[#allocation11 + $0x540] ss:$16 sps:$4 sm:$0xff]   ;;  %v6909_v49 = vld [vmem:[#allocation11 + $0x548] ss:$16 sps:$4 sm:$0xff]  }
 0xab6   :  { %5042 = vmatpush1.bf16.msra.mxu0 %v6828_v8  ;;  %5206 = vmatpush1.bf16.msra.mxu1 %v6831_v50  ;;  %v6914_v8 = vld [vmem:[#allocation11 + $0x564] ss:$16 sps:$4 sm:$0xff]   ;;  %v6917_v50 = vld [vmem:[#allocation11 + $0x56c] ss:$16 sps:$4 sm:$0xff]  }
 0xab7   :  { %5043 = vmatprep.subr.bf16.mxu0 %v6836_v57  ;;  %5207 = vmatprep.subr.bf16.mxu1 %v6839_v61  ;;  %v6915_v57 = vld [vmem:[#allocation11 + $0x568] ss:$16 sps:$4 sm:$0xff]   ;;  %v6920_v61 = vld [vmem:[#allocation11 + $0x584] ss:$16 sps:$4 sm:$0xff]  }
 0xaba   :  { %5044 = vmatpush1.bf16.msra.mxu0 %v6834_v63  ;;  %5208 = vmatpush1.bf16.msra.mxu1 %v6837_v4  ;;  %v6923_v63 = vld [vmem:[#allocation11 + $0x58c] ss:$16 sps:$4 sm:$0xff]   ;;  %v6918_v4 = vld [vmem:[#allocation11 + $0x580] ss:$16 sps:$4 sm:$0xff]  }
 0xabb   :  { %5045 = vmatprep.subr.bf16.mxu0 %v6842_v9  ;;  %5209 = vmatprep.subr.bf16.mxu1 %v6845_v0  ;;  %v6926_v9 = vld [vmem:[#allocation11 + $0x5a4] ss:$16 sps:$4 sm:$0xff]   ;;  %v6929_v0 = vld [vmem:[#allocation11 + $0x5ac] ss:$16 sps:$4 sm:$0xff]  }
 0xabe   :  { %5046 = vmatpush1.bf16.msra.mxu0 %v6840_v44  ;;  %5210 = vmatpush1.bf16.msra.mxu1 %v6843_v10  ;;  %v1770_v44 = vsub.s32 4, %v7549_v19  ;;  %v6924_v10 = vld [vmem:[#allocation11 + $0x5a0] ss:$16 sps:$4 sm:$0xff]  }
 0xabf   :  { %5056 = vmatprep.subr.bf16.mxu0 %v6848_v3  ;;  %5220 = vmatprep.subr.bf16.mxu1 %v6851_v11  ;;  %v1774_v3 = vsub.s32 5, %v7549_v19  ;;  %v6932_v11 = vld [vmem:[#allocation11 + $0x5c4] ss:$16 sps:$4 sm:$0xff]  }
 0xac1   :  { %5048 = vmatmul.mubr.bf16.vlgmr.msra.gmra.mrb[40].mxu0 %v3410_v55  ;;  %5212 = vmatmul.mubr.bf16.vlgmr.msra.gmra.mrb[36].mxu1 %v3410_v55  ;;  %v1771_v55 = vrot.slane %v7633_v34, %v1770_v44  ;;  %v6983_v44 = vld [vmem:[#allocation11 + $0x6cc] ss:$16 sps:$4 sm:$0xff]  }
 0xac2   :  { %5057 = vmatpush1.bf16.msra.mxu0 %v6846_v12  ;;  %5221 = vmatpush1.bf16.msra.mxu1 %v6849_v54  ;;  %v6935_v12 = vld [vmem:[#allocation11 + $0x5cc] ss:$16 sps:$4 sm:$0xff]   ;;  %v1782_v54 = vsub.s32 7, %v7549_v19 }
 0xac3   :  { %5058 = vmatprep.subr.bf16.mxu0 %v6854_v39  ;;  %5222 = vmatprep.subr.bf16.mxu1 %v6857_v56  ;;  %v6930_v39 = vld [vmem:[#allocation11 + $0x5c0] ss:$16 sps:$4 sm:$0xff]   ;;  %v6933_v56 = vld [vmem:[#allocation11 + $0x5c8] ss:$16 sps:$4 sm:$0xff]  }
 0xac6   :  { %5059 = vmatpush1.bf16.msra.mxu0 %v6852_v59  ;;  %5223 = vmatpush1.bf16.msra.mxu1 %v6855_v60  ;;  %v1775_v59 = vrot.slane %v7633_v34, %v1774_v3  ;;  %v1783_v60 = vrot.slane %v7633_v34, %v1782_v54  ;;  %v6986_v3 = vld [vmem:[#allocation11 + $0x6e4] ss:$16 sps:$4 sm:$0xff]   ;;  %v6987_v54 = vld [vmem:[#allocation11 + $0x6e8] ss:$16 sps:$4 sm:$0xff]  }
 0xac7   :  { %5060 = vmatprep.subr.bf16.mxu0 %v6860_v13  ;;  %5224 = vmatprep.subr.bf16.mxu1 %v6863_v30  ;;  %v6938_v13 = vld [vmem:[#allocation11 + $0x5e4] ss:$16 sps:$4 sm:$0xff]   ;;  %v6941_v30 = vld [vmem:[#allocation11 + $0x5ec] ss:$16 sps:$4 sm:$0xff]  }
 0xaca   :  { %5061 = vmatpush1.bf16.msra.mxu0 %v6858_v6  ;;  %5225 = vmatpush1.bf16.msra.mxu1 %v6861_v7 }
 0xacb   :  { %5062 = vmatprep.subr.bf16.mxu0 %v6866_v14  ;;  %5226 = vmatprep.subr.bf16.mxu1 %v6869_v15 }
 0xace   :  { %5063 = vmatpush1.bf16.msra.mxu0 %v6864_v45  ;;  %5227 = vmatpush1.bf16.msra.mxu1 %v6867_v16  ;;  %v6936_v45 = vld [vmem:[#allocation11 + $0x5e0] ss:$16 sps:$4 sm:$0xff]  }
 0xacf   :  { %5064 = vmatprep.subr.bf16.mxu0 %v6872_v17  ;;  %5228 = vmatprep.subr.bf16.mxu1 %v6875_v18 }
 0xad2   :  { %5065 = vmatpush1.bf16.msra.mxu0 %v6870_v21  ;;  %5229 = vmatpush1.bf16.msra.mxu1 %v6873_v23  ;;  %v6939_v21 = vld [vmem:[#allocation11 + $0x5e8] ss:$16 sps:$4 sm:$0xff]   ;;  %v6944_v23 = vld [vmem:[#allocation11 + $0x604] ss:$16 sps:$4 sm:$0xff]  }
 0xad3   :  { %5066 = vmatprep.subr.bf16.mxu0 %v6878_v24  ;;  %5230 = vmatprep.subr.bf16.mxu1 %v6881_v25 }
 0xad6   :  { %5067 = vmatpush1.bf16.msra.mxu0 %v6876_v26  ;;  %5231 = vmatpush1.bf16.msra.mxu1 %v6879_v27 }
 0xad7   :  { %5068 = vmatprep.subr.bf16.mxu0 %v6884_v28  ;;  %5232 = vmatprep.subr.bf16.mxu1 %v6887_v29  ;;  %v6947_v28 = vld [vmem:[#allocation11 + $0x60c] ss:$16 sps:$4 sm:$0xff]  }
 0xada   :  { %5069 = vmatpush1.bf16.msra.mxu0 %v6882_v31  ;;  %5233 = vmatpush1.bf16.msra.mxu1 %v6885_v51 }
 0xadb   :  { %5070 = vmatprep.subr.bf16.mxu0 %v6890_v32  ;;  %5234 = vmatprep.subr.bf16.mxu1 %v6893_v33  ;;  %v6942_v33 = vld [vmem:[#allocation11 + $0x600] ss:$16 sps:$4 sm:$0xff]  }
 0xade   :  { %5071 = vmatpush1.bf16.msra.mxu0 %v6888_v35  ;;  %5235 = vmatpush1.bf16.msra.mxu1 %v6891_v36  ;;  %v6945_v35 = vld [vmem:[#allocation11 + $0x608] ss:$16 sps:$4 sm:$0xff]  }
 0xadf   :  { %5072 = vmatprep.subr.bf16.mxu0 %v6896_v37  ;;  %5236 = vmatprep.subr.bf16.mxu1 %v6899_v38  ;;  %v6950_v37 = vld [vmem:[#allocation11 + $0x624] ss:$16 sps:$4 sm:$0xff]   ;;  %v6953_v38 = vld [vmem:[#allocation11 + $0x62c] ss:$16 sps:$4 sm:$0xff]  }
 0xae2   :  { %5073 = vmatpush1.bf16.msra.mxu0 %v6894_v40  ;;  %5237 = vmatpush1.bf16.msra.mxu1 %v6897_v41  ;;  %v6948_v41 = vld [vmem:[#allocation11 + $0x620] ss:$16 sps:$4 sm:$0xff]  }
 0xae3   :  { %5074 = vmatprep.subr.bf16.mxu0 %v6902_v58  ;;  %5238 = vmatprep.subr.bf16.mxu1 %v6905_v52  ;;  %v6951_v58 = vld [vmem:[#allocation11 + $0x628] ss:$16 sps:$4 sm:$0xff]   ;;  %v6956_v52 = vld [vmem:[#allocation11 + $0x644] ss:$16 sps:$4 sm:$0xff]  }
 0xae6   :  { %5075 = vmatpush1.bf16.msra.mxu0 %v6900_v42  ;;  %5239 = vmatpush1.bf16.msra.mxu1 %v6903_v43  ;;  %v6959_v42 = vld [vmem:[#allocation11 + $0x64c] ss:$16 sps:$4 sm:$0xff]   ;;  %v6954_v43 = vld [vmem:[#allocation11 + $0x640] ss:$16 sps:$4 sm:$0xff]  }
 0xae7   :  { %5076 = vmatprep.subr.bf16.mxu0 %v6908_v46  ;;  %5240 = vmatprep.subr.bf16.mxu1 %v6911_v47  ;;  %v6957_v46 = vld [vmem:[#allocation11 + $0x648] ss:$16 sps:$4 sm:$0xff]   ;;  %v6962_v47 = vld [vmem:[#allocation11 + $0x664] ss:$16 sps:$4 sm:$0xff]  }
 0xaea   :  { %5077 = vmatpush1.bf16.msra.mxu0 %v6906_v48  ;;  %5241 = vmatpush1.bf16.msra.mxu1 %v6909_v49  ;;  %v6965_v48 = vld [vmem:[#allocation11 + $0x66c] ss:$16 sps:$4 sm:$0xff]   ;;  %v6960_v49 = vld [vmem:[#allocation11 + $0x660] ss:$16 sps:$4 sm:$0xff]  }
 0xaeb   :  { %5078 = vmatprep.subr.bf16.mxu0 %v6914_v8  ;;  %5242 = vmatprep.subr.bf16.mxu1 %v6917_v50  ;;  %v6963_v8 = vld [vmem:[#allocation11 + $0x668] ss:$16 sps:$4 sm:$0xff]   ;;  %v6968_v50 = vld [vmem:[#allocation11 + $0x684] ss:$16 sps:$4 sm:$0xff]  }
 0xaee   :  { %5079 = vmatpush1.bf16.msra.mxu0 %v6912_v53  ;;  %5243 = vmatpush1.bf16.msra.mxu1 %v6915_v57  ;;  %v6971_v53 = vld [vmem:[#allocation11 + $0x68c] ss:$16 sps:$4 sm:$0xff]   ;;  %v6966_v57 = vld [vmem:[#allocation11 + $0x680] ss:$16 sps:$4 sm:$0xff]  }
 0xaef   :  { %5080 = vmatprep.subr.bf16.mxu0 %v6920_v61  ;;  %5244 = vmatprep.subr.bf16.mxu1 %v6923_v63  ;;  %v6969_v61 = vld [vmem:[#allocation11 + $0x688] ss:$16 sps:$4 sm:$0xff]   ;;  %v6974_v63 = vld [vmem:[#allocation11 + $0x6a4] ss:$16 sps:$4 sm:$0xff]  }
 0xaf2   :  { %5081 = vmatpush1.bf16.msra.mxu0 %v6918_v4  ;;  %5245 = vmatpush1.bf16.msra.mxu1 %v6921_v5  ;;  %v6977_v4 = vld [vmem:[#allocation11 + $0x6ac] ss:$16 sps:$4 sm:$0xff]   ;;  %v6972_v5 = vld [vmem:[#allocation11 + $0x6a0] ss:$16 sps:$4 sm:$0xff]  }
 0xaf3   :  { %5082 = vmatprep.subr.bf16.mxu0 %v6926_v9  ;;  %5246 = vmatprep.subr.bf16.mxu1 %v6929_v0  ;;  %v6975_v9 = vld [vmem:[#allocation11 + $0x6a8] ss:$16 sps:$4 sm:$0xff]   ;;  %v6980_v0 = vld [vmem:[#allocation11 + $0x6c4] ss:$16 sps:$4 sm:$0xff]  }
 0xaf6   :  { %5083 = vmatpush1.bf16.msra.mxu0 %v6924_v10  ;;  %5247 = vmatpush1.bf16.msra.mxu1 %v6927_v2  ;;  %v6978_v10 = vld [vmem:[#allocation11 + $0x6c0] ss:$16 sps:$4 sm:$0xff]   ;;  %v6981_v2 = vld [vmem:[#allocation11 + $0x6c8] ss:$16 sps:$4 sm:$0xff]  }
 0xaf7   :  { %5084 = vmatprep.subr.bf16.mxu0 %v6932_v11  ;;  %5248 = vmatprep.subr.bf16.mxu1 %v6935_v12  ;;  %v6989_v11 = vld [vmem:[#allocation11 + $0x6ec] ss:$16 sps:$4 sm:$0xff]   ;;  %v6984_v12 = vld [vmem:[#allocation11 + $0x6e0] ss:$16 sps:$4 sm:$0xff]  }
 0xaf8   :  { %v3311_v6 = vpop.f32.mrb[36].mxu0 }
 0xaf9   :  { %v6460_v7 = vadd.f32 %v3311_v6, %v1771_v55  ;;  %v7652_v14 = vpop.f32.mrb[32].mxu1  ;;  %v3313_v15 = vpop.f32.mrb[37].mxu0  ;;  %v6992_v55 = vld [vmem:[#allocation11 + $0x704] ss:$16 sps:$4 sm:$0xff]   ;;  %v6999_v6 = vld [vmem:[#allocation11 + $0x728] ss:$16 sps:$4 sm:$0xff]  }
 0xafa   :  { %v6461_v16 = vadd.f32 %v3313_v15, %v1775_v59  ;;  %v3395_v17 = vpop.f32.mrb[33].mxu1  ;;  %5085 = vmatpush1.bf16.msra.mxu0 %v6930_v39  ;;  %5249 = vmatpush1.bf16.msra.mxu1 %v6933_v56  ;;  %v3315_v18 = vpop.f32.mrb[38].mxu0  ;;  %v6995_v39 = vld [vmem:[#allocation11 + $0x70c] ss:$16 sps:$4 sm:$0xff]   ;;  %v6990_v56 = vld [vmem:[#allocation11 + $0x700] ss:$16 sps:$4 sm:$0xff]  }
 0xafb   :  { %v3404_v24 = vmax.f32 %v6460_v7, 0.0  ;;  %v6463_v25 = vadd.f32 %v3395_v17, %v1783_v60  ;;  %v3397_v26 = vpop.f32.mrb[34].mxu1  ;;  %v3316_v27 = vpop.f32.mrb[39].mxu0  ;;  %5086 = vmatprep.subr.bf16.mxu0 %v6938_v13  ;;  %5250 = vmatprep.subr.bf16.mxu1 %v6941_v30  ;;  %v6993_v59 = vld [vmem:[#allocation11 + $0x708] ss:$16 sps:$4 sm:$0xff]  }
 0xafc   :  { %v3405_v29 = vmax.f32 %v6461_v16, 0.0  ;;  %v3398_v31 = vpop.f32.mrb[35].mxu1  ;;  %v6998_v60 = vld [vmem:[#allocation11 + $0x724] ss:$16 sps:$4 sm:$0xff]   ;;  %v7001_v13 = vld [vmem:[#allocation11 + $0x72c] ss:$16 sps:$4 sm:$0xff]  }
 0xafd   :  { %v3407_v51 = vmax.f32 %v6463_v25, 0.0  ;;  %v3412_v36 = vpack.c.bf16 %v3404_v24, %v3404_v24  ;;  %v6996_v30 = vld [vmem:[#allocation11 + $0x720] ss:$16 sps:$4 sm:$0xff]   ;;  %v7004_v7 = vld [vmem:[#allocation11 + $0x744] ss:$16 sps:$4 sm:$0xff]  }
 0xafe   :  { %v3413_v32 = vpack.c.bf16 %v3405_v29, %v3405_v29  ;;  %5087 = vmatpush1.bf16.msra.mxu0 %v6936_v45  ;;  %5251 = vmatpush1.bf16.msra.mxu1 %v6939_v21  ;;  %v7007_v15 = vld [vmem:[#allocation11 + $0x74c] ss:$16 sps:$4 sm:$0xff]   ;;  %v7002_v45 = vld [vmem:[#allocation11 + $0x740] ss:$16 sps:$4 sm:$0xff]   ;;  %v7005_v16 = vld [vmem:[#allocation11 + $0x748] ss:$16 sps:$4 sm:$0xff]  }
 0xaff   :  { %5097 = vmatprep.subr.bf16.mxu0 %v6944_v23  ;;  %5261 = vmatprep.subr.bf16.mxu1 %v6947_v28  ;;  %v3415_v40 = vpack.c.bf16 %v3407_v51, %v3407_v51  ;;  %v7010_v17 = vld [vmem:[#allocation11 + $0x764] ss:$16 sps:$4 sm:$0xff]   ;;  %v7013_v18 = vld [vmem:[#allocation11 + $0x76c] ss:$16 sps:$4 sm:$0xff]   ;;  %v7008_v21 = vld [vmem:[#allocation11 + $0x760] ss:$16 sps:$4 sm:$0xff]  }
 0xb00   :  { %5088 = vmatprep.mubr.bf16.mxu0 %v3413_v32  ;;  %5252 = vmatprep.mubr.bf16.mxu1 %v3413_v32  ;;  %v7011_v23 = vld [vmem:[#allocation11 + $0x768] ss:$16 sps:$4 sm:$0xff]   ;;  %v7016_v24 = vld [vmem:[#allocation11 + $0x784] ss:$16 sps:$4 sm:$0xff]   ;;  %v7019_v25 = vld [vmem:[#allocation11 + $0x78c] ss:$16 sps:$4 sm:$0xff]  }
 0xb01   :  { %5089 = vmatmul.mubr.bf16.vlgmr.msra.gmra.mrb[40].mxu0 %v3412_v36  ;;  %5253 = vmatmul.mubr.bf16.vlgmr.msra.gmra.mrb[36].mxu1 %v3412_v36  ;;  %v7014_v26 = vld [vmem:[#allocation11 + $0x780] ss:$16 sps:$4 sm:$0xff]   ;;  %v7017_v27 = vld [vmem:[#allocation11 + $0x788] ss:$16 sps:$4 sm:$0xff]   ;;  %v1778_v28 = vsub.s32 6, %v7549_v19 }
 0xb02   :  { %5098 = vmatpush1.bf16.msra.mxu0 %v6942_v33  ;;  %5262 = vmatpush1.bf16.msra.mxu1 %v6945_v35  ;;  %v7022_v29 = vld [vmem:[#allocation11 + $0x7a4] ss:$16 sps:$4 sm:$0xff]   ;;  %v7025_v31 = vld [vmem:[#allocation11 + $0x7ac] ss:$16 sps:$4 sm:$0xff]   ;;  %v7020_v51 = vld [vmem:[#allocation11 + $0x7a0] ss:$16 sps:$4 sm:$0xff]  }
 0xb03   :  { %5129 = vmatprep.mubr.bf16.mxu0 %v3415_v40  ;;  %5293 = vmatprep.mubr.bf16.mxu1 %v3415_v40  ;;  %v7023_v32 = vld [vmem:[#allocation11 + $0x7a8] ss:$16 sps:$4 sm:$0xff]   ;;  %v1779_v33 = vrot.slane %v7633_v34, %v1778_v28  ;;  %v7028_v35 = vld [vmem:[#allocation11 + $0x7c4] ss:$16 sps:$4 sm:$0xff]   ;;  %v7031_v36 = vld [vmem:[#allocation11 + $0x7cc] ss:$16 sps:$4 sm:$0xff]  }
 0xb04   :  { %5099 = vmatprep.subr.bf16.mxu0 %v6950_v37  ;;  %5263 = vmatprep.subr.bf16.mxu1 %v6953_v38  ;;  %v7026_v37 = vld [vmem:[#allocation11 + $0x7c0] ss:$16 sps:$4 sm:$0xff]   ;;  %v7029_v38 = vld [vmem:[#allocation11 + $0x7c8] ss:$16 sps:$4 sm:$0xff]   ;;  %v7034_v40 = vld [vmem:[#allocation11 + $0x7e4] ss:$16 sps:$4 sm:$0xff]  }
 0xb05   :  { %v6462_v19 = vadd.f32 %v7652_v14, %v1779_v33  ;;  %v7038_v34 = vld [vmem:[#allocation13 + $0x40] sm:$0xff]   ;;  %v7042_v14 = vld [vmem:[#allocation13 + $0x48] sm:$0xff]  }
 0xb06   :  { %5100 = vmatpush1.bf16.msra.mxu0 %v6948_v41  ;;  %5264 = vmatpush1.bf16.msra.mxu1 %v6951_v58  ;;  %v7037_v41 = vld [vmem:[#allocation11 + $0x7ec] ss:$16 sps:$4 sm:$0xff]   ;;  %v7032_v58 = vld [vmem:[#allocation11 + $0x7e0] ss:$16 sps:$4 sm:$0xff]  }
 0xb07   :  { %5101 = vmatprep.subr.bf16.mxu0 %v6956_v52  ;;  %5265 = vmatprep.subr.bf16.mxu1 %v6959_v42  ;;  %v7035_v52 = vld [vmem:[#allocation11 + $0x7e8] ss:$16 sps:$4 sm:$0xff]   ;;  %v3406_v42 = vmax.f32 %v6462_v19, 0.0 }
 0xb0a   :  { %5102 = vmatpush1.bf16.msra.mxu0 %v6954_v43  ;;  %5266 = vmatpush1.bf16.msra.mxu1 %v6957_v46  ;;  %v7039_v43 = vld [vmem:[#allocation13 + $0xc0] sm:$0xff]  }
 0xb0b   :  { %5103 = vmatprep.subr.bf16.mxu0 %v6962_v47  ;;  %5267 = vmatprep.subr.bf16.mxu1 %v6965_v48  ;;  %v7040_v46 = vld [vmem:[#allocation13] sm:$0xff]   ;;  %v3414_v48 = vpack.c.bf16 %v3406_v42, %v3406_v42 }
 0xb0c   :  { %v7041_v47 = vld [vmem:[#allocation13 + $0x80] sm:$0xff]  }
 0xb0e   :  { %5104 = vmatpush1.bf16.msra.mxu0 %v6960_v49  ;;  %5268 = vmatpush1.bf16.msra.mxu1 %v6963_v8  ;;  %v7043_v49 = vld [vmem:[#allocation13 + $0xc8] sm:$0xff]  }
 0xb0f   :  { %5105 = vmatprep.subr.bf16.mxu0 %v6968_v50  ;;  %5269 = vmatprep.subr.bf16.mxu1 %v6971_v53  ;;  %v7044_v8 = vld [vmem:[#allocation13 + $0x8] sm:$0xff]   ;;  %v7046_v53 = vld [vmem:[#allocation13 + $0x50] sm:$0xff]  }
 0xb10   :  { %v7045_v50 = vld [vmem:[#allocation13 + $0x88] sm:$0xff]  }
 0xb12   :  { %5106 = vmatpush1.bf16.msra.mxu0 %v6966_v57  ;;  %5270 = vmatpush1.bf16.msra.mxu1 %v6969_v61  ;;  %v7047_v57 = vld [vmem:[#allocation13 + $0xd0] sm:$0xff]  }
 0xb13   :  { %5107 = vmatprep.subr.bf16.mxu0 %v6974_v63  ;;  %5271 = vmatprep.subr.bf16.mxu1 %v6977_v4  ;;  %v7048_v61 = vld [vmem:[#allocation13 + $0x10] sm:$0xff]   ;;  %v7050_v4 = vld [vmem:[#allocation13 + $0x58] sm:$0xff]  }
 0xb14   :  { %v7049_v63 = vld [vmem:[#allocation13 + $0x90] sm:$0xff]  }
 0xb16   :  { %5108 = vmatpush1.bf16.msra.mxu0 %v6972_v5  ;;  %5272 = vmatpush1.bf16.msra.mxu1 %v6975_v9  ;;  %v7051_v5 = vld [vmem:[#allocation13 + $0xd8] sm:$0xff]  }
 0xb17   :  { %5109 = vmatprep.subr.bf16.mxu0 %v6980_v0  ;;  %5273 = vmatprep.subr.bf16.mxu1 %v6983_v44  ;;  %v7052_v9 = vld [vmem:[#allocation13 + $0x18] sm:$0xff]   ;;  %v7054_v44 = vld [vmem:[#allocation13 + $0x60] sm:$0xff]  }
 0xb18   :  { %v7053_v0 = vld [vmem:[#allocation13 + $0x98] sm:$0xff]  }
 0xb1a   :  { %5110 = vmatpush1.bf16.msra.mxu0 %v6978_v10  ;;  %5274 = vmatpush1.bf16.msra.mxu1 %v6981_v2  ;;  %v7055_v10 = vld [vmem:[#allocation13 + $0xe0] sm:$0xff]  }
 0xb1b   :  { %5111 = vmatprep.subr.bf16.mxu0 %v6986_v3  ;;  %5275 = vmatprep.subr.bf16.mxu1 %v6989_v11  ;;  %v7056_v2 = vld [vmem:[#allocation13 + $0x20] sm:$0xff]   ;;  %v7058_v11 = vld [vmem:[#allocation13 + $0x68] sm:$0xff]  }
 0xb1c   :  { %v7057_v3 = vld [vmem:[#allocation13 + $0xa0] sm:$0xff]  }
 0xb1e   :  { %5112 = vmatpush1.bf16.msra.mxu0 %v6984_v12  ;;  %5276 = vmatpush1.bf16.msra.mxu1 %v6987_v54  ;;  %v7059_v12 = vld [vmem:[#allocation13 + $0xe8] sm:$0xff]  }
 0xb1f   :  { %5113 = vmatprep.subr.bf16.mxu0 %v6992_v55  ;;  %5277 = vmatprep.subr.bf16.mxu1 %v6995_v39  ;;  %v7060_v54 = vld [vmem:[#allocation13 + $0x28] sm:$0xff]   ;;  %v7062_v39 = vld [vmem:[#allocation13 + $0x70] sm:$0xff]  }
 0xb20   :  { %v7061_v55 = vld [vmem:[#allocation13 + $0xa8] sm:$0xff]  }
 0xb22   :  { %5114 = vmatpush1.bf16.msra.mxu0 %v6990_v56  ;;  %5278 = vmatpush1.bf16.msra.mxu1 %v6993_v59  ;;  %v7063_v56 = vld [vmem:[#allocation13 + $0xf0] sm:$0xff]  }
 0xb23   :  { %5115 = vmatprep.subr.bf16.mxu0 %v6998_v60  ;;  %5279 = vmatprep.subr.bf16.mxu1 %v7001_v13  ;;  %v7064_v59 = vld [vmem:[#allocation13 + $0x30] sm:$0xff]   ;;  %v7066_v13 = vld [vmem:[#allocation13 + $0x78] sm:$0xff]  }
 0xb24   :  { %v7065_v60 = vld [vmem:[#allocation13 + $0xb0] sm:$0xff]  }
 0xb26   :  { %5116 = vmatpush1.bf16.msra.mxu0 %v6996_v30  ;;  %5280 = vmatpush1.bf16.msra.mxu1 %v6999_v6  ;;  %v7067_v30 = vld [vmem:[#allocation13 + $0xf8] sm:$0xff]  }
 0xb27   :  { %5117 = vmatprep.subr.bf16.mxu0 %v7004_v7  ;;  %5281 = vmatprep.subr.bf16.mxu1 %v7007_v15  ;;  %v7068_v6 = vld [vmem:[#allocation13 + $0x38] sm:$0xff]   ;;  %v3672_v15 = vld [vmem:[%s7695_s16] sm:$0xf] }
 0xb28   :  { %v7069_v7 = vld [vmem:[#allocation13 + $0xb8] sm:$0xff]  }
 0xb2a   :  { %5118 = vmatpush1.bf16.msra.mxu0 %v7002_v45  ;;  %5282 = vmatpush1.bf16.msra.mxu1 %v7005_v16  ;;  %v3677_v45 = vrot.slane %v3672_v15, %v7552_v20  ;;  %v3685_v16 = vrot.slane %v3672_v15, %v7584_v62 }
 0xb2b   :  { %5119 = vmatprep.subr.bf16.mxu0 %v7010_v17  ;;  %5283 = vmatprep.subr.bf16.mxu1 %v7013_v18  ;;  %v3681_v17 = vrot.slane %v3672_v15, %v7558_v22  ;;  %v3689_v18 = vrot.slane %v3672_v15, %v7590_v1 }
 0xb2e   :  { %5120 = vmatpush1.bf16.msra.mxu0 %v7008_v21  ;;  %5284 = vmatpush1.bf16.msra.mxu1 %v7011_v23 }
 0xb2f   :  { %5121 = vmatprep.subr.bf16.mxu0 %v7016_v24  ;;  %5285 = vmatprep.subr.bf16.mxu1 %v7019_v25 }
 0xb32   :  { %5122 = vmatpush1.bf16.msra.mxu0 %v7014_v26  ;;  %5286 = vmatpush1.bf16.msra.mxu1 %v7017_v27 }
 0xb33   :  { %5123 = vmatprep.subr.bf16.mxu0 %v7022_v29  ;;  %5287 = vmatprep.subr.bf16.mxu1 %v7025_v31 }
 0xb36   :  { %5124 = vmatpush1.bf16.msra.mxu0 %v7020_v51  ;;  %5288 = vmatpush1.bf16.msra.mxu1 %v7023_v32 }
 0xb37   :  { %5125 = vmatprep.subr.bf16.mxu0 %v7028_v35  ;;  %5289 = vmatprep.subr.bf16.mxu1 %v7031_v36 }
 0xb3a   :  { %5126 = vmatpush1.bf16.msra.mxu0 %v7026_v37  ;;  %5290 = vmatpush1.bf16.msra.mxu1 %v7029_v38 }
 0xb3b   :  { %5127 = vmatprep.subr.bf16.mxu0 %v7034_v40  ;;  %5291 = vmatprep.subr.bf16.mxu1 %v7037_v41  ;;  %v6292_v41 = vld [vmem:[%s7696_s17] ss:$0 sm:$0xff] }
 0xb3e   :  { %5128 = vmatpush1.bf16.msra.mxu0 %v7032_v58  ;;  %5292 = vmatpush1.bf16.msra.mxu1 %v7035_v52 }
 0xb3f   :  { %6354 = vmatprep.subr.bf16.mxu0 %v7038_v34  ;;  %6376 = vmatprep.subr.bf16.mxu1 %v7039_v43 }
 0xb41   :  { %5130 = vmatmul.mubr.bf16.vlgmr.msra.gmra.mrb[40].mxu0 %v3414_v48  ;;  %5294 = vmatmul.mubr.bf16.vlgmr.msra.gmra.mrb[36].mxu1 %v3414_v48 }
 0xb42   :  { %6355 = vmatpush3.bf16.msra.mxu0 %v7040_v46  ;;  %6377 = vmatpush3.bf16.msra.mxu1 %v7041_v47 }
 0xb43   :  { %6356 = vmatprep.subr.bf16.mxu0 %v7042_v14  ;;  %6378 = vmatprep.subr.bf16.mxu1 %v7043_v49 }
 0xb46   :  { %6357 = vmatpush3.bf16.msra.mxu0 %v7044_v8  ;;  %6379 = vmatpush3.bf16.msra.mxu1 %v7045_v50 }
 0xb47   :  { %6358 = vmatprep.subr.bf16.mxu0 %v7046_v53  ;;  %6380 = vmatprep.subr.bf16.mxu1 %v7047_v57 }
 0xb4a   :  { %6359 = vmatpush3.bf16.msra.mxu0 %v7048_v61  ;;  %6381 = vmatpush3.bf16.msra.mxu1 %v7049_v63 }
 0xb4b   :  { %6360 = vmatprep.subr.bf16.mxu0 %v7050_v4  ;;  %6382 = vmatprep.subr.bf16.mxu1 %v7051_v5 }
 0xb4e   :  { %6361 = vmatpush3.bf16.msra.mxu0 %v7052_v9  ;;  %6383 = vmatpush3.bf16.msra.mxu1 %v7053_v0 }
 0xb4f   :  { %6362 = vmatprep.subr.bf16.mxu0 %v7054_v44  ;;  %6384 = vmatprep.subr.bf16.mxu1 %v7055_v10 }
 0xb52   :  { %6363 = vmatpush3.bf16.msra.mxu0 %v7056_v2  ;;  %6385 = vmatpush3.bf16.msra.mxu1 %v7057_v3 }
 0xb53   :  { %6364 = vmatprep.subr.bf16.mxu0 %v7058_v11  ;;  %6386 = vmatprep.subr.bf16.mxu1 %v7059_v12 }
 0xb56   :  { %6365 = vmatpush3.bf16.msra.mxu0 %v7060_v54  ;;  %6387 = vmatpush3.bf16.msra.mxu1 %v7061_v55 }
 0xb57   :  { %6366 = vmatprep.subr.bf16.mxu0 %v7062_v39  ;;  %6388 = vmatprep.subr.bf16.mxu1 %v7063_v56 }
 0xb5a   :  { %6367 = vmatpush3.bf16.msra.mxu0 %v7064_v59  ;;  %6389 = vmatpush3.bf16.msra.mxu1 %v7065_v60 }
 0xb5b   :  { %6368 = vmatprep.subr.bf16.mxu0 %v7066_v13  ;;  %6390 = vmatprep.subr.bf16.mxu1 %v7067_v30 }
 0xb5e   :  { %6369 = vmatpush3.bf16.msra.mxu0 %v7068_v6  ;;  %6391 = vmatpush3.bf16.msra.mxu1 %v7069_v7 }
 0xc14   :  { %v5131_v21 = vpop.f32.mrb[40].mxu0  ;;  %v5295_v23 = vpop.f32.mrb[36].mxu1 }
 0xc15   :  { %v6464_v24 = vadd.f32 %v5131_v21, %v3677_v45  ;;  %v6466_v25 = vadd.f32 %v5295_v23, %v3685_v16  ;;  %v5133_v26 = vpop.f32.mrb[41].mxu0  ;;  %v5297_v27 = vpop.f32.mrb[37].mxu1 }
 0xc16   :  { %v6465_v28 = vadd.f32 %v5133_v26, %v3681_v17  ;;  %v6467_v29 = vadd.f32 %v5297_v27, %v3689_v18  ;;  %v5135_v31 = vpop.f32.mrb[42].mxu0  ;;  %v5299_v51 = vpop.f32.mrb[38].mxu1 }
 0xc17   :  { %v5302_v32 = vmax.f32 %v6464_v24, 0.0  ;;  %v5304_v33 = vmax.f32 %v6466_v25, 0.0  ;;  %v5136_v35 = vpop.f32.mrb[43].mxu0  ;;  %v5300_v20 = vpop.f32.mrb[39].mxu1 }
 0xc18   :  { %v5303_v36 = vmax.f32 %v6465_v28, 0.0  ;;  %v5305_v62 = vmax.f32 %v6467_v29, 0.0 }
 0xc19   :  { %v5306_v38 = vpack.c.bf16 %v5302_v32, %v5302_v32  ;;  %v5308_v1 = vpack.c.bf16 %v5304_v33, %v5304_v33 }
 0xc1a   :  { %v5307_v37 = vpack.c.bf16 %v5303_v36, %v5303_v36  ;;  %v5309_v22 = vpack.c.bf16 %v5305_v62, %v5305_v62 }
 0xc1c   :  { %5605 = vmatprep.mubr.bf16.mxu0 %v5307_v37  ;;  %5645 = vmatprep.mubr.bf16.mxu1 %v5309_v22 }
 0xc1d   :  { %5606 = vmatmul.mubr.bf16.vlgmr.msra.gmra.mrb[44].mxu0 %v5306_v38  ;;  %5646 = vmatmul.mubr.bf16.vlgmr.msra.gmra.mrb[40].mxu1 %v5308_v1 }
 0xcf0   :  { %v6370_v19 = vpop.f32.mrb[44].mxu0  ;;  %v6392_v40 = vpop.f32.mrb[40].mxu1 }
 0xcf1   :  { %v6371_v58 = vpop.f32.mrb[45].mxu0  ;;  %v6393_v52 = vpop.f32.mrb[41].mxu1 }
 0xcf2   :  { %v6372_v42 = vadd.f32 %v6371_v58, %v6370_v19  ;;  %v6394_v34 = vadd.f32 %v6393_v52, %v6392_v40  ;;  %v6373_v43 = vpop.f32.mrb[46].mxu0  ;;  %v6395_v46 = vpop.f32.mrb[42].mxu1 }
 0xcf3   :  { %v6374_v47 = vpop.f32.mrb[47].mxu0  ;;  %v6396_v48 = vpop.f32.mrb[43].mxu1 }
 0xcf4   :  { %v5608_v14 = vadd.f32 %v6372_v42, %v6292_v41 }
 0xcf6   :  { %v5648_v49 = vadd.f32 %v6394_v34, %v5608_v14 }
 0xcf8   :  { %5653 = vst [vmem:[#allocation14] sm:$0x3] %v5648_v49 }
 0xcf9   :  { %7237 = shalt.err (!%p7234_p4)
}
 0xcfa   :  { %s7238_s23 = scalar_lea.hbm %s7697_s18, 32 }
 0xcfb   :  { %p7239_p5 = scmp.ne.s32.totalorder %s7697_s18, %s7238_s23  ;;  %p7242_p6 = scmp.lt.u32.totalorder %s7238_s23, %s7697_s18 }
 0xcfd   :  { %p7244_p7 = pnand %p7242_p6, %p7239_p5 }
 0xcff   :  { %7247 = shalt.err (!%p7244_p7)
}
 0xd00   :  { %5663 = dma.vmem_to_hbm [thread:$0]  %s5661_s21, 32, %s7697_s18, [#allocation4]  }
 0xd01   :  { %7256 = dma.done.wait [#allocation4], 32  }
 0xd02   :  { %7257 = vsyncadd [#allocation4], 4294967264 }
 0xd03   :  { %5667 = vsyncpa [#allocation3], 1 }
 0xd04   :  { %5668 = vsyncpa [#allocation6], 1 }
 0xd05   :  { %5669 = vsyncpa [#allocation9], 1 }
 0xd06   :  { %5670 = vsyncpa [#allocation12], 1 }
 0xd07   :  { %5671 = vsyncpa [#allocation4], 1 }

</bundles_post_ra>
